<compile_context>
chip_gen: v5e
topology: v5e:2x2
jax: 0.10.0
libtpu: 0.0.40
codegen_flags: <defaults>
</compile_context>

<pallas_src>
from functools import partial

import jax
import jax.numpy as jnp
from jax import lax
from jax.experimental import pallas as pl
from jax.experimental.pallas import tpu as pltpu


def _round_up(x, m):
    return (x + m - 1) // m * m


# ---------------------------------------------------------------------------
# In-kernel helpers
# ---------------------------------------------------------------------------
def _lstm_stack_step(x, w_ref, b_ref, h_ref, c_ref):
    """One time step through all stacked LSTM layers.

    x:      [B_pad, IN_pad] bf16 input (layer 0)
    w_ref:  [n_layers, IN_pad + H_pad, 4*H_pad] bf16 ([w_ih; w_hh], gate-padded)
    b_ref:  [n_layers, 1, 4*H_pad] f32 (b_ih + b_hh, gate-padded)
    h_ref / c_ref: [n_layers, B_pad, H_pad] f32 state refs (read + write)
    Returns the top-layer hidden state as bf16 [B_pad, H_pad].
    """
    n_layers = w_ref.shape[0]
    hp = h_ref.shape[-1]
    in_pad = w_ref.shape[1] - hp
    for l in range(n_layers):
        if x.shape[-1] < in_pad:  # static no-op at these shapes
            x = jnp.concatenate(
                [x, jnp.zeros((x.shape[0], in_pad - x.shape[-1]), x.dtype)], axis=-1)
        h_prev = h_ref[l]
        c_prev = c_ref[l]
        xh = jnp.concatenate([x, h_prev.astype(jnp.bfloat16)], axis=-1)
        gates = (jnp.dot(xh, w_ref[l], preferred_element_type=jnp.float32)
                 + b_ref[l])
        i = jax.nn.sigmoid(gates[:, 0 * hp:1 * hp])
        f = jax.nn.sigmoid(gates[:, 1 * hp:2 * hp])
        g = jnp.tanh(gates[:, 2 * hp:3 * hp])
        o = jax.nn.sigmoid(gates[:, 3 * hp:4 * hp])
        c_new = f * c_prev + i * g
        h_new = o * jnp.tanh(c_new)
        h_ref[l] = h_new
        c_ref[l] = c_new
        x = h_new.astype(jnp.bfloat16)
    return x


# ---------------------------------------------------------------------------
# Encoder kernel: whole source sequence in one gridded pallas_call
# ---------------------------------------------------------------------------
def _encoder_kernel(emb_ref, w_ref, b_ref, h_ref, c_ref):
    t = pl.program_id(0)

    @pl.when(t == 0)
    def _():
        h_ref[...] = jnp.zeros_like(h_ref)
        c_ref[...] = jnp.zeros_like(c_ref)

    x = emb_ref[0]  # [B_pad, IN_pad] bf16
    _lstm_stack_step(x, w_ref, b_ref, h_ref, c_ref)


def encoder_forward(params, src_pad):
    src_len, b_pad = src_pad.shape
    n_layers = params["enc_w"].shape[0]
    h_pad = params["enc_w"].shape[2] // 4
    emb = jnp.take(params["enc_emb"], src_pad, axis=0)  # [src_len, B_pad, IN_pad] bf16

    grid_spec = pltpu.PrefetchScalarGridSpec(
        num_scalar_prefetch=0,
        grid=(src_len,),
        in_specs=[
            pl.BlockSpec((1, b_pad, emb.shape[-1]), lambda t: (t, 0, 0)),
            pl.BlockSpec(params["enc_w"].shape, lambda t: (0, 0, 0)),
            pl.BlockSpec(params["enc_b"].shape, lambda t: (0, 0, 0)),
        ],
        out_specs=(
            pl.BlockSpec((n_layers, b_pad, h_pad), lambda t: (0, 0, 0)),
            pl.BlockSpec((n_layers, b_pad, h_pad), lambda t: (0, 0, 0)),
        ),
    )
    return pl.pallas_call(
        _encoder_kernel,
        grid_spec=grid_spec,
        out_shape=(jax.ShapeDtypeStruct((n_layers, b_pad, h_pad), jnp.float32),
                   jax.ShapeDtypeStruct((n_layers, b_pad, h_pad), jnp.float32)),
        compiler_params=pltpu.CompilerParams(dimension_semantics=("arbitrary",)),
    )(emb, params["enc_w"], params["enc_b"])


# ---------------------------------------------------------------------------
# Decoder kernel: whole target loop (embed -> LSTM stack -> fc_out -> argmax
# -> teacher-force select) in one gridded pallas_call
# ---------------------------------------------------------------------------
def _decoder_kernel(trg_ref, tf_ref,                       # scalar prefetch (SMEM)
                    emb_tbl_ref, w_ref, b_ref, fcw_ref, fcb_ref, h0_ref, c0_ref,
                    out_ref,                               # [1, B_pad, V_pad]
                    h_ref, c_ref, oh_ref):                 # scratch
    s = pl.program_id(0)
    t = s + 1
    b_pad, v_pad = oh_ref.shape
    row_iota = lax.broadcasted_iota(jnp.int32, (b_pad, 1), 0)
    col_iota = lax.broadcasted_iota(jnp.int32, (b_pad, v_pad), 1)

    def onehot_from_trg(row):
        tok_col = jnp.zeros((b_pad, 1), jnp.int32)
        for b in range(b_pad):
            tok_col = tok_col + jnp.where(row_iota == b, trg_ref[row, b], 0)
        return (col_iota == tok_col).astype(jnp.float32)

    @pl.when(s == 0)
    def _():
        h_ref[...] = h0_ref[...]
        c_ref[...] = c0_ref[...]
        oh_ref[...] = onehot_from_trg(0)   # input = trg[0]

    # Embedding lookup as one-hot @ table (gather-free, MXU friendly at V_pad=128).
    x = jnp.dot(oh_ref[...].astype(jnp.bfloat16), emb_tbl_ref[...],
                preferred_element_type=jnp.float32).astype(jnp.bfloat16)

    top_h = _lstm_stack_step(x, w_ref, b_ref, h_ref, c_ref)   # bf16 [B_pad, H_pad]

    logits = (jnp.dot(top_h, fcw_ref[...], preferred_element_type=jnp.float32)
              + fcb_ref[...])                                  # [B_pad, V_pad] f32
    out_ref[0] = logits

    # Next-step input: teacher force (trg[t]) vs greedy argmax of logits.
    m = jnp.max(logits, axis=1, keepdims=True)
    idx = jnp.min(jnp.where(logits >= m, col_iota, v_pad), axis=1, keepdims=True)
    pred_oh = (col_iota == idx).astype(jnp.float32)
    sel = (tf_ref[t] != 0).astype(jnp.float32)
    oh_ref[...] = sel * onehot_from_trg(t) + (1.0 - sel) * pred_oh


def decoder_forward(params, trg_pad, tf_mask, enc_h, enc_c):
    trg_len, b_pad = trg_pad.shape
    n_layers = params["dec_w"].shape[0]
    h_pad = params["dec_w"].shape[2] // 4
    v_pad = params["dec_emb"].shape[0]
    steps = trg_len - 1

    grid_spec = pltpu.PrefetchScalarGridSpec(
        num_scalar_prefetch=2,
        grid=(steps,),
        in_specs=[
            pl.BlockSpec(params["dec_emb"].shape, lambda s, *_: (0, 0)),
            pl.BlockSpec(params["dec_w"].shape, lambda s, *_: (0, 0, 0)),
            pl.BlockSpec(params["dec_b"].shape, lambda s, *_: (0, 0, 0)),
            pl.BlockSpec(params["fc_w"].shape, lambda s, *_: (0, 0)),
            pl.BlockSpec(params["fc_b"].shape, lambda s, *_: (0, 0)),
            pl.BlockSpec(enc_h.shape, lambda s, *_: (0, 0, 0)),
            pl.BlockSpec(enc_c.shape, lambda s, *_: (0, 0, 0)),
        ],
        out_specs=pl.BlockSpec((1, b_pad, v_pad), lambda s, *_: (s, 0, 0)),
        scratch_shapes=[
            pltpu.VMEM((n_layers, b_pad, h_pad), jnp.float32),   # h state
            pltpu.VMEM((n_layers, b_pad, h_pad), jnp.float32),   # c state
            pltpu.VMEM((b_pad, v_pad), jnp.float32),             # current input one-hot
        ],
    )
    return pl.pallas_call(
        _decoder_kernel,
        grid_spec=grid_spec,
        out_shape=jax.ShapeDtypeStruct((steps, b_pad, v_pad), jnp.float32),
        compiler_params=pltpu.CompilerParams(dimension_semantics=("arbitrary",)),
    )(trg_pad, tf_mask, params["dec_emb"], params["dec_w"], params["dec_b"],
      params["fc_w"], params["fc_b"], enc_h, enc_c)


# ---------------------------------------------------------------------------
# Full forward (jitted)
# ---------------------------------------------------------------------------
@partial(jax.jit, static_argnames=("trg_vocab",))
def seq2seq_forward(params, src, trg, teacher_force_mask, *, trg_vocab):
    """Mirrors Seq2Seq.forward. outputs[0] stays zero, as in the reference."""
    trg_len, batch = trg.shape
    b_pad = _round_up(batch, 8)
    src_pad = jnp.pad(src, ((0, 0), (0, b_pad - batch)))
    trg_pad = jnp.pad(trg, ((0, 0), (0, b_pad - batch)))
    tf_i32 = teacher_force_mask.astype(jnp.int32)

    enc_h, enc_c = encoder_forward(params, src_pad)
    dec_out = decoder_forward(params, trg_pad, tf_i32, enc_h, enc_c)

    body = dec_out[:, :batch, :trg_vocab]
    zeros0 = jnp.zeros((1, batch, trg_vocab), jnp.float32)
    return jnp.concatenate([zeros0, body], axis=0)   # [trg_len, B, V_trg]


# ---------------------------------------------------------------------------
# Deterministic parameter initialization (padded / fused / bf16 layout)
# ---------------------------------------------------------------------------
def init_params(key, src_vocab, trg_vocab, emb_dim, hid_dim, n_layers):
    def uni(k, shape, scale):
        return jax.random.uniform(k, shape, jnp.float32, -scale, scale)

    e_pad = _round_up(emb_dim, 128)
    h_pad = _round_up(hid_dim, 128)
    v_pad = _round_up(trg_vocab, 128)
    in_pad = max(e_pad, h_pad)

    n_keys = 4 + 8 * n_layers
    keys = iter(jax.random.split(key, n_keys))
    scale = 1.0 / (hid_dim ** 0.5)

    enc_emb = uni(next(keys), (src_vocab, emb_dim), 0.1)
    dec_emb = uni(next(keys), (trg_vocab, emb_dim), 0.1)

    def make_stack(in_dim):
        w_all = jnp.zeros((n_layers, in_pad + h_pad, 4 * h_pad), jnp.float32)
        b_all = jnp.zeros((n_layers, 1, 4 * h_pad), jnp.float32)
        d = in_dim
        for l in range(n_layers):
            w_ih = uni(next(keys), (d, 4 * hid_dim), scale)
            w_hh = uni(next(keys), (hid_dim, 4 * hid_dim), scale)
            bias = (uni(next(keys), (4 * hid_dim,), scale)
                    + uni(next(keys), (4 * hid_dim,), scale))   # b_ih + b_hh
            for g in range(4):
                w_all = w_all.at[l, :d, g * h_pad:g * h_pad + hid_dim].set(
                    w_ih[:, g * hid_dim:(g + 1) * hid_dim])
                w_all = w_all.at[l, in_pad:in_pad + hid_dim,
                                 g * h_pad:g * h_pad + hid_dim].set(
                    w_hh[:, g * hid_dim:(g + 1) * hid_dim])
                b_all = b_all.at[l, 0, g * h_pad:g * h_pad + hid_dim].set(
                    bias[g * hid_dim:(g + 1) * hid_dim])
            d = hid_dim
        return w_all.astype(jnp.bfloat16), b_all   # bias stays f32

    enc_w, enc_b = make_stack(emb_dim)
    dec_w, dec_b = make_stack(emb_dim)

    fc_w = uni(next(keys), (hid_dim, trg_vocab), scale)
    fc_b = uni(next(keys), (trg_vocab,), scale)
    fc_w_pad = jnp.zeros((h_pad, v_pad), jnp.float32).at[:hid_dim, :trg_vocab].set(fc_w)
    # -1e30 bias on padded vocab lanes => padded logits never win the argmax.
    fc_b_pad = jnp.full((1, v_pad), -1e30, jnp.float32).at[0, :trg_vocab].set(fc_b)

    enc_emb_pad = jnp.zeros((src_vocab, in_pad), jnp.float32).at[:, :emb_dim].set(enc_emb)
    dec_emb_pad = jnp.zeros((v_pad, in_pad), jnp.float32).at[:trg_vocab, :emb_dim].set(dec_emb)

    return dict(
        enc_emb=enc_emb_pad.astype(jnp.bfloat16),
        dec_emb=dec_emb_pad.astype(jnp.bfloat16),
        enc_w=enc_w, enc_b=enc_b,
        dec_w=dec_w, dec_b=dec_b,
        fc_w=fc_w_pad.astype(jnp.bfloat16), fc_b=fc_b_pad)


# ---------------------------------------------------------------------------
if __name__ == "__main__":
    SRC_VOCAB, TRG_VOCAB = 30, 25
    EMB_DIM, HID_DIM, N_LAYERS = 16, 32, 2
    SRC_LEN, TRG_LEN, BATCH = 7, 8, 2
    TEACHER_FORCING_RATIO = 0.5

    root = jax.random.PRNGKey(0)
    k_par, k_src, k_trg, k_tf = jax.random.split(root, 4)

    params = init_params(k_par, SRC_VOCAB, TRG_VOCAB, EMB_DIM, HID_DIM, N_LAYERS)

    src = jax.random.randint(k_src, (SRC_LEN, BATCH), 0, SRC_VOCAB, dtype=jnp.int32)
    trg = jax.random.randint(k_trg, (TRG_LEN, BATCH), 0, TRG_VOCAB, dtype=jnp.int32)

    # Deterministic stand-in for python `random.random() < teacher_forcing_ratio`.
    teacher_force_mask = jax.random.bernoulli(k_tf, TEACHER_FORCING_RATIO, (TRG_LEN,))

    outputs = seq2seq_forward(params, src, trg, teacher_force_mask,
                              trg_vocab=TRG_VOCAB)
    jax.block_until_ready(outputs)

    assert outputs.shape == (TRG_LEN, BATCH, TRG_VOCAB)
    assert outputs.dtype == jnp.float32
    print("KERNEL_OK")
</pallas_src>

<mosaic_0001>
module attributes {stable_mosaic.version = 11 : i64} {
  func.func @_encoder_kernel(%arg0: i32, %arg1: memref<1x8x128xbf16, #tpu.memory_space<vmem>>, %arg2: memref<2x256x512xbf16, #tpu.memory_space<vmem>>, %arg3: memref<2x1x512xf32, #tpu.memory_space<vmem>>, %arg4: memref<2x8x128xf32, #tpu.memory_space<vmem>>, %arg5: memref<2x8x128xf32, #tpu.memory_space<vmem>>) attributes {dimension_semantics = [#tpu.dimension_semantics<arbitrary>], iteration_bounds = array<i64: 7>, scalar_prefetch = 0 : i64, scratch_operands = 0 : i64, tpu.core_type = #tpu.core_type<tc>, window_params = [{transform_indices = @transform_0, window_bounds = array<i64: 1, 8, 128>}, {pipeline_mode = #tpu.pipeline_mode<synchronous>, transform_indices = @transform_1, window_bounds = array<i64: 2, 256, 512>}, {pipeline_mode = #tpu.pipeline_mode<synchronous>, transform_indices = @transform_2, window_bounds = array<i64: 2, 1, 512>}, {pipeline_mode = #tpu.pipeline_mode<synchronous>, transform_indices = @transform_3, window_bounds = array<i64: 2, 8, 128>}, {pipeline_mode = #tpu.pipeline_mode<synchronous>, transform_indices = @transform_4, window_bounds = array<i64: 2, 8, 128>}]} {
    %c0_i32 = arith.constant 0 : i32
    %0 = arith.cmpi eq, %arg0, %c0_i32 : i32
    %1 = arith.extui %0 : i1 to i32
    %c0_i32_0 = arith.constant 0 : i32
    %2 = arith.cmpi ne, %1, %c0_i32_0 : i32
    scf.if %2 {
      %cst_45 = arith.constant 0.000000e+00 : f32
      %94 = vector.broadcast %cst_45 : f32 to vector<2x8x128xf32>
      %c0_46 = arith.constant 0 : index
      %c0_47 = arith.constant 0 : index
      %c0_48 = arith.constant 0 : index
      %95 = vector.load %arg4[%c0_46, %c0_47, %c0_48] : memref<2x8x128xf32, #tpu.memory_space<vmem>>, vector<2x8x128xf32>
      tpu.vector_store %arg4[%c0_46, %c0_47, %c0_48], %94 {strides = array<i32>} : memref<2x8x128xf32, #tpu.memory_space<vmem>>, vector<2x8x128xf32>,
      %cst_49 = arith.constant 0.000000e+00 : f32
      %96 = vector.broadcast %cst_49 : f32 to vector<2x8x128xf32>
      %c0_50 = arith.constant 0 : index
      %c0_51 = arith.constant 0 : index
      %c0_52 = arith.constant 0 : index
      %97 = vector.load %arg5[%c0_50, %c0_51, %c0_52] : memref<2x8x128xf32, #tpu.memory_space<vmem>>, vector<2x8x128xf32>
      tpu.vector_store %arg5[%c0_50, %c0_51, %c0_52], %96 {strides = array<i32>} : memref<2x8x128xf32, #tpu.memory_space<vmem>>, vector<2x8x128xf32>,
    } else {
    }
    %c0 = arith.constant 0 : index
    %c0_1 = arith.constant 0 : index
    %c0_2 = arith.constant 0 : index
    %3 = vector.load %arg1[%c0, %c0_1, %c0_2] : memref<1x8x128xbf16, #tpu.memory_space<vmem>>, vector<1x8x128xbf16>
    %4 = vector.shape_cast %3 : vector<1x8x128xbf16> to vector<8x128xbf16>
    %c0_3 = arith.constant 0 : index
    %c0_4 = arith.constant 0 : index
    %c0_5 = arith.constant 0 : index
    %5 = vector.load %arg4[%c0_3, %c0_4, %c0_5] : memref<2x8x128xf32, #tpu.memory_space<vmem>>, vector<1x8x128xf32>
    %6 = vector.shape_cast %5 : vector<1x8x128xf32> to vector<8x128xf32>
    %c0_6 = arith.constant 0 : index
    %c0_7 = arith.constant 0 : index
    %c0_8 = arith.constant 0 : index
    %7 = vector.load %arg5[%c0_6, %c0_7, %c0_8] : memref<2x8x128xf32, #tpu.memory_space<vmem>>, vector<1x8x128xf32>
    %8 = vector.shape_cast %7 : vector<1x8x128xf32> to vector<8x128xf32>
    %9 = arith.truncf %6 : vector<8x128xf32> to vector<8x128xbf16>
    %10 = tpu.concatenate %4, %9 in 1 : vector<8x128xbf16>, vector<8x128xbf16> -> vector<8x256xbf16>
    %c0_9 = arith.constant 0 : index
    %c0_10 = arith.constant 0 : index
    %c0_11 = arith.constant 0 : index
    %11 = vector.load %arg2[%c0_9, %c0_10, %c0_11] : memref<2x256x512xbf16, #tpu.memory_space<vmem>>, vector<1x256x512xbf16>
    %12 = vector.shape_cast %11 : vector<1x256x512xbf16> to vector<256x512xbf16>
    %cst = arith.constant dense<0.000000e+00> : vector<8x512xf32>
    %13 = tpu.matmul %10, %12, %cst {dimension_numbers = #tpu.dot_dimension_numbers<[1], [0], [0], [1], [0, 0, 1, 1], [], []>} : vector<8x256xbf16>, vector<256x512xbf16>, vector<8x512xf32> -> vector<8x512xf32>
    %c0_12 = arith.constant 0 : index
    %c0_13 = arith.constant 0 : index
    %c0_14 = arith.constant 0 : index
    %14 = vector.load %arg3[%c0_12, %c0_13, %c0_14] : memref<2x1x512xf32, #tpu.memory_space<vmem>>, vector<1x1x512xf32>
    %15 = vector.shape_cast %14 : vector<1x1x512xf32> to vector<1x512xf32>
    %16 = vector.broadcast %15 : vector<1x512xf32> to vector<8x512xf32>
    %17 = arith.addf %13, %16 : vector<8x512xf32>
    %18 = vector.extract_strided_slice %17 {offsets = [0, 0], sizes = [8, 128], strides = [1, 1]} : vector<8x512xf32> to vector<8x128xf32>
    %19 = arith.negf %18 : vector<8x128xf32>
    %20 = math.exp %19 : vector<8x128xf32>
    %cst_15 = arith.constant 1.000000e+00 : f32
    %21 = vector.broadcast %cst_15 : f32 to vector<8x128xf32>
    %22 = arith.addf %21, %20 : vector<8x128xf32>
    %23 = arith.divf %21, %22 : vector<8x128xf32>
    %24 = vector.extract_strided_slice %17 {offsets = [0, 128], sizes = [8, 128], strides = [1, 1]} : vector<8x512xf32> to vector<8x128xf32>
    %25 = arith.negf %24 : vector<8x128xf32>
    %26 = math.exp %25 : vector<8x128xf32>
    %cst_16 = arith.constant 1.000000e+00 : f32
    %27 = vector.broadcast %cst_16 : f32 to vector<8x128xf32>
    %28 = arith.addf %27, %26 : vector<8x128xf32>
    %29 = arith.divf %27, %28 : vector<8x128xf32>
    %30 = vector.extract_strided_slice %17 {offsets = [0, 256], sizes = [8, 128], strides = [1, 1]} : vector<8x512xf32> to vector<8x128xf32>
    %31 = math.tanh %30 : vector<8x128xf32>
    %32 = vector.extract_strided_slice %17 {offsets = [0, 384], sizes = [8, 128], strides = [1, 1]} : vector<8x512xf32> to vector<8x128xf32>
    %33 = arith.negf %32 : vector<8x128xf32>
    %34 = math.exp %33 : vector<8x128xf32>
    %cst_17 = arith.constant 1.000000e+00 : f32
    %35 = vector.broadcast %cst_17 : f32 to vector<8x128xf32>
    %36 = arith.addf %35, %34 : vector<8x128xf32>
    %37 = arith.divf %35, %36 : vector<8x128xf32>
    %38 = arith.mulf %29, %8 : vector<8x128xf32>
    %39 = arith.mulf %23, %31 : vector<8x128xf32>
    %40 = arith.addf %38, %39 : vector<8x128xf32>
    %41 = math.tanh %40 : vector<8x128xf32>
    %42 = arith.mulf %37, %41 : vector<8x128xf32>
    %c0_18 = arith.constant 0 : index
    %c0_19 = arith.constant 0 : index
    %c0_20 = arith.constant 0 : index
    %43 = vector.load %arg4[%c0_18, %c0_19, %c0_20] : memref<2x8x128xf32, #tpu.memory_space<vmem>>, vector<1x8x128xf32>
    %44 = vector.shape_cast %43 : vector<1x8x128xf32> to vector<8x128xf32>
    %45 = vector.shape_cast %42 : vector<8x128xf32> to vector<1x8x128xf32>
    tpu.vector_store %arg4[%c0_18, %c0_19, %c0_20], %45 {strides = array<i32>} : memref<2x8x128xf32, #tpu.memory_space<vmem>>, vector<1x8x128xf32>,
    %c0_21 = arith.constant 0 : index
    %c0_22 = arith.constant 0 : index
    %c0_23 = arith.constant 0 : index
    %46 = vector.load %arg5[%c0_21, %c0_22, %c0_23] : memref<2x8x128xf32, #tpu.memory_space<vmem>>, vector<1x8x128xf32>
    %47 = vector.shape_cast %46 : vector<1x8x128xf32> to vector<8x128xf32>
    %48 = vector.shape_cast %40 : vector<8x128xf32> to vector<1x8x128xf32>
    tpu.vector_store %arg5[%c0_21, %c0_22, %c0_23], %48 {strides = array<i32>} : memref<2x8x128xf32, #tpu.memory_space<vmem>>, vector<1x8x128xf32>,
    %49 = arith.truncf %42 : vector<8x128xf32> to vector<8x128xbf16>
    %c1 = arith.constant 1 : index
    %c0_24 = arith.constant 0 : index
    %c0_25 = arith.constant 0 : index
    %50 = vector.load %arg4[%c1, %c0_24, %c0_25] : memref<2x8x128xf32, #tpu.memory_space<vmem>>, vector<1x8x128xf32>
    %51 = vector.shape_cast %50 : vector<1x8x128xf32> to vector<8x128xf32>
    %c1_26 = arith.constant 1 : index
    %c0_27 = arith.constant 0 : index
    %c0_28 = arith.constant 0 : index
    %52 = vector.load %arg5[%c1_26, %c0_27, %c0_28] : memref<2x8x128xf32, #tpu.memory_space<vmem>>, vector<1x8x128xf32>
    %53 = vector.shape_cast %52 : vector<1x8x128xf32> to vector<8x128xf32>
    %54 = arith.truncf %51 : vector<8x128xf32> to vector<8x128xbf16>
    %55 = tpu.concatenate %49, %54 in 1 : vector<8x128xbf16>, vector<8x128xbf16> -> vector<8x256xbf16>
    %c1_29 = arith.constant 1 : index
    %c0_30 = arith.constant 0 : index
    %c0_31 = arith.constant 0 : index
    %56 = vector.load %arg2[%c1_29, %c0_30, %c0_31] : memref<2x256x512xbf16, #tpu.memory_space<vmem>>, vector<1x256x512xbf16>
    %57 = vector.shape_cast %56 : vector<1x256x512xbf16> to vector<256x512xbf16>
    %cst_32 = arith.constant dense<0.000000e+00> : vector<8x512xf32>
    %58 = tpu.matmul %55, %57, %cst_32 {dimension_numbers = #tpu.dot_dimension_numbers<[1], [0], [0], [1], [0, 0, 1, 1], [], []>} : vector<8x256xbf16>, vector<256x512xbf16>, vector<8x512xf32> -> vector<8x512xf32>
    %c1_33 = arith.constant 1 : index
    %c0_34 = arith.constant 0 : index
    %c0_35 = arith.constant 0 : index
    %59 = vector.load %arg3[%c1_33, %c0_34, %c0_35] : memref<2x1x512xf32, #tpu.memory_space<vmem>>, vector<1x1x512xf32>
    %60 = vector.shape_cast %59 : vector<1x1x512xf32> to vector<1x512xf32>
    %61 = vector.broadcast %60 : vector<1x512xf32> to vector<8x512xf32>
    %62 = arith.addf %58, %61 : vector<8x512xf32>
    %63 = vector.extract_strided_slice %62 {offsets = [0, 0], sizes = [8, 128], strides = [1, 1]} : vector<8x512xf32> to vector<8x128xf32>
    %64 = arith.negf %63 : vector<8x128xf32>
    %65 = math.exp %64 : vector<8x128xf32>
    %cst_36 = arith.constant 1.000000e+00 : f32
    %66 = vector.broadcast %cst_36 : f32 to vector<8x128xf32>
    %67 = arith.addf %66, %65 : vector<8x128xf32>
    %68 = arith.divf %66, %67 : vector<8x128xf32>
    %69 = vector.extract_strided_slice %62 {offsets = [0, 128], sizes = [8, 128], strides = [1, 1]} : vector<8x512xf32> to vector<8x128xf32>
    %70 = arith.negf %69 : vector<8x128xf32>
    %71 = math.exp %70 : vector<8x128xf32>
    %cst_37 = arith.constant 1.000000e+00 : f32
    %72 = vector.broadcast %cst_37 : f32 to vector<8x128xf32>
    %73 = arith.addf %72, %71 : vector<8x128xf32>
    %74 = arith.divf %72, %73 : vector<8x128xf32>
    %75 = vector.extract_strided_slice %62 {offsets = [0, 256], sizes = [8, 128], strides = [1, 1]} : vector<8x512xf32> to vector<8x128xf32>
    %76 = math.tanh %75 : vector<8x128xf32>
    %77 = vector.extract_strided_slice %62 {offsets = [0, 384], sizes = [8, 128], strides = [1, 1]} : vector<8x512xf32> to vector<8x128xf32>
    %78 = arith.negf %77 : vector<8x128xf32>
    %79 = math.exp %78 : vector<8x128xf32>
    %cst_38 = arith.constant 1.000000e+00 : f32
    %80 = vector.broadcast %cst_38 : f32 to vector<8x128xf32>
    %81 = arith.addf %80, %79 : vector<8x128xf32>
    %82 = arith.divf %80, %81 : vector<8x128xf32>
    %83 = arith.mulf %74, %53 : vector<8x128xf32>
    %84 = arith.mulf %68, %76 : vector<8x128xf32>
    %85 = arith.addf %83, %84 : vector<8x128xf32>
    %86 = math.tanh %85 : vector<8x128xf32>
    %87 = arith.mulf %82, %86 : vector<8x128xf32>
    %c1_39 = arith.constant 1 : index
    %c0_40 = arith.constant 0 : index
    %c0_41 = arith.constant 0 : index
    %88 = vector.load %arg4[%c1_39, %c0_40, %c0_41] : memref<2x8x128xf32, #tpu.memory_space<vmem>>, vector<1x8x128xf32>
    %89 = vector.shape_cast %88 : vector<1x8x128xf32> to vector<8x128xf32>
    %90 = vector.shape_cast %87 : vector<8x128xf32> to vector<1x8x128xf32>
    tpu.vector_store %arg4[%c1_39, %c0_40, %c0_41], %90 {strides = array<i32>} : memref<2x8x128xf32, #tpu.memory_space<vmem>>, vector<1x8x128xf32>,
    %c1_42 = arith.constant 1 : index
    %c0_43 = arith.constant 0 : index
    %c0_44 = arith.constant 0 : index
    %91 = vector.load %arg5[%c1_42, %c0_43, %c0_44] : memref<2x8x128xf32, #tpu.memory_space<vmem>>, vector<1x8x128xf32>
    %92 = vector.shape_cast %91 : vector<1x8x128xf32> to vector<8x128xf32>
    %93 = vector.shape_cast %85 : vector<8x128xf32> to vector<1x8x128xf32>
    tpu.vector_store %arg5[%c1_42, %c0_43, %c0_44], %93 {strides = array<i32>} : memref<2x8x128xf32, #tpu.memory_space<vmem>>, vector<1x8x128xf32>,
    return
  }
  func.func @transform_0(%arg0: i32) -> (i32, i32, i32) {
    %c0_i32 = arith.constant 0 : i32
    %c0_i32_0 = arith.constant 0 : i32
    %c0_i32_1 = arith.constant 0 : i32
    return %arg0, %c0_i32, %c0_i32_0 : i32, i32, i32
  }
  func.func @transform_1(%arg0: i32) -> (i32, i32, i32) {
    %c0_i32 = arith.constant 0 : i32
    %c0_i32_0 = arith.constant 0 : i32
    %c0_i32_1 = arith.constant 0 : i32
    %c0_i32_2 = arith.constant 0 : i32
    return %c0_i32, %c0_i32_0, %c0_i32_1 : i32, i32, i32
  }
  func.func @transform_2(%arg0: i32) -> (i32, i32, i32) {
    %c0_i32 = arith.constant 0 : i32
    %c0_i32_0 = arith.constant 0 : i32
    %c0_i32_1 = arith.constant 0 : i32
    %c0_i32_2 = arith.constant 0 : i32
    return %c0_i32, %c0_i32_0, %c0_i32_1 : i32, i32, i32
  }
  func.func @transform_3(%arg0: i32) -> (i32, i32, i32) {
    %c0_i32 = arith.constant 0 : i32
    %c0_i32_0 = arith.constant 0 : i32
    %c0_i32_1 = arith.constant 0 : i32
    %c0_i32_2 = arith.constant 0 : i32
    return %c0_i32, %c0_i32_0, %c0_i32_1 : i32, i32, i32
  }
  func.func @transform_4(%arg0: i32) -> (i32, i32, i32) {
    %c0_i32 = arith.constant 0 : i32
    %c0_i32_0 = arith.constant 0 : i32
    %c0_i32_1 = arith.constant 0 : i32
    %c0_i32_2 = arith.constant 0 : i32
    return %c0_i32, %c0_i32_0, %c0_i32_1 : i32, i32, i32
  }
}

module attributes {stable_mosaic.version = 11 : i64} {
  func.func @_decoder_kernel(%arg0: i32, %arg1: memref<8x8xi32, #tpu.memory_space<smem>>, %arg2: memref<8xi32, #tpu.memory_space<smem>>, %arg3: memref<128x128xbf16, #tpu.memory_space<vmem>>, %arg4: memref<2x256x512xbf16, #tpu.memory_space<vmem>>, %arg5: memref<2x1x512xf32, #tpu.memory_space<vmem>>, %arg6: memref<128x128xbf16, #tpu.memory_space<vmem>>, %arg7: memref<1x128xf32, #tpu.memory_space<vmem>>, %arg8: memref<2x8x128xf32, #tpu.memory_space<vmem>>, %arg9: memref<2x8x128xf32, #tpu.memory_space<vmem>>, %arg10: memref<1x8x128xf32, #tpu.memory_space<vmem>>, %arg11: memref<2x8x128xf32, #tpu.memory_space<vmem>>, %arg12: memref<2x8x128xf32, #tpu.memory_space<vmem>>, %arg13: memref<8x128xf32, #tpu.memory_space<vmem>>) attributes {dimension_semantics = [#tpu.dimension_semantics<arbitrary>], iteration_bounds = array<i64: 7>, scalar_prefetch = 2 : i64, scratch_operands = 3 : i64, tpu.core_type = #tpu.core_type<tc>, window_params = [{pipeline_mode = #tpu.pipeline_mode<synchronous>, transform_indices = @transform_0, window_bounds = array<i64: 128, 128>}, {pipeline_mode = #tpu.pipeline_mode<synchronous>, transform_indices = @transform_1, window_bounds = array<i64: 2, 256, 512>}, {pipeline_mode = #tpu.pipeline_mode<synchronous>, transform_indices = @transform_2, window_bounds = array<i64: 2, 1, 512>}, {pipeline_mode = #tpu.pipeline_mode<synchronous>, transform_indices = @transform_3, window_bounds = array<i64: 128, 128>}, {pipeline_mode = #tpu.pipeline_mode<synchronous>, transform_indices = @transform_4, window_bounds = array<i64: 1, 128>}, {pipeline_mode = #tpu.pipeline_mode<synchronous>, transform_indices = @transform_5, window_bounds = array<i64: 2, 8, 128>}, {pipeline_mode = #tpu.pipeline_mode<synchronous>, transform_indices = @transform_6, window_bounds = array<i64: 2, 8, 128>}, {transform_indices = @transform_7, window_bounds = array<i64: 1, 8, 128>}]} {
    %c1_i32 = arith.constant 1 : i32
    %0 = arith.addi %arg0, %c1_i32 : i32
    %1 = tpu.iota {dimensions = array<i32: 0>} : vector<8x1xi32>
    %2 = tpu.iota {dimensions = array<i32: 1>} : vector<8x128xi32>
    %c0_i32 = arith.constant 0 : i32
    %3 = arith.cmpi eq, %arg0, %c0_i32 : i32
    %4 = arith.extui %3 : i1 to i32
    %c0_i32_0 = arith.constant 0 : i32
    %5 = arith.cmpi ne, %4, %c0_i32_0 : i32
    scf.if %5 {
      %c0_74 = arith.constant 0 : index
      %c0_75 = arith.constant 0 : index
      %c0_76 = arith.constant 0 : index
      %202 = vector.load %arg8[%c0_74, %c0_75, %c0_76] : memref<2x8x128xf32, #tpu.memory_space<vmem>>, vector<2x8x128xf32>
      %c0_77 = arith.constant 0 : index
      %c0_78 = arith.constant 0 : index
      %c0_79 = arith.constant 0 : index
      %203 = vector.load %arg11[%c0_77, %c0_78, %c0_79] : memref<2x8x128xf32, #tpu.memory_space<vmem>>, vector<2x8x128xf32>
      tpu.vector_store %arg11[%c0_77, %c0_78, %c0_79], %202 {strides = array<i32>} : memref<2x8x128xf32, #tpu.memory_space<vmem>>, vector<2x8x128xf32>,
      %c0_80 = arith.constant 0 : index
      %c0_81 = arith.constant 0 : index
      %c0_82 = arith.constant 0 : index
      %204 = vector.load %arg9[%c0_80, %c0_81, %c0_82] : memref<2x8x128xf32, #tpu.memory_space<vmem>>, vector<2x8x128xf32>
      %c0_83 = arith.constant 0 : index
      %c0_84 = arith.constant 0 : index
      %c0_85 = arith.constant 0 : index
      %205 = vector.load %arg12[%c0_83, %c0_84, %c0_85] : memref<2x8x128xf32, #tpu.memory_space<vmem>>, vector<2x8x128xf32>
      tpu.vector_store %arg12[%c0_83, %c0_84, %c0_85], %204 {strides = array<i32>} : memref<2x8x128xf32, #tpu.memory_space<vmem>>, vector<2x8x128xf32>,
      %c0_i32_86 = arith.constant 0 : i32
      %206 = vector.broadcast %c0_i32_86 : i32 to vector<8x1xi32>
      %c0_i32_87 = arith.constant 0 : i32
      %207 = vector.broadcast %c0_i32_87 : i32 to vector<8x1xi32>
      %208 = arith.cmpi eq, %1, %207 : vector<8x1xi32>
      %c0_88 = arith.constant 0 : index
      %c0_89 = arith.constant 0 : index
      %209 = memref.load %arg1[%c0_88, %c0_89] : memref<8x8xi32, #tpu.memory_space<smem>>
      %c0_i32_90 = arith.constant 0 : i32
      %210 = vector.broadcast %209 : i32 to vector<8x1xi32>
      %211 = vector.broadcast %c0_i32_90 : i32 to vector<8x1xi32>
      %212 = arith.select %208, %210, %211 : vector<8x1xi1>, vector<8x1xi32>
      %213 = arith.addi %206, %212 : vector<8x1xi32>
      %c1_i32_91 = arith.constant 1 : i32
      %214 = vector.broadcast %c1_i32_91 : i32 to vector<8x1xi32>
      %215 = arith.cmpi eq, %1, %214 : vector<8x1xi32>
      %c0_92 = arith.constant 0 : index
      %c1_93 = arith.constant 1 : index
      %216 = memref.load %arg1[%c0_92, %c1_93] : memref<8x8xi32, #tpu.memory_space<smem>>
      %c0_i32_94 = arith.constant 0 : i32
      %217 = vector.broadcast %216 : i32 to vector<8x1xi32>
      %218 = vector.broadcast %c0_i32_94 : i32 to vector<8x1xi32>
      %219 = arith.select %215, %217, %218 : vector<8x1xi1>, vector<8x1xi32>
      %220 = arith.addi %213, %219 : vector<8x1xi32>
      %c2_i32_95 = arith.constant 2 : i32
      %221 = vector.broadcast %c2_i32_95 : i32 to vector<8x1xi32>
      %222 = arith.cmpi eq, %1, %221 : vector<8x1xi32>
      %c0_96 = arith.constant 0 : index
      %c2_97 = arith.constant 2 : index
      %223 = memref.load %arg1[%c0_96, %c2_97] : memref<8x8xi32, #tpu.memory_space<smem>>
      %c0_i32_98 = arith.constant 0 : i32
      %224 = vector.broadcast %223 : i32 to vector<8x1xi32>
      %225 = vector.broadcast %c0_i32_98 : i32 to vector<8x1xi32>
      %226 = arith.select %222, %224, %225 : vector<8x1xi1>, vector<8x1xi32>
      %227 = arith.addi %220, %226 : vector<8x1xi32>
      %c3_i32_99 = arith.constant 3 : i32
      %228 = vector.broadcast %c3_i32_99 : i32 to vector<8x1xi32>
      %229 = arith.cmpi eq, %1, %228 : vector<8x1xi32>
      %c0_100 = arith.constant 0 : index
      %c3_101 = arith.constant 3 : index
      %230 = memref.load %arg1[%c0_100, %c3_101] : memref<8x8xi32, #tpu.memory_space<smem>>
      %c0_i32_102 = arith.constant 0 : i32
      %231 = vector.broadcast %230 : i32 to vector<8x1xi32>
      %232 = vector.broadcast %c0_i32_102 : i32 to vector<8x1xi32>
      %233 = arith.select %229, %231, %232 : vector<8x1xi1>, vector<8x1xi32>
      %234 = arith.addi %227, %233 : vector<8x1xi32>
      %c4_i32_103 = arith.constant 4 : i32
      %235 = vector.broadcast %c4_i32_103 : i32 to vector<8x1xi32>
      %236 = arith.cmpi eq, %1, %235 : vector<8x1xi32>
      %c0_104 = arith.constant 0 : index
      %c4_105 = arith.constant 4 : index
      %237 = memref.load %arg1[%c0_104, %c4_105] : memref<8x8xi32, #tpu.memory_space<smem>>
      %c0_i32_106 = arith.constant 0 : i32
      %238 = vector.broadcast %237 : i32 to vector<8x1xi32>
      %239 = vector.broadcast %c0_i32_106 : i32 to vector<8x1xi32>
      %240 = arith.select %236, %238, %239 : vector<8x1xi1>, vector<8x1xi32>
      %241 = arith.addi %234, %240 : vector<8x1xi32>
      %c5_i32_107 = arith.constant 5 : i32
      %242 = vector.broadcast %c5_i32_107 : i32 to vector<8x1xi32>
      %243 = arith.cmpi eq, %1, %242 : vector<8x1xi32>
      %c0_108 = arith.constant 0 : index
      %c5_109 = arith.constant 5 : index
      %244 = memref.load %arg1[%c0_108, %c5_109] : memref<8x8xi32, #tpu.memory_space<smem>>
      %c0_i32_110 = arith.constant 0 : i32
      %245 = vector.broadcast %244 : i32 to vector<8x1xi32>
      %246 = vector.broadcast %c0_i32_110 : i32 to vector<8x1xi32>
      %247 = arith.select %243, %245, %246 : vector<8x1xi1>, vector<8x1xi32>
      %248 = arith.addi %241, %247 : vector<8x1xi32>
      %c6_i32_111 = arith.constant 6 : i32
      %249 = vector.broadcast %c6_i32_111 : i32 to vector<8x1xi32>
      %250 = arith.cmpi eq, %1, %249 : vector<8x1xi32>
      %c0_112 = arith.constant 0 : index
      %c6_113 = arith.constant 6 : index
      %251 = memref.load %arg1[%c0_112, %c6_113] : memref<8x8xi32, #tpu.memory_space<smem>>
      %c0_i32_114 = arith.constant 0 : i32
      %252 = vector.broadcast %251 : i32 to vector<8x1xi32>
      %253 = vector.broadcast %c0_i32_114 : i32 to vector<8x1xi32>
      %254 = arith.select %250, %252, %253 : vector<8x1xi1>, vector<8x1xi32>
      %255 = arith.addi %248, %254 : vector<8x1xi32>
      %c7_i32_115 = arith.constant 7 : i32
      %256 = vector.broadcast %c7_i32_115 : i32 to vector<8x1xi32>
      %257 = arith.cmpi eq, %1, %256 : vector<8x1xi32>
      %c0_116 = arith.constant 0 : index
      %c7_117 = arith.constant 7 : index
      %258 = memref.load %arg1[%c0_116, %c7_117] : memref<8x8xi32, #tpu.memory_space<smem>>
      %c0_i32_118 = arith.constant 0 : i32
      %259 = vector.broadcast %258 : i32 to vector<8x1xi32>
      %260 = vector.broadcast %c0_i32_118 : i32 to vector<8x1xi32>
      %261 = arith.select %257, %259, %260 : vector<8x1xi1>, vector<8x1xi32>
      %262 = arith.addi %255, %261 : vector<8x1xi32>
      %263 = vector.broadcast %262 : vector<8x1xi32> to vector<8x128xi32>
      %264 = arith.cmpi eq, %2, %263 : vector<8x128xi32>
      %265 = arith.extui %264 : vector<8x128xi1> to vector<8x128xi32>
      %266 = arith.sitofp %265 : vector<8x128xi32> to vector<8x128xf32>
      %c0_119 = arith.constant 0 : index
      %c0_120 = arith.constant 0 : index
      %267 = vector.load %arg13[%c0_119, %c0_120] : memref<8x128xf32, #tpu.memory_space<vmem>>, vector<8x128xf32>
      tpu.vector_store %arg13[%c0_119, %c0_120], %266 {strides = array<i32>} : memref<8x128xf32, #tpu.memory_space<vmem>>, vector<8x128xf32>,
    } else {
    }
    %c0 = arith.constant 0 : index
    %c0_1 = arith.constant 0 : index
    %6 = vector.load %arg13[%c0, %c0_1] : memref<8x128xf32, #tpu.memory_space<vmem>>, vector<8x128xf32>
    %7 = arith.truncf %6 : vector<8x128xf32> to vector<8x128xbf16>
    %c0_2 = arith.constant 0 : index
    %c0_3 = arith.constant 0 : index
    %8 = vector.load %arg3[%c0_2, %c0_3] : memref<128x128xbf16, #tpu.memory_space<vmem>>, vector<128x128xbf16>
    %cst = arith.constant dense<0.000000e+00> : vector<8x128xf32>
    %9 = tpu.matmul %7, %8, %cst {dimension_numbers = #tpu.dot_dimension_numbers<[1], [0], [0], [1], [0, 0, 1, 1], [], []>} : vector<8x128xbf16>, vector<128x128xbf16>, vector<8x128xf32> -> vector<8x128xf32>
    %10 = arith.truncf %9 : vector<8x128xf32> to vector<8x128xbf16>
    %c0_4 = arith.constant 0 : index
    %c0_5 = arith.constant 0 : index
    %c0_6 = arith.constant 0 : index
    %11 = vector.load %arg11[%c0_4, %c0_5, %c0_6] : memref<2x8x128xf32, #tpu.memory_space<vmem>>, vector<1x8x128xf32>
    %12 = vector.shape_cast %11 : vector<1x8x128xf32> to vector<8x128xf32>
    %c0_7 = arith.constant 0 : index
    %c0_8 = arith.constant 0 : index
    %c0_9 = arith.constant 0 : index
    %13 = vector.load %arg12[%c0_7, %c0_8, %c0_9] : memref<2x8x128xf32, #tpu.memory_space<vmem>>, vector<1x8x128xf32>
    %14 = vector.shape_cast %13 : vector<1x8x128xf32> to vector<8x128xf32>
    %15 = arith.truncf %12 : vector<8x128xf32> to vector<8x128xbf16>
    %16 = tpu.concatenate %10, %15 in 1 : vector<8x128xbf16>, vector<8x128xbf16> -> vector<8x256xbf16>
    %c0_10 = arith.constant 0 : index
    %c0_11 = arith.constant 0 : index
    %c0_12 = arith.constant 0 : index
    %17 = vector.load %arg4[%c0_10, %c0_11, %c0_12] : memref<2x256x512xbf16, #tpu.memory_space<vmem>>, vector<1x256x512xbf16>
    %18 = vector.shape_cast %17 : vector<1x256x512xbf16> to vector<256x512xbf16>
    %cst_13 = arith.constant dense<0.000000e+00> : vector<8x512xf32>
    %19 = tpu.matmul %16, %18, %cst_13 {dimension_numbers = #tpu.dot_dimension_numbers<[1], [0], [0], [1], [0, 0, 1, 1], [], []>} : vector<8x256xbf16>, vector<256x512xbf16>, vector<8x512xf32> -> vector<8x512xf32>
    %c0_14 = arith.constant 0 : index
    %c0_15 = arith.constant 0 : index
    %c0_16 = arith.constant 0 : index
    %20 = vector.load %arg5[%c0_14, %c0_15, %c0_16] : memref<2x1x512xf32, #tpu.memory_space<vmem>>, vector<1x1x512xf32>
    %21 = vector.shape_cast %20 : vector<1x1x512xf32> to vector<1x512xf32>
    %22 = vector.broadcast %21 : vector<1x512xf32> to vector<8x512xf32>
    %23 = arith.addf %19, %22 : vector<8x512xf32>
    %24 = vector.extract_strided_slice %23 {offsets = [0, 0], sizes = [8, 128], strides = [1, 1]} : vector<8x512xf32> to vector<8x128xf32>
    %25 = arith.negf %24 : vector<8x128xf32>
    %26 = math.exp %25 : vector<8x128xf32>
    %cst_17 = arith.constant 1.000000e+00 : f32
    %27 = vector.broadcast %cst_17 : f32 to vector<8x128xf32>
    %28 = arith.addf %27, %26 : vector<8x128xf32>
    %29 = arith.divf %27, %28 : vector<8x128xf32>
    %30 = vector.extract_strided_slice %23 {offsets = [0, 128], sizes = [8, 128], strides = [1, 1]} : vector<8x512xf32> to vector<8x128xf32>
    %31 = arith.negf %30 : vector<8x128xf32>
    %32 = math.exp %31 : vector<8x128xf32>
    %cst_18 = arith.constant 1.000000e+00 : f32
    %33 = vector.broadcast %cst_18 : f32 to vector<8x128xf32>
    %34 = arith.addf %33, %32 : vector<8x128xf32>
    %35 = arith.divf %33, %34 : vector<8x128xf32>
    %36 = vector.extract_strided_slice %23 {offsets = [0, 256], sizes = [8, 128], strides = [1, 1]} : vector<8x512xf32> to vector<8x128xf32>
    %37 = math.tanh %36 : vector<8x128xf32>
    %38 = vector.extract_strided_slice %23 {offsets = [0, 384], sizes = [8, 128], strides = [1, 1]} : vector<8x512xf32> to vector<8x128xf32>
    %39 = arith.negf %38 : vector<8x128xf32>
    %40 = math.exp %39 : vector<8x128xf32>
    %cst_19 = arith.constant 1.000000e+00 : f32
    %41 = vector.broadcast %cst_19 : f32 to vector<8x128xf32>
    %42 = arith.addf %41, %40 : vector<8x128xf32>
    %43 = arith.divf %41, %42 : vector<8x128xf32>
    %44 = arith.mulf %35, %14 : vector<8x128xf32>
    %45 = arith.mulf %29, %37 : vector<8x128xf32>
    %46 = arith.addf %44, %45 : vector<8x128xf32>
    %47 = math.tanh %46 : vector<8x128xf32>
    %48 = arith.mulf %43, %47 : vector<8x128xf32>
    %c0_20 = arith.constant 0 : index
    %c0_21 = arith.constant 0 : index
    %c0_22 = arith.constant 0 : index
    %49 = vector.load %arg11[%c0_20, %c0_21, %c0_22] : memref<2x8x128xf32, #tpu.memory_space<vmem>>, vector<1x8x128xf32>
    %50 = vector.shape_cast %49 : vector<1x8x128xf32> to vector<8x128xf32>
    %51 = vector.shape_cast %48 : vector<8x128xf32> to vector<1x8x128xf32>
    tpu.vector_store %arg11[%c0_20, %c0_21, %c0_22], %51 {strides = array<i32>} : memref<2x8x128xf32, #tpu.memory_space<vmem>>, vector<1x8x128xf32>,
    %c0_23 = arith.constant 0 : index
    %c0_24 = arith.constant 0 : index
    %c0_25 = arith.constant 0 : index
    %52 = vector.load %arg12[%c0_23, %c0_24, %c0_25] : memref<2x8x128xf32, #tpu.memory_space<vmem>>, vector<1x8x128xf32>
    %53 = vector.shape_cast %52 : vector<1x8x128xf32> to vector<8x128xf32>
    %54 = vector.shape_cast %46 : vector<8x128xf32> to vector<1x8x128xf32>
    tpu.vector_store %arg12[%c0_23, %c0_24, %c0_25], %54 {strides = array<i32>} : memref<2x8x128xf32, #tpu.memory_space<vmem>>, vector<1x8x128xf32>,
    %55 = arith.truncf %48 : vector<8x128xf32> to vector<8x128xbf16>
    %c1 = arith.constant 1 : index
    %c0_26 = arith.constant 0 : index
    %c0_27 = arith.constant 0 : index
    %56 = vector.load %arg11[%c1, %c0_26, %c0_27] : memref<2x8x128xf32, #tpu.memory_space<vmem>>, vector<1x8x128xf32>
    %57 = vector.shape_cast %56 : vector<1x8x128xf32> to vector<8x128xf32>
    %c1_28 = arith.constant 1 : index
    %c0_29 = arith.constant 0 : index
    %c0_30 = arith.constant 0 : index
    %58 = vector.load %arg12[%c1_28, %c0_29, %c0_30] : memref<2x8x128xf32, #tpu.memory_space<vmem>>, vector<1x8x128xf32>
    %59 = vector.shape_cast %58 : vector<1x8x128xf32> to vector<8x128xf32>
    %60 = arith.truncf %57 : vector<8x128xf32> to vector<8x128xbf16>
    %61 = tpu.concatenate %55, %60 in 1 : vector<8x128xbf16>, vector<8x128xbf16> -> vector<8x256xbf16>
    %c1_31 = arith.constant 1 : index
    %c0_32 = arith.constant 0 : index
    %c0_33 = arith.constant 0 : index
    %62 = vector.load %arg4[%c1_31, %c0_32, %c0_33] : memref<2x256x512xbf16, #tpu.memory_space<vmem>>, vector<1x256x512xbf16>
    %63 = vector.shape_cast %62 : vector<1x256x512xbf16> to vector<256x512xbf16>
    %cst_34 = arith.constant dense<0.000000e+00> : vector<8x512xf32>
    %64 = tpu.matmul %61, %63, %cst_34 {dimension_numbers = #tpu.dot_dimension_numbers<[1], [0], [0], [1], [0, 0, 1, 1], [], []>} : vector<8x256xbf16>, vector<256x512xbf16>, vector<8x512xf32> -> vector<8x512xf32>
    %c1_35 = arith.constant 1 : index
    %c0_36 = arith.constant 0 : index
    %c0_37 = arith.constant 0 : index
    %65 = vector.load %arg5[%c1_35, %c0_36, %c0_37] : memref<2x1x512xf32, #tpu.memory_space<vmem>>, vector<1x1x512xf32>
    %66 = vector.shape_cast %65 : vector<1x1x512xf32> to vector<1x512xf32>
    %67 = vector.broadcast %66 : vector<1x512xf32> to vector<8x512xf32>
    %68 = arith.addf %64, %67 : vector<8x512xf32>
    %69 = vector.extract_strided_slice %68 {offsets = [0, 0], sizes = [8, 128], strides = [1, 1]} : vector<8x512xf32> to vector<8x128xf32>
    %70 = arith.negf %69 : vector<8x128xf32>
    %71 = math.exp %70 : vector<8x128xf32>
    %cst_38 = arith.constant 1.000000e+00 : f32
    %72 = vector.broadcast %cst_38 : f32 to vector<8x128xf32>
    %73 = arith.addf %72, %71 : vector<8x128xf32>
    %74 = arith.divf %72, %73 : vector<8x128xf32>
    %75 = vector.extract_strided_slice %68 {offsets = [0, 128], sizes = [8, 128], strides = [1, 1]} : vector<8x512xf32> to vector<8x128xf32>
    %76 = arith.negf %75 : vector<8x128xf32>
    %77 = math.exp %76 : vector<8x128xf32>
    %cst_39 = arith.constant 1.000000e+00 : f32
    %78 = vector.broadcast %cst_39 : f32 to vector<8x128xf32>
    %79 = arith.addf %78, %77 : vector<8x128xf32>
    %80 = arith.divf %78, %79 : vector<8x128xf32>
    %81 = vector.extract_strided_slice %68 {offsets = [0, 256], sizes = [8, 128], strides = [1, 1]} : vector<8x512xf32> to vector<8x128xf32>
    %82 = math.tanh %81 : vector<8x128xf32>
    %83 = vector.extract_strided_slice %68 {offsets = [0, 384], sizes = [8, 128], strides = [1, 1]} : vector<8x512xf32> to vector<8x128xf32>
    %84 = arith.negf %83 : vector<8x128xf32>
    %85 = math.exp %84 : vector<8x128xf32>
    %cst_40 = arith.constant 1.000000e+00 : f32
    %86 = vector.broadcast %cst_40 : f32 to vector<8x128xf32>
    %87 = arith.addf %86, %85 : vector<8x128xf32>
    %88 = arith.divf %86, %87 : vector<8x128xf32>
    %89 = arith.mulf %80, %59 : vector<8x128xf32>
    %90 = arith.mulf %74, %82 : vector<8x128xf32>
    %91 = arith.addf %89, %90 : vector<8x128xf32>
    %92 = math.tanh %91 : vector<8x128xf32>
    %93 = arith.mulf %88, %92 : vector<8x128xf32>
    %c1_41 = arith.constant 1 : index
    %c0_42 = arith.constant 0 : index
    %c0_43 = arith.constant 0 : index
    %94 = vector.load %arg11[%c1_41, %c0_42, %c0_43] : memref<2x8x128xf32, #tpu.memory_space<vmem>>, vector<1x8x128xf32>
    %95 = vector.shape_cast %94 : vector<1x8x128xf32> to vector<8x128xf32>
    %96 = vector.shape_cast %93 : vector<8x128xf32> to vector<1x8x128xf32>
    tpu.vector_store %arg11[%c1_41, %c0_42, %c0_43], %96 {strides = array<i32>} : memref<2x8x128xf32, #tpu.memory_space<vmem>>, vector<1x8x128xf32>,
    %c1_44 = arith.constant 1 : index
    %c0_45 = arith.constant 0 : index
    %c0_46 = arith.constant 0 : index
    %97 = vector.load %arg12[%c1_44, %c0_45, %c0_46] : memref<2x8x128xf32, #tpu.memory_space<vmem>>, vector<1x8x128xf32>
    %98 = vector.shape_cast %97 : vector<1x8x128xf32> to vector<8x128xf32>
    %99 = vector.shape_cast %91 : vector<8x128xf32> to vector<1x8x128xf32>
    tpu.vector_store %arg12[%c1_44, %c0_45, %c0_46], %99 {strides = array<i32>} : memref<2x8x128xf32, #tpu.memory_space<vmem>>, vector<1x8x128xf32>,
    %100 = arith.truncf %93 : vector<8x128xf32> to vector<8x128xbf16>
    %c0_47 = arith.constant 0 : index
    %c0_48 = arith.constant 0 : index
    %101 = vector.load %arg6[%c0_47, %c0_48] : memref<128x128xbf16, #tpu.memory_space<vmem>>, vector<128x128xbf16>
    %cst_49 = arith.constant dense<0.000000e+00> : vector<8x128xf32>
    %102 = tpu.matmul %100, %101, %cst_49 {dimension_numbers = #tpu.dot_dimension_numbers<[1], [0], [0], [1], [0, 0, 1, 1], [], []>} : vector<8x128xbf16>, vector<128x128xbf16>, vector<8x128xf32> -> vector<8x128xf32>
    %c0_50 = arith.constant 0 : index
    %c0_51 = arith.constant 0 : index
    %103 = vector.load %arg7[%c0_50, %c0_51] : memref<1x128xf32, #tpu.memory_space<vmem>>, vector<1x128xf32>
    %104 = vector.broadcast %103 : vector<1x128xf32> to vector<8x128xf32>
    %105 = arith.addf %102, %104 : vector<8x128xf32>
    %c0_52 = arith.constant 0 : index
    %c0_53 = arith.constant 0 : index
    %c0_54 = arith.constant 0 : index
    %106 = vector.load %arg10[%c0_52, %c0_53, %c0_54] : memref<1x8x128xf32, #tpu.memory_space<vmem>>, vector<1x8x128xf32>
    %107 = vector.shape_cast %106 : vector<1x8x128xf32> to vector<8x128xf32>
    %108 = vector.shape_cast %105 : vector<8x128xf32> to vector<1x8x128xf32>
    tpu.vector_store %arg10[%c0_52, %c0_53, %c0_54], %108 {strides = array<i32>} : memref<1x8x128xf32, #tpu.memory_space<vmem>>, vector<1x8x128xf32>,
    %cst_55 = arith.constant dense<0xFF800000> : vector<8xf32>
    %109 = vector.multi_reduction <maximumf>, %105, %cst_55 [1] : vector<8x128xf32> to vector<8xf32>
    %110 = vector.shape_cast %109 : vector<8xf32> to vector<8x1xf32>
    %111 = vector.broadcast %110 : vector<8x1xf32> to vector<8x128xf32>
    %112 = arith.cmpf oge, %105, %111 : vector<8x128xf32>
    %c128_i32 = arith.constant 128 : i32
    %113 = vector.broadcast %c128_i32 : i32 to vector<8x128xi32>
    %114 = arith.select %112, %2, %113 : vector<8x128xi1>, vector<8x128xi32>
    %cst_56 = arith.constant dense<2147483647> : vector<8xi32>
    %115 = vector.multi_reduction <minsi>, %114, %cst_56 [1] : vector<8x128xi32> to vector<8xi32>
    %116 = vector.shape_cast %115 : vector<8xi32> to vector<8x1xi32>
    %117 = vector.broadcast %116 : vector<8x1xi32> to vector<8x128xi32>
    %118 = arith.cmpi eq, %2, %117 : vector<8x128xi32>
    %119 = arith.extui %118 : vector<8x128xi1> to vector<8x128xi32>
    %120 = arith.sitofp %119 : vector<8x128xi32> to vector<8x128xf32>
    %121 = arith.index_cast %0 : i32 to index
    %122 = memref.load %arg2[%121] : memref<8xi32, #tpu.memory_space<smem>>
    %c0_i32_57 = arith.constant 0 : i32
    %123 = arith.cmpi ne, %122, %c0_i32_57 : i32
    %124 = arith.extui %123 : i1 to i32
    %125 = arith.sitofp %124 : i32 to f32
    %c0_i32_58 = arith.constant 0 : i32
    %126 = vector.broadcast %c0_i32_58 : i32 to vector<8x1xi32>
    %c0_i32_59 = arith.constant 0 : i32
    %127 = vector.broadcast %c0_i32_59 : i32 to vector<8x1xi32>
    %128 = arith.cmpi eq, %1, %127 : vector<8x1xi32>
    %129 = arith.index_cast %0 : i32 to index
    %c0_60 = arith.constant 0 : index
    %130 = memref.load %arg1[%129, %c0_60] : memref<8x8xi32, #tpu.memory_space<smem>>
    %c0_i32_61 = arith.constant 0 : i32
    %131 = vector.broadcast %130 : i32 to vector<8x1xi32>
    %132 = vector.broadcast %c0_i32_61 : i32 to vector<8x1xi32>
    %133 = arith.select %128, %131, %132 : vector<8x1xi1>, vector<8x1xi32>
    %134 = arith.addi %126, %133 : vector<8x1xi32>
    %c1_i32_62 = arith.constant 1 : i32
    %135 = vector.broadcast %c1_i32_62 : i32 to vector<8x1xi32>
    %136 = arith.cmpi eq, %1, %135 : vector<8x1xi32>
    %137 = arith.index_cast %0 : i32 to index
    %c1_63 = arith.constant 1 : index
    %138 = memref.load %arg1[%137, %c1_63] : memref<8x8xi32, #tpu.memory_space<smem>>
    %c0_i32_64 = arith.constant 0 : i32
    %139 = vector.broadcast %138 : i32 to vector<8x1xi32>
    %140 = vector.broadcast %c0_i32_64 : i32 to vector<8x1xi32>
    %141 = arith.select %136, %139, %140 : vector<8x1xi1>, vector<8x1xi32>
    %142 = arith.addi %134, %141 : vector<8x1xi32>
    %c2_i32 = arith.constant 2 : i32
    %143 = vector.broadcast %c2_i32 : i32 to vector<8x1xi32>
    %144 = arith.cmpi eq, %1, %143 : vector<8x1xi32>
    %145 = arith.index_cast %0 : i32 to index
    %c2 = arith.constant 2 : index
    %146 = memref.load %arg1[%145, %c2] : memref<8x8xi32, #tpu.memory_space<smem>>
    %c0_i32_65 = arith.constant 0 : i32
    %147 = vector.broadcast %146 : i32 to vector<8x1xi32>
    %148 = vector.broadcast %c0_i32_65 : i32 to vector<8x1xi32>
    %149 = arith.select %144, %147, %148 : vector<8x1xi1>, vector<8x1xi32>
    %150 = arith.addi %142, %149 : vector<8x1xi32>
    %c3_i32 = arith.constant 3 : i32
    %151 = vector.broadcast %c3_i32 : i32 to vector<8x1xi32>
    %152 = arith.cmpi eq, %1, %151 : vector<8x1xi32>
    %153 = arith.index_cast %0 : i32 to index
    %c3 = arith.constant 3 : index
    %154 = memref.load %arg1[%153, %c3] : memref<8x8xi32, #tpu.memory_space<smem>>
    %c0_i32_66 = arith.constant 0 : i32
    %155 = vector.broadcast %154 : i32 to vector<8x1xi32>
    %156 = vector.broadcast %c0_i32_66 : i32 to vector<8x1xi32>
    %157 = arith.select %152, %155, %156 : vector<8x1xi1>, vector<8x1xi32>
    %158 = arith.addi %150, %157 : vector<8x1xi32>
    %c4_i32 = arith.constant 4 : i32
    %159 = vector.broadcast %c4_i32 : i32 to vector<8x1xi32>
    %160 = arith.cmpi eq, %1, %159 : vector<8x1xi32>
    %161 = arith.index_cast %0 : i32 to index
    %c4 = arith.constant 4 : index
    %162 = memref.load %arg1[%161, %c4] : memref<8x8xi32, #tpu.memory_space<smem>>
    %c0_i32_67 = arith.constant 0 : i32
    %163 = vector.broadcast %162 : i32 to vector<8x1xi32>
    %164 = vector.broadcast %c0_i32_67 : i32 to vector<8x1xi32>
    %165 = arith.select %160, %163, %164 : vector<8x1xi1>, vector<8x1xi32>
    %166 = arith.addi %158, %165 : vector<8x1xi32>
    %c5_i32 = arith.constant 5 : i32
    %167 = vector.broadcast %c5_i32 : i32 to vector<8x1xi32>
    %168 = arith.cmpi eq, %1, %167 : vector<8x1xi32>
    %169 = arith.index_cast %0 : i32 to index
    %c5 = arith.constant 5 : index
    %170 = memref.load %arg1[%169, %c5] : memref<8x8xi32, #tpu.memory_space<smem>>
    %c0_i32_68 = arith.constant 0 : i32
    %171 = vector.broadcast %170 : i32 to vector<8x1xi32>
    %172 = vector.broadcast %c0_i32_68 : i32 to vector<8x1xi32>
    %173 = arith.select %168, %171, %172 : vector<8x1xi1>, vector<8x1xi32>
    %174 = arith.addi %166, %173 : vector<8x1xi32>
    %c6_i32 = arith.constant 6 : i32
    %175 = vector.broadcast %c6_i32 : i32 to vector<8x1xi32>
    %176 = arith.cmpi eq, %1, %175 : vector<8x1xi32>
    %177 = arith.index_cast %0 : i32 to index
    %c6 = arith.constant 6 : index
    %178 = memref.load %arg1[%177, %c6] : memref<8x8xi32, #tpu.memory_space<smem>>
    %c0_i32_69 = arith.constant 0 : i32
    %179 = vector.broadcast %178 : i32 to vector<8x1xi32>
    %180 = vector.broadcast %c0_i32_69 : i32 to vector<8x1xi32>
    %181 = arith.select %176, %179, %180 : vector<8x1xi1>, vector<8x1xi32>
    %182 = arith.addi %174, %181 : vector<8x1xi32>
    %c7_i32 = arith.constant 7 : i32
    %183 = vector.broadcast %c7_i32 : i32 to vector<8x1xi32>
    %184 = arith.cmpi eq, %1, %183 : vector<8x1xi32>
    %185 = arith.index_cast %0 : i32 to index
    %c7 = arith.constant 7 : index
    %186 = memref.load %arg1[%185, %c7] : memref<8x8xi32, #tpu.memory_space<smem>>
    %c0_i32_70 = arith.constant 0 : i32
    %187 = vector.broadcast %186 : i32 to vector<8x1xi32>
    %188 = vector.broadcast %c0_i32_70 : i32 to vector<8x1xi32>
    %189 = arith.select %184, %187, %188 : vector<8x1xi1>, vector<8x1xi32>
    %190 = arith.addi %182, %189 : vector<8x1xi32>
    %191 = vector.broadcast %190 : vector<8x1xi32> to vector<8x128xi32>
    %192 = arith.cmpi eq, %2, %191 : vector<8x128xi32>
    %193 = arith.extui %192 : vector<8x128xi1> to vector<8x128xi32>
    %194 = arith.sitofp %193 : vector<8x128xi32> to vector<8x128xf32>
    %195 = vector.broadcast %125 : f32 to vector<8x128xf32>
    %196 = arith.mulf %195, %194 : vector<8x128xf32>
    %cst_71 = arith.constant 1.000000e+00 : f32
    %197 = arith.subf %cst_71, %125 : f32
    %198 = vector.broadcast %197 : f32 to vector<8x128xf32>
    %199 = arith.mulf %198, %120 : vector<8x128xf32>
    %200 = arith.addf %196, %199 : vector<8x128xf32>
    %c0_72 = arith.constant 0 : index
    %c0_73 = arith.constant 0 : index
    %201 = vector.load %arg13[%c0_72, %c0_73] : memref<8x128xf32, #tpu.memory_space<vmem>>, vector<8x128xf32>
    tpu.vector_store %arg13[%c0_72, %c0_73], %200 {strides = array<i32>} : memref<8x128xf32, #tpu.memory_space<vmem>>, vector<8x128xf32>,
    return
  }
  func.func @transform_0(%arg0: i32, %arg1: memref<8x8xi32, #tpu.memory_space<smem>>, %arg2: memref<8xi32, #tpu.memory_space<smem>>) -> (i32, i32) {
    %c0_i32 = arith.constant 0 : i32
    %c0_i32_0 = arith.constant 0 : i32
    %c0_i32_1 = arith.constant 0 : i32
    return %c0_i32, %c0_i32_0 : i32, i32
  }
  func.func @transform_1(%arg0: i32, %arg1: memref<8x8xi32, #tpu.memory_space<smem>>, %arg2: memref<8xi32, #tpu.memory_space<smem>>) -> (i32, i32, i32) {
    %c0_i32 = arith.constant 0 : i32
    %c0_i32_0 = arith.constant 0 : i32
    %c0_i32_1 = arith.constant 0 : i32
    %c0_i32_2 = arith.constant 0 : i32
    return %c0_i32, %c0_i32_0, %c0_i32_1 : i32, i32, i32
  }
  func.func @transform_2(%arg0: i32, %arg1: memref<8x8xi32, #tpu.memory_space<smem>>, %arg2: memref<8xi32, #tpu.memory_space<smem>>) -> (i32, i32, i32) {
    %c0_i32 = arith.constant 0 : i32
    %c0_i32_0 = arith.constant 0 : i32
    %c0_i32_1 = arith.constant 0 : i32
    %c0_i32_2 = arith.constant 0 : i32
    return %c0_i32, %c0_i32_0, %c0_i32_1 : i32, i32, i32
  }
  func.func @transform_3(%arg0: i32, %arg1: memref<8x8xi32, #tpu.memory_space<smem>>, %arg2: memref<8xi32, #tpu.memory_space<smem>>) -> (i32, i32) {
    %c0_i32 = arith.constant 0 : i32
    %c0_i32_0 = arith.constant 0 : i32
    %c0_i32_1 = arith.constant 0 : i32
    return %c0_i32, %c0_i32_0 : i32, i32
  }
  func.func @transform_4(%arg0: i32, %arg1: memref<8x8xi32, #tpu.memory_space<smem>>, %arg2: memref<8xi32, #tpu.memory_space<smem>>) -> (i32, i32) {
    %c0_i32 = arith.constant 0 : i32
    %c0_i32_0 = arith.constant 0 : i32
    %c0_i32_1 = arith.constant 0 : i32
    return %c0_i32, %c0_i32_0 : i32, i32
  }
  func.func @transform_5(%arg0: i32, %arg1: memref<8x8xi32, #tpu.memory_space<smem>>, %arg2: memref<8xi32, #tpu.memory_space<smem>>) -> (i32, i32, i32) {
    %c0_i32 = arith.constant 0 : i32
    %c0_i32_0 = arith.constant 0 : i32
    %c0_i32_1 = arith.constant 0 : i32
    %c0_i32_2 = arith.constant 0 : i32
    return %c0_i32, %c0_i32_0, %c0_i32_1 : i32, i32, i32
  }
  func.func @transform_6(%arg0: i32, %arg1: memref<8x8xi32, #tpu.memory_space<smem>>, %arg2: memref<8xi32, #tpu.memory_space<smem>>) -> (i32, i32, i32) {
    %c0_i32 = arith.constant 0 : i32
    %c0_i32_0 = arith.constant 0 : i32
    %c0_i32_1 = arith.constant 0 : i32
    %c0_i32_2 = arith.constant 0 : i32
    return %c0_i32, %c0_i32_0, %c0_i32_1 : i32, i32, i32
  }
  func.func @transform_7(%arg0: i32, %arg1: memref<8x8xi32, #tpu.memory_space<smem>>, %arg2: memref<8xi32, #tpu.memory_space<smem>>) -> (i32, i32, i32) {
    %c0_i32 = arith.constant 0 : i32
    %c0_i32_0 = arith.constant 0 : i32
    %c0_i32_1 = arith.constant 0 : i32
    return %arg0, %c0_i32, %c0_i32_0 : i32, i32, i32
  }
}

</mosaic_0001>

<bundles_post_ra>
// kernel: seq2seq_forward.2
= control target key start
LH: loop header
LB: loop body
LE: loop exit
PB: predicated region body
PF: predicated region fallthrough
CT: control target
= control target key end

     0   :  { %10 = vsyncpa [#allocation3], 0  ;;  %s2173_s15 = smov 0   ;;  %s2323_s0 = inlined_call_operand.vmem [shape: bf16[7,8,128], index: 0, kind: input, shape index: {}]   ;;  %s2324_s1 = inlined_call_operand.hbm [shape: bf16[2,256,512], index: 1, kind: input, shape index: {}]   ;;  %s2325_s2 = inlined_call_operand.vmem [shape: f32[2,1,512], index: 2, kind: input, shape index: {}]   ;;  %s2326_s3 = inlined_call_operand.vmem [shape: f32[2,8,128], index: 3, kind: output, shape index: {0}]   ;;  %s2327_s4 = inlined_call_operand.vmem [shape: f32[2,8,128], index: 4, kind: output, shape index: {1}]  }
   0x1 LB: > { %s142_s18 = sshll.u32 %s2324_s1, 4  ;;  %s1387_s19 = sadd.s32 4294967295, %s2142_s15   ;;  %s2142_s15 = sphi %s2173_s15, %s16_s15   ;;  %s143_s18 = int_to_ptr.hbm [resolvable:$true] %s142_s18 }
   0x2   : > { %p1388_p0 = scmp.ge.s32.totalorder %s2142_s15, 1  ;;  %p131_p1 = scmp.lt.s32.totalorder %s2142_s15, 8 }
   0x3   : > { %p1389_p2 = scmp.ne.s32.totalorder %s1387_s19, 0  ;;  %p2056_p3 = scmp.eq.s32.totalorder %s1387_s19, 0 }
   0x4   : > { %p132_p4 = pnand %p1388_p0, %p131_p1  ;;  %s2144_s20 = smov [#allocation2]  }
   0x5   : > { %s144_s21 = sshll.u32 %s2144_s20, 4  ;;  %s2145_s22 = smov 256   ;;  %s145_s21 = int_to_ptr.vmem [resolvable:$true] %s144_s21 }
   0x6   : > { %p2052_p5 = pneg %p132_p4  ;;  %s2146_s23 = smov 16  }
   0x7   : > { %170 = sbr.rel (%p132_p4) target bundleno = 442 (0x1ba), region = 32 }
   0x8   : > { %p2053_p6 = pnand %p2056_p3, %p2052_p5 }
   0xa   : > { %2055 = dma.hbm_to_vmem [thread:$0]  (!%p2053_p6), %s143_s18, 16384, %s145_s21, [#allocation3], %s2145_s22, %s2145_s22, %s2146_s23  }
   0xc   : > { %2137 = dma.done.wait (%p2056_p3), [#allocation3], 16384  }
   0xd   : > { %2139 = vsyncadd (%p2056_p3), [#allocation3], 4294950912  ;;  %p191_p7 = scmp.lt.s32.totalorder %s1387_s19, 6 }
   0xe   : > { %198 = sbr.rel (%p1389_p2) target bundleno = 24 (0x18), region = 40 }
   0xf   : > { %s192_s24 = scalar_select %p191_p7, %s1387_s19, 6 }
  0x11   : > { %s1393_s25 = sshll.u32 %s192_s24, 2 }
  0x12   : > { %s2187_s28 = scalar_lea.vmem %s2323_s0, %s1393_s25 }
  0x13   : > { %v2147_v0 = vmov 0.0  }
  0x14   : > { %199 = vst [vmem:[%s2326_s3] sm:$0xff] %v2147_v0 }
  0x15   : > { %200 = vst [vmem:[%s2326_s3 + $0x8] sm:$0xff] %v2147_v0 }
  0x16   : > { %201 = vst [vmem:[%s2327_s4] sm:$0xff] %v2147_v0 }
  0x17   : > { %202 = vst [vmem:[%s2327_s4 + $0x8] sm:$0xff] %v2147_v0 }
  0x18 PF: > { %v1509_v1 = vld [vmem:[#allocation2 + $0xe0] sm:$0xf]  ;;  %v1950_v2 = vld [vmem:[#allocation2 + $0xec] sm:$0xf0]  ;;  %v1948_v3 = vld [vmem:[#allocation2 + $0xe4] sm:$0xf] }
  0x19   : > { %v1510_v4 = vor.u32 %v1950_v2, %v1509_v1  ;;  %v1511_v5 = vld [vmem:[#allocation2 + $0xf0] sm:$0xf0]  ;;  %v1980_v6 = vld [vmem:[#allocation2 + $0x1e4] sm:$0xf]  ;;  %v1637_v10 = vld [vmem:[#allocation2 + $0x1e0] sm:$0xf] }
  0x1a   : > { %v1639_v7 = vld [vmem:[#allocation2 + $0x1f0] sm:$0xf0]  ;;  %v1514_v8 = vor.u32 %v1948_v3, %v1511_v5  ;;  %v1982_v11 = vld [vmem:[#allocation2 + $0x1ec] sm:$0xf0]  ;;  %v1493_v12 = vld [vmem:[#allocation2 + $0xc0] sm:$0xf] }
  0x1b   : > { %v1642_v9 = vor.u32 %v1980_v6, %v1639_v7  ;;  %601 = vmatpush.bf16.msra.mxu0 %v1510_v4  ;;  %v1638_v13 = vor.u32 %v1982_v11, %v1637_v10  ;;  %v1946_v14 = vld [vmem:[#allocation2 + $0xcc] sm:$0xf0]  ;;  %v1944_v15 = vld [vmem:[#allocation2 + $0xc4] sm:$0xf]  ;;  %v1495_v16 = vld [vmem:[#allocation2 + $0xd0] sm:$0xf0] }
  0x1c   : > { %627 = vmatpush.bf16.msra.mxu2 %v1514_v8  ;;  %v1494_v17 = vor.u32 %v1946_v14, %v1493_v12  ;;  %v1498_v18 = vor.u32 %v1944_v15, %v1495_v16  ;;  %v1976_v19 = vld [vmem:[#allocation2 + $0x1c4] sm:$0xf]  ;;  %v1623_v20 = vld [vmem:[#allocation2 + $0x1d0] sm:$0xf0]  ;;  %v1621_v21 = vld [vmem:[#allocation2 + $0x1c0] sm:$0xf] }
  0x1d   : > { %640 = vmatpush.bf16.msra.mxu3 %v1642_v9  ;;  %614 = vmatpush.bf16.msra.mxu1 %v1638_v13  ;;  %v1626_v22 = vor.u32 %v1976_v19, %v1623_v20  ;;  %v1978_v23 = vld [vmem:[#allocation2 + $0x1cc] sm:$0xf0]  ;;  %v1477_v24 = vld [vmem:[#allocation2 + $0xa0] sm:$0xf]  ;;  %v1940_v27 = vld [vmem:[#allocation2 + $0xa4] sm:$0xf] }
  0x1e   : > { %v1942_v25 = vld [vmem:[#allocation2 + $0xac] sm:$0xf0]  ;;  %v1622_v26 = vor.u32 %v1978_v23, %v1621_v21  ;;  %v1479_v28 = vld [vmem:[#allocation2 + $0xb0] sm:$0xf0]  ;;  %v1972_v29 = vld [vmem:[#allocation2 + $0x1a4] sm:$0xf] }
  0x1f   : > { %602 = vmatpush.bf16.msra.mxu0 %v1494_v17  ;;  %v1478_v30 = vor.u32 %v1942_v25, %v1477_v24  ;;  %v1607_v31 = vld [vmem:[#allocation2 + $0x1b0] sm:$0xf0]  ;;  %v1605_v32 = vld [vmem:[#allocation2 + $0x1a0] sm:$0xf]  ;;  %v1974_v33 = vld [vmem:[#allocation2 + $0x1ac] sm:$0xf0]  ;;  %v1482_v34 = vor.u32 %v1940_v27, %v1479_v28 }
  0x20   : > { %628 = vmatpush.bf16.msra.mxu2 %v1498_v18  ;;  %v1610_v35 = vor.u32 %v1972_v29, %v1607_v31  ;;  %v1461_v36 = vld [vmem:[#allocation2 + $0x80] sm:$0xf]  ;;  %v1938_v37 = vld [vmem:[#allocation2 + $0x8c] sm:$0xf0]  ;;  %v1936_v38 = vld [vmem:[#allocation2 + $0x84] sm:$0xf]  ;;  %v1606_v39 = vor.u32 %v1974_v33, %v1605_v32 }
  0x21   : > { %641 = vmatpush.bf16.msra.mxu3 %v1626_v22  ;;  %615 = vmatpush.bf16.msra.mxu1 %v1622_v26  ;;  %v1463_v40 = vld [vmem:[#allocation2 + $0x90] sm:$0xf0]  ;;  %v1968_v41 = vld [vmem:[#allocation2 + $0x184] sm:$0xf]  ;;  %v1589_v43 = vld [vmem:[#allocation2 + $0x180] sm:$0xf]  ;;  %v1462_v45 = vor.u32 %v1938_v37, %v1461_v36 }
  0x22   : > { %v1591_v42 = vld [vmem:[#allocation2 + $0x190] sm:$0xf0]  ;;  %v1970_v44 = vld [vmem:[#allocation2 + $0x18c] sm:$0xf0]  ;;  %v1466_v46 = vor.u32 %v1936_v38, %v1463_v40  ;;  %v1445_v48 = vld [vmem:[#allocation2 + $0x60] sm:$0xf] }
  0x23   : > { %603 = vmatpush.bf16.msra.mxu0 %v1478_v30  ;;  %v1594_v47 = vor.u32 %v1968_v41, %v1591_v42  ;;  %v1934_v49 = vld [vmem:[#allocation2 + $0x6c] sm:$0xf0]  ;;  %v1932_v50 = vld [vmem:[#allocation2 + $0x64] sm:$0xf]  ;;  %v1590_v51 = vor.u32 %v1970_v44, %v1589_v43  ;;  %v1447_v52 = vld [vmem:[#allocation2 + $0x70] sm:$0xf0] }
  0x24   : > { %629 = vmatpush.bf16.msra.mxu2 %v1482_v34  ;;  %v1964_v53 = vld [vmem:[#allocation2 + $0x164] sm:$0xf]  ;;  %v1575_v54 = vld [vmem:[#allocation2 + $0x170] sm:$0xf0]  ;;  %v1573_v55 = vld [vmem:[#allocation2 + $0x160] sm:$0xf]  ;;  %v1446_v57 = vor.u32 %v1934_v49, %v1445_v48  ;;  %v1450_v58 = vor.u32 %v1932_v50, %v1447_v52 }
  0x25   : > { %642 = vmatpush.bf16.msra.mxu3 %v1610_v35  ;;  %616 = vmatpush.bf16.msra.mxu1 %v1606_v39  ;;  %v1966_v56 = vld [vmem:[#allocation2 + $0x16c] sm:$0xf0]  ;;  %v1578_v59 = vor.u32 %v1964_v53, %v1575_v54  ;;  %v1429_v60 = vld [vmem:[#allocation2 + $0x40] sm:$0xf]  ;;  %v1928_v62 = vld [vmem:[#allocation2 + $0x44] sm:$0xf] }
  0x26   : > { %v1930_v61 = vld [vmem:[#allocation2 + $0x4c] sm:$0xf0]  ;;  %v1574_v63 = vor.u32 %v1966_v56, %v1573_v55  ;;  %v1431_v0 = vld [vmem:[#allocation2 + $0x50] sm:$0xf0]  ;;  %v1960_v1 = vld [vmem:[#allocation2 + $0x144] sm:$0xf] }
  0x27   : > { %604 = vmatpush.bf16.msra.mxu0 %v1462_v45  ;;  %v1559_v2 = vld [vmem:[#allocation2 + $0x150] sm:$0xf0]  ;;  %v1557_v3 = vld [vmem:[#allocation2 + $0x140] sm:$0xf]  ;;  %v1962_v4 = vld [vmem:[#allocation2 + $0x14c] sm:$0xf0]  ;;  %v1430_v5 = vor.u32 %v1930_v61, %v1429_v60  ;;  %v1434_v6 = vor.u32 %v1928_v62, %v1431_v0 }
  0x28   : > { %630 = vmatpush.bf16.msra.mxu2 %v1466_v46  ;;  %v1562_v7 = vor.u32 %v1960_v1, %v1559_v2  ;;  %v1413_v8 = vld [vmem:[#allocation2 + $0x20] sm:$0xf]  ;;  %v1926_v9 = vld [vmem:[#allocation2 + $0x2c] sm:$0xf0]  ;;  %v1924_v10 = vld [vmem:[#allocation2 + $0x24] sm:$0xf]  ;;  %v1558_v11 = vor.u32 %v1962_v4, %v1557_v3 }
  0x29   : > { %643 = vmatpush.bf16.msra.mxu3 %v1594_v47  ;;  %617 = vmatpush.bf16.msra.mxu1 %v1590_v51  ;;  %v1415_v12 = vld [vmem:[#allocation2 + $0x30] sm:$0xf0]  ;;  %v1956_v13 = vld [vmem:[#allocation2 + $0x124] sm:$0xf]  ;;  %v1541_v15 = vld [vmem:[#allocation2 + $0x120] sm:$0xf]  ;;  %v1414_v17 = vor.u32 %v1926_v9, %v1413_v8 }
  0x2a   : > { %v1543_v14 = vld [vmem:[#allocation2 + $0x130] sm:$0xf0]  ;;  %v1958_v16 = vld [vmem:[#allocation2 + $0x12c] sm:$0xf0]  ;;  %v1397_v18 = vld [vmem:[#allocation2] sm:$0xf]  ;;  %v1418_v20 = vor.u32 %v1924_v10, %v1415_v12 }
  0x2b   : > { %605 = vmatpush.bf16.msra.mxu0 %v1446_v57  ;;  %v1922_v19 = vld [vmem:[#allocation2 + $0xc] sm:$0xf0]  ;;  %v1546_v21 = vor.u32 %v1956_v13, %v1543_v14  ;;  %v1920_v22 = vld [vmem:[#allocation2 + $0x4] sm:$0xf]  ;;  %v1399_v23 = vld [vmem:[#allocation2 + $0x10] sm:$0xf0]  ;;  %v1542_v25 = vor.u32 %v1958_v16, %v1541_v15 }
  0x2c   : > { %631 = vmatpush.bf16.msra.mxu2 %v1450_v58  ;;  %v1952_v24 = vld [vmem:[#allocation2 + $0x104] sm:$0xf]  ;;  %v1527_v26 = vld [vmem:[#allocation2 + $0x110] sm:$0xf0]  ;;  %v1517_v27 = vld [vmem:[#allocation2 + $0xe8] sm:$0xf]  ;;  %v1398_v32 = vor.u32 %v1922_v19, %v1397_v18  ;;  %v1402_v36 = vor.u32 %v1920_v22, %v1399_v23 }
  0x2d   : > { %644 = vmatpush.bf16.msra.mxu3 %v1578_v59  ;;  %618 = vmatpush.bf16.msra.mxu1 %v1574_v63  ;;  %v1951_v28 = vld [vmem:[#allocation2 + $0xf4] sm:$0xf0]  ;;  %v1949_v29 = vld [vmem:[#allocation2 + $0xec] sm:$0xf]  ;;  %v1519_v30 = vld [vmem:[#allocation2 + $0xf8] sm:$0xf0]  ;;  %v1530_v37 = vor.u32 %v1952_v24, %v1527_v26 }
  0x2e   : > { %v1981_v31 = vld [vmem:[#allocation2 + $0x1ec] sm:$0xf]  ;;  %v1647_v33 = vld [vmem:[#allocation2 + $0x1f8] sm:$0xf0]  ;;  %v1525_v34 = vld [vmem:[#allocation2 + $0x100] sm:$0xf]  ;;  %v1518_v40 = vor.u32 %v1951_v28, %v1517_v27  ;;  %v1522_v41 = vor.u32 %v1949_v29, %v1519_v30 }
  0x2f   : > { %606 = vmatpush.bf16.msra.mxu0 %v1430_v5  ;;  %v1954_v35 = vld [vmem:[#allocation2 + $0x10c] sm:$0xf0]  ;;  %v1645_v38 = vld [vmem:[#allocation2 + $0x1e8] sm:$0xf]  ;;  %v1983_v39 = vld [vmem:[#allocation2 + $0x1f4] sm:$0xf0]  ;;  %v1650_v44 = vor.u32 %v1981_v31, %v1647_v33 }
  0x30   : > { %632 = vmatpush.bf16.msra.mxu2 %v1434_v6  ;;  %v204_v42 = vld [vmem:[%s2326_s3] sm:$0xff]  ;;  %v1501_v43 = vld [vmem:[#allocation2 + $0xc8] sm:$0xf]  ;;  %v1526_v45 = vor.u32 %v1954_v35, %v1525_v34  ;;  %v1947_v46 = vld [vmem:[#allocation2 + $0xd4] sm:$0xf0]  ;;  %v1646_v49 = vor.u32 %v1983_v39, %v1645_v38 }
  0x31   : > { %645 = vmatpush.bf16.msra.mxu3 %v1562_v7  ;;  %619 = vmatpush.bf16.msra.mxu1 %v1558_v11  ;;  %v1945_v47 = vld [vmem:[#allocation2 + $0xcc] sm:$0xf]  ;;  %v1503_v48 = vld [vmem:[#allocation2 + $0xd8] sm:$0xf0]  ;;  %v2206_v52 = vld [vmem:[%s2187_s28] sm:$0xf]  ;;  %v2208_v53 = vpack.c.bf16 %v204_v42, %v204_v42  ;;  %v1502_v56 = vor.u32 %v1947_v46, %v1501_v43 }
  0x32   : > { %v1977_v50 = vld [vmem:[#allocation2 + $0x1cc] sm:$0xf]  ;;  %v1631_v51 = vld [vmem:[#allocation2 + $0x1d8] sm:$0xf0]  ;;  %v1629_v54 = vld [vmem:[#allocation2 + $0x1c8] sm:$0xf]  ;;  %v1506_v57 = vor.u32 %v1945_v47, %v1503_v48 }
  0x33   : > { %607 = vmatpush.bf16.msra.mxu0 %v1414_v17  ;;  %v1979_v55 = vld [vmem:[#allocation2 + $0x1d4] sm:$0xf0]  ;;  %v1485_v58 = vld [vmem:[#allocation2 + $0xa8] sm:$0xf]  ;;  %v1634_v59 = vor.u32 %v1977_v50, %v1631_v51  ;;  %v1941_v61 = vld [vmem:[#allocation2 + $0xac] sm:$0xf] }
  0x34   : > { %633 = vmatpush.bf16.msra.mxu2 %v1418_v20  ;;  %v1943_v60 = vld [vmem:[#allocation2 + $0xb4] sm:$0xf0]  ;;  %v1487_v62 = vld [vmem:[#allocation2 + $0xb8] sm:$0xf0]  ;;  %v1630_v63 = vor.u32 %v1979_v55, %v1629_v54  ;;  %v1973_v0 = vld [vmem:[#allocation2 + $0x1ac] sm:$0xf] }
  0x35   : > { %646 = vmatpush.bf16.msra.mxu3 %v1546_v21  ;;  %620 = vmatpush.bf16.msra.mxu1 %v1542_v25  ;;  %v1615_v1 = vld [vmem:[#allocation2 + $0x1b8] sm:$0xf0]  ;;  %v1613_v2 = vld [vmem:[#allocation2 + $0x1a8] sm:$0xf]  ;;  %v1975_v3 = vld [vmem:[#allocation2 + $0x1b4] sm:$0xf0]  ;;  %v1486_v4 = vor.u32 %v1943_v60, %v1485_v58  ;;  %v1490_v5 = vor.u32 %v1941_v61, %v1487_v62 }
  0x36   : > { %v1469_v6 = vld [vmem:[#allocation2 + $0x88] sm:$0xf]  ;;  %v1618_v7 = vor.u32 %v1973_v0, %v1615_v1  ;;  %v1939_v8 = vld [vmem:[#allocation2 + $0x94] sm:$0xf0]  ;;  %v1937_v9 = vld [vmem:[#allocation2 + $0x8c] sm:$0xf]  ;;  %v1614_v11 = vor.u32 %v1975_v3, %v1613_v2 }
  0x37   : > { %608 = vmatpush.bf16.msra.mxu0 %v1398_v32  ;;  %v1471_v10 = vld [vmem:[#allocation2 + $0x98] sm:$0xf0]  ;;  %v1969_v12 = vld [vmem:[#allocation2 + $0x18c] sm:$0xf]  ;;  %v1597_v14 = vld [vmem:[#allocation2 + $0x188] sm:$0xf]  ;;  %v1470_v16 = vor.u32 %v1939_v8, %v1469_v6 }
  0x38   : > { %634 = vmatpush.bf16.msra.mxu2 %v1402_v36  ;;  %v1599_v13 = vld [vmem:[#allocation2 + $0x198] sm:$0xf0]  ;;  %v1971_v15 = vld [vmem:[#allocation2 + $0x194] sm:$0xf0]  ;;  %v1474_v17 = vor.u32 %v1937_v9, %v1471_v10  ;;  %v1453_v18 = vld [vmem:[#allocation2 + $0x68] sm:$0xf] }
  0x39   : > { %647 = vmatpush.bf16.msra.mxu3 %v1530_v37  ;;  %621 = vmatpush.bf16.msra.mxu1 %v1526_v45  ;;  %v1602_v19 = vor.u32 %v1969_v12, %v1599_v13  ;;  %v1935_v20 = vld [vmem:[#allocation2 + $0x74] sm:$0xf0]  ;;  %v1933_v21 = vld [vmem:[#allocation2 + $0x6c] sm:$0xf]  ;;  %v1455_v22 = vld [vmem:[#allocation2 + $0x78] sm:$0xf0]  ;;  %v1598_v23 = vor.u32 %v1971_v15, %v1597_v14 }
  0x3a   : > { %609 = vmatmul.bf16.vlgmr.msra.gmra.mxu0 %v2206_v52  ;;  %v1965_v24 = vld [vmem:[#allocation2 + $0x16c] sm:$0xf]  ;;  %v1583_v25 = vld [vmem:[#allocation2 + $0x178] sm:$0xf0]  ;;  %v1581_v26 = vld [vmem:[#allocation2 + $0x168] sm:$0xf]  ;;  %v1454_v28 = vor.u32 %v1935_v20, %v1453_v18  ;;  %v1458_v29 = vor.u32 %v1933_v21, %v1455_v22 }
  0x3b   : > { %653 = vmatpush.bf16.msrb.mxu0 %v1518_v40  ;;  %635 = vmatmul.bf16.vlgmr.msra.gmra.mxu2 %v2206_v52  ;;  %v1967_v27 = vld [vmem:[#allocation2 + $0x174] sm:$0xf0]  ;;  %v1437_v30 = vld [vmem:[#allocation2 + $0x48] sm:$0xf]  ;;  %v1586_v31 = vor.u32 %v1965_v24, %v1583_v25  ;;  %v1929_v33 = vld [vmem:[#allocation2 + $0x4c] sm:$0xf] }
  0x3c   : > { %679 = vmatpush.bf16.msrb.mxu2 %v1522_v41  ;;  %648 = vmatmul.bf16.vlgmr.msra.gmra.mxu3 %v2208_v53  ;;  %v1931_v32 = vld [vmem:[#allocation2 + $0x54] sm:$0xf0]  ;;  %v1439_v34 = vld [vmem:[#allocation2 + $0x58] sm:$0xf0]  ;;  %v1582_v35 = vor.u32 %v1967_v27, %v1581_v26  ;;  %v1961_v36 = vld [vmem:[#allocation2 + $0x14c] sm:$0xf] }
  0x3d   : > { %692 = vmatpush.bf16.msrb.mxu3 %v1650_v44  ;;  %666 = vmatpush.bf16.msrb.mxu1 %v1646_v49  ;;  %v1567_v37 = vld [vmem:[#allocation2 + $0x158] sm:$0xf0]  ;;  %v1565_v38 = vld [vmem:[#allocation2 + $0x148] sm:$0xf]  ;;  %v1963_v39 = vld [vmem:[#allocation2 + $0x154] sm:$0xf0]  ;;  %v1438_v40 = vor.u32 %v1931_v32, %v1437_v30  ;;  %v1442_v41 = vor.u32 %v1929_v33, %v1439_v34 }
  0x3e   : > { %622 = vmatmul.bf16.vlgmr.msra.gmra.mxu1 %v2208_v53  ;;  %v1421_v42 = vld [vmem:[#allocation2 + $0x28] sm:$0xf]  ;;  %v1570_v43 = vor.u32 %v1961_v36, %v1567_v37  ;;  %v1927_v44 = vld [vmem:[#allocation2 + $0x34] sm:$0xf0]  ;;  %v1925_v45 = vld [vmem:[#allocation2 + $0x2c] sm:$0xf]  ;;  %v1566_v47 = vor.u32 %v1963_v39, %v1565_v38 }
  0x3f   : > { %654 = vmatpush.bf16.msrb.mxu0 %v1502_v56  ;;  %v1423_v46 = vld [vmem:[#allocation2 + $0x38] sm:$0xf0]  ;;  %v1957_v48 = vld [vmem:[#allocation2 + $0x12c] sm:$0xf]  ;;  %v1549_v50 = vld [vmem:[#allocation2 + $0x128] sm:$0xf]  ;;  %v1422_v54 = vor.u32 %v1927_v44, %v1421_v42 }
  0x40   : > { %680 = vmatpush.bf16.msrb.mxu2 %v1506_v57  ;;  %v1551_v49 = vld [vmem:[#allocation2 + $0x138] sm:$0xf0]  ;;  %v1959_v51 = vld [vmem:[#allocation2 + $0x134] sm:$0xf0]  ;;  %v1426_v55 = vor.u32 %v1925_v45, %v1423_v46  ;;  %v1405_v56 = vld [vmem:[#allocation2 + $0x8] sm:$0xf] }
  0x41   : > { %693 = vmatpush.bf16.msrb.mxu3 %v1634_v59  ;;  %667 = vmatpush.bf16.msrb.mxu1 %v1630_v63  ;;  %v1554_v57 = vor.u32 %v1957_v48, %v1551_v49  ;;  %v1923_v58 = vld [vmem:[#allocation2 + $0x14] sm:$0xf0]  ;;  %v1921_v59 = vld [vmem:[#allocation2 + $0xc] sm:$0xf]  ;;  %v1407_v60 = vld [vmem:[#allocation2 + $0x18] sm:$0xf0]  ;;  %v1550_v61 = vor.u32 %v1959_v51, %v1549_v50 }
  0x42   : > { %v1953_v62 = vld [vmem:[#allocation2 + $0x10c] sm:$0xf]  ;;  %v1535_v63 = vld [vmem:[#allocation2 + $0x118] sm:$0xf0]  ;;  %v1533_v0 = vld [vmem:[#allocation2 + $0x108] sm:$0xf]  ;;  %v1406_v2 = vor.u32 %v1923_v58, %v1405_v56  ;;  %v1410_v3 = vor.u32 %v1921_v59, %v1407_v60 }
  0x43   : > { %655 = vmatpush.bf16.msrb.mxu0 %v1486_v4  ;;  %v1955_v1 = vld [vmem:[#allocation2 + $0x114] sm:$0xf0]  ;;  %v1538_v4 = vor.u32 %v1953_v62, %v1535_v63  ;;  %v2044_v6 = vld [vmem:[#allocation2 + $0x3e4] sm:$0xf]  ;;  %v1885_v10 = vld [vmem:[#allocation2 + $0x3d0] sm:$0xf0] }
  0x44   : > { %681 = vmatpush.bf16.msrb.mxu2 %v1490_v5  ;;  %v1534_v5 = vor.u32 %v1955_v1, %v1533_v0  ;;  %v2040_v9 = vld [vmem:[#allocation2 + $0x3c4] sm:$0xf]  ;;  %v1771_v12 = vld [vmem:[#allocation2 + $0x2e0] sm:$0xf]  ;;  %v2014_v13 = vld [vmem:[#allocation2 + $0x2ec] sm:$0xf0] }
  0x45   : > { %694 = vmatpush.bf16.msrb.mxu3 %v1618_v7  ;;  %668 = vmatpush.bf16.msrb.mxu1 %v1614_v11  ;;  %v1901_v7 = vld [vmem:[#allocation2 + $0x3f0] sm:$0xf0]  ;;  %v1888_v11 = vor.u32 %v2040_v9, %v1885_v10  ;;  %v2012_v14 = vld [vmem:[#allocation2 + $0x2e4] sm:$0xf]  ;;  %v2221_v15 = vld [vmem:[%s2325_s2] sm:$0xf] }
  0x46   : > { %v1904_v8 = vor.u32 %v2044_v6, %v1901_v7  ;;  %v2046_v18 = vld [vmem:[#allocation2 + $0x3ec] sm:$0xf0]  ;;  %v273_v20 = vperm.slane %v2221_v15, 0  ;;  %v1869_v22 = vld [vmem:[#allocation2 + $0x3b0] sm:$0xf0] }
  0x47   : > { %656 = vmatpush.bf16.msrb.mxu0 %v1470_v16  ;;  %v1773_v16 = vld [vmem:[#allocation2 + $0x2f0] sm:$0xf0]  ;;  %v1755_v24 = vld [vmem:[#allocation2 + $0x2c0] sm:$0xf]  ;;  %v2010_v25 = vld [vmem:[#allocation2 + $0x2cc] sm:$0xf0] }
  0x48   : > { %682 = vmatpush.bf16.msrb.mxu2 %v1474_v17  ;;  %v1776_v17 = vor.u32 %v2012_v14, %v1773_v16  ;;  %v2008_v26 = vld [vmem:[#allocation2 + $0x2c4] sm:$0xf]  ;;  %v1756_v27 = vor.u32 %v2010_v25, %v1755_v24  ;;  %v1883_v30 = vld [vmem:[#allocation2 + $0x3c0] sm:$0xf]  ;;  %v2006_v39 = vld [vmem:[#allocation2 + $0x2ac] sm:$0xf0] }
  0x49   : > { %695 = vmatpush.bf16.msrb.mxu3 %v1602_v19  ;;  %669 = vmatpush.bf16.msrb.mxu1 %v1598_v23  ;;  %v2036_v19 = vld [vmem:[#allocation2 + $0x3a4] sm:$0xf]  ;;  %v1739_v38 = vld [vmem:[#allocation2 + $0x2a0] sm:$0xf]  ;;  %v1741_v44 = vld [vmem:[#allocation2 + $0x2b0] sm:$0xf0] }
  0x4a   : > { %v1872_v23 = vor.u32 %v2036_v19, %v1869_v22  ;;  %v2032_v32 = vld [vmem:[#allocation2 + $0x384] sm:$0xf]  ;;  %v2038_v48 = vld [vmem:[#allocation2 + $0x3ac] sm:$0xf0]  ;;  %v1837_v51 = vld [vmem:[#allocation2 + $0x370] sm:$0xf0] }
  0x4b   : > { %657 = vmatpush.bf16.msrb.mxu0 %v1454_v28  ;;  %v1757_v28 = vld [vmem:[#allocation2 + $0x2d0] sm:$0xf0]  ;;  %v2028_v49 = vld [vmem:[#allocation2 + $0x364] sm:$0xf]  ;;  %v2002_v58 = vld [vmem:[#allocation2 + $0x28c] sm:$0xf0] }
  0x4c   : > { %683 = vmatpush.bf16.msrb.mxu2 %v1458_v29  ;;  %v1760_v29 = vor.u32 %v2008_v26, %v1757_v28  ;;  %v1840_v56 = vor.u32 %v2028_v49, %v1837_v51  ;;  %v2000_v62 = vld [vmem:[#allocation2 + $0x284] sm:$0xf]  ;;  %v1725_v63 = vld [vmem:[#allocation2 + $0x290] sm:$0xf0]  ;;  %v1851_v1 = vld [vmem:[#allocation2 + $0x380] sm:$0xf] }
  0x4d   : > { %696 = vmatpush.bf16.msrb.mxu3 %v1586_v31  ;;  %670 = vmatpush.bf16.msrb.mxu1 %v1582_v35  ;;  %v2042_v31 = vld [vmem:[#allocation2 + $0x3cc] sm:$0xf0]  ;;  %v1853_v35 = vld [vmem:[#allocation2 + $0x390] sm:$0xf0]  ;;  %v1728_v0 = vor.u32 %v2000_v62, %v1725_v63  ;;  %v1707_v9 = vld [vmem:[#allocation2 + $0x260] sm:$0xf] }
  0x4e   : > { %v1884_v34 = vor.u32 %v2042_v31, %v1883_v30  ;;  %v1856_v37 = vor.u32 %v2032_v32, %v1853_v35  ;;  %v1821_v7 = vld [vmem:[#allocation2 + $0x350] sm:$0xf0]  ;;  %v1998_v10 = vld [vmem:[#allocation2 + $0x26c] sm:$0xf0]  ;;  %v1691_v24 = vld [vmem:[#allocation2 + $0x240] sm:$0xf] }
  0x4f   : > { %658 = vmatpush.bf16.msrb.mxu0 %v1438_v40  ;;  %v2004_v40 = vld [vmem:[#allocation2 + $0x2a4] sm:$0xf]  ;;  %v1708_v14 = vor.u32 %v1998_v10, %v1707_v9  ;;  %v1994_v25 = vld [vmem:[#allocation2 + $0x24c] sm:$0xf0]  ;;  %v1693_v30 = vld [vmem:[#allocation2 + $0x250] sm:$0xf0] }
  0x50   : > { %684 = vmatpush.bf16.msrb.mxu2 %v1442_v41  ;;  %v274_v41 = vperm.slane %v2221_v15, 1  ;;  %v1744_v46 = vor.u32 %v2004_v40, %v1741_v44  ;;  %v1992_v26 = vld [vmem:[#allocation2 + $0x244] sm:$0xf]  ;;  %v1819_v32 = vld [vmem:[#allocation2 + $0x340] sm:$0xf] }
  0x51   : > { %697 = vmatpush.bf16.msrb.mxu3 %v1570_v43  ;;  %671 = vmatpush.bf16.msrb.mxu1 %v1566_v47  ;;  %v1740_v43 = vor.u32 %v2006_v39, %v1739_v38  ;;  %v1867_v47 = vld [vmem:[#allocation2 + $0x3a0] sm:$0xf]  ;;  %v1696_v31 = vor.u32 %v1992_v26, %v1693_v30  ;;  %v1789_v35 = vld [vmem:[#allocation2 + $0x310] sm:$0xf0]  ;;  %v2045_v38 = vld [vmem:[#allocation2 + $0x3ec] sm:$0xf] }
  0x52   : > { %v1868_v50 = vor.u32 %v2038_v48, %v1867_v47  ;;  %v1909_v39 = vld [vmem:[#allocation2 + $0x3f8] sm:$0xf0]  ;;  %v1675_v40 = vld [vmem:[#allocation2 + $0x220] sm:$0xf]  ;;  %v1988_v44 = vld [vmem:[#allocation2 + $0x224] sm:$0xf] }
  0x53   : > { %659 = vmatpush.bf16.msrb.mxu0 %v1422_v54  ;;  %v1677_v48 = vld [vmem:[#allocation2 + $0x230] sm:$0xf0]  ;;  %v1803_v49 = vld [vmem:[#allocation2 + $0x320] sm:$0xf]  ;;  %v2022_v51 = vld [vmem:[#allocation2 + $0x32c] sm:$0xf0] }
  0x54   : > { %685 = vmatpush.bf16.msrb.mxu2 %v1426_v55  ;;  %v1986_v62 = vld [vmem:[#allocation2 + $0x20c] sm:$0xf0]  ;;  %v1984_v63 = vld [vmem:[#allocation2 + $0x204] sm:$0xf]  ;;  %v2013_v10 = vld [vmem:[#allocation2 + $0x2ec] sm:$0xf] }
  0x55   : > { %698 = vmatpush.bf16.msrb.mxu3 %v1554_v57  ;;  %672 = vmatpush.bf16.msrb.mxu1 %v1550_v61  ;;  %v1723_v57 = vld [vmem:[#allocation2 + $0x280] sm:$0xf]  ;;  %v1763_v26 = vld [vmem:[#allocation2 + $0x2c8] sm:$0xf] }
  0x56   : > { %v1724_v61 = vor.u32 %v2002_v58, %v1723_v57  ;;  %v1659_v58 = vld [vmem:[#allocation2 + $0x200] sm:$0xf] }
  0x57   : > { %660 = vmatpush.bf16.msrb.mxu0 %v1406_v2  ;;  %v2034_v2 = vld [vmem:[#allocation2 + $0x38c] sm:$0xf0] }
  0x58   : > { %686 = vmatpush.bf16.msrb.mxu2 %v1410_v3  ;;  %v2024_v3 = vld [vmem:[#allocation2 + $0x344] sm:$0xf]  ;;  %v1852_v6 = vor.u32 %v2034_v2, %v1851_v1 }
  0x59   : > { %699 = vmatpush.bf16.msrb.mxu3 %v1538_v4  ;;  %673 = vmatpush.bf16.msrb.mxu1 %v1534_v5 }
  0x5a   : > { %661 = vmatmul.bf16.vlgmr.msrb.gmra.mxu0 %v2206_v52 }
  0x5b   : > { %687 = vmatmul.bf16.vlgmr.msrb.gmra.mxu2 %v2206_v52  ;;  %v1772_v52 = vor.u32 %v2014_v13, %v1771_v12 }
  0x5c   : > { %700 = vmatmul.bf16.vlgmr.msrb.gmra.mxu3 %v2208_v53  ;;  %674 = vmatmul.bf16.vlgmr.msrb.gmra.mxu1 %v2208_v53  ;;  %v1899_v53 = vld [vmem:[#allocation2 + $0x3e0] sm:$0xf] }
  0x5d   : > { %1211 = vmatpush.bf16.msra.mxu3 %v1904_v8  ;;  %1172 = vmatpush.bf16.msra.mxu0 %v1772_v52  ;;  %v1900_v21 = vor.u32 %v2046_v18, %v1899_v53  ;;  %v1824_v8 = vor.u32 %v2024_v3, %v1821_v7  ;;  %v1709_v52 = vld [vmem:[#allocation2 + $0x270] sm:$0xf0]  ;;  %v2030_v53 = vld [vmem:[#allocation2 + $0x36c] sm:$0xf0]  ;;  %v2020_v18 = vld [vmem:[#allocation2 + $0x324] sm:$0xf]  ;;  %v1660_v7 = vor.u32 %v1986_v62, %v1659_v58 }
  0x5e   : > { %1198 = vmatpush.bf16.msra.mxu2 %v1776_v17  ;;  %v1835_v17 = vld [vmem:[#allocation2 + $0x360] sm:$0xf]  ;;  %v276_v3 = vperm.slane %v2221_v15, 3  ;;  %v2029_v62 = vld [vmem:[#allocation2 + $0x36c] sm:$0xf] }
  0x5f   : > { %1185 = vmatpush.bf16.msra.mxu1 %v1900_v21  ;;  %v1836_v19 = vor.u32 %v2030_v53, %v1835_v17  ;;  %v2018_v17 = vld [vmem:[#allocation2 + $0x30c] sm:$0xf0]  ;;  %v1843_v53 = vld [vmem:[#allocation2 + $0x368] sm:$0xf] }
  0x61   : > { %1212 = vmatpush.bf16.msra.mxu3 %v1888_v11  ;;  %1173 = vmatpush.bf16.msra.mxu0 %v1756_v27  ;;  %v1996_v11 = vld [vmem:[#allocation2 + $0x264] sm:$0xf] }
  0x62   : > { %1199 = vmatpush.bf16.msra.mxu2 %v1760_v29  ;;  %v1712_v16 = vor.u32 %v1996_v11, %v1709_v52  ;;  %v1692_v29 = vor.u32 %v1994_v25, %v1691_v24  ;;  %v1781_v11 = vld [vmem:[#allocation2 + $0x2f8] sm:$0xf0] }
  0x63   : > { %1186 = vmatpush.bf16.msra.mxu1 %v1884_v34  ;;  %v2016_v34 = vld [vmem:[#allocation2 + $0x304] sm:$0xf]  ;;  %v1784_v52 = vor.u32 %v2013_v10, %v1781_v11  ;;  %v1877_v25 = vld [vmem:[#allocation2 + $0x3b8] sm:$0xf0]  ;;  %v2001_v10 = vld [vmem:[#allocation2 + $0x28c] sm:$0xf] }
  0x64   : > { %v1733_v11 = vld [vmem:[#allocation2 + $0x298] sm:$0xf0] }
  0x65   : > { %1213 = vmatpush.bf16.msra.mxu3 %v1872_v23  ;;  %1174 = vmatpush.bf16.msra.mxu0 %v1740_v43  ;;  %v1990_v43 = vld [vmem:[#allocation2 + $0x22c] sm:$0xf0] }
  0x66   : > { %1200 = vmatpush.bf16.msra.mxu2 %v1744_v46  ;;  %v1676_v47 = vor.u32 %v1990_v43, %v1675_v40  ;;  %v2043_v40 = vld [vmem:[#allocation2 + $0x3d4] sm:$0xf0] }
  0x67   : > { %1187 = vmatpush.bf16.msra.mxu1 %v1868_v50  ;;  %v1680_v50 = vor.u32 %v1988_v44, %v1677_v48  ;;  %v1654_v48 = vld [vmem:[%s2326_s3 + $0x8] sm:$0xff] }
  0x69   : > { %1214 = vmatpush.bf16.msra.mxu3 %v1856_v37  ;;  %1175 = vmatpush.bf16.msra.mxu0 %v1724_v61  ;;  %v1792_v37 = vor.u32 %v2016_v34, %v1789_v35  ;;  %v1891_v34 = vld [vmem:[#allocation2 + $0x3c8] sm:$0xf]  ;;  %v2031_v35 = vld [vmem:[#allocation2 + $0x374] sm:$0xf0] }
  0x6a   : > { %1201 = vmatpush.bf16.msra.mxu2 %v1728_v0  ;;  %v1661_v0 = vld [vmem:[#allocation2 + $0x210] sm:$0xf0] }
  0x6b   : > { %1188 = vmatpush.bf16.msra.mxu1 %v1852_v6 }
  0x6d   : > { %1215 = vmatpush.bf16.msra.mxu3 %v1840_v56  ;;  %1176 = vmatpush.bf16.msra.mxu0 %v1708_v14  ;;  %v275_v56 = vperm.slane %v2221_v15, 2  ;;  %v1829_v14 = vld [vmem:[#allocation2 + $0x358] sm:$0xf0]  ;;  %v205_v15 = vld [vmem:[%s2327_s4] sm:$0xff] }
  0x6e   : > { %1202 = vmatpush.bf16.msra.mxu2 %v1712_v16  ;;  %v1787_v16 = vld [vmem:[#allocation2 + $0x300] sm:$0xf] }
  0x6f   : > { %1189 = vmatpush.bf16.msra.mxu1 %v1836_v19  ;;  %v1907_v19 = vld [vmem:[#allocation2 + $0x3e8] sm:$0xf] }
  0x71   : > { %1216 = vmatpush.bf16.msra.mxu3 %v1824_v8  ;;  %1177 = vmatpush.bf16.msra.mxu0 %v1692_v29  ;;  %v1664_v8 = vor.u32 %v1984_v63, %v1661_v0  ;;  %v2279_v63 = vpack.c.bf16 %v1654_v48, %v1654_v48 }
  0x72   : > { %1203 = vmatpush.bf16.msra.mxu2 %v1696_v31 }
  0x75   : > { %1178 = vmatpush.bf16.msra.mxu0 %v1676_v47  ;;  %v1747_v47 = vld [vmem:[#allocation2 + $0x2a8] sm:$0xf] }
  0x76   : > { %1204 = vmatpush.bf16.msra.mxu2 %v1680_v50 }
  0x79   : > { %1179 = vmatpush.bf16.msra.mxu0 %v1660_v7 }
  0x7a   : > { %1205 = vmatpush.bf16.msra.mxu2 %v1664_v8 }
  0x7e   : > { %1250 = vmatpush.bf16.msrb.mxu2 %v1784_v52 }
  0xb7   : > { %v610_v33 = vpop.f32.mrf.mxu0 }
  0xb8   : > { %v611_v36 = vadd.f32 %v610_v33, %v273_v20  ;;  %v1805_v20 = vld [vmem:[#allocation2 + $0x330] sm:$0xf0]  ;;  %v2026_v33 = vld [vmem:[#allocation2 + $0x34c] sm:$0xf0] }
  0xb9   : > { %v1808_v23 = vor.u32 %v2020_v18, %v1805_v20  ;;  %v1788_v18 = vor.u32 %v2018_v17, %v1787_v16  ;;  %v2047_v20 = vld [vmem:[#allocation2 + $0x3f4] sm:$0xf0]  ;;  %v1736_v17 = vor.u32 %v2001_v10, %v1733_v11  ;;  %v1669_v10 = vld [vmem:[#allocation2 + $0x218] sm:$0xf0] }
  0xba   : > { %v1908_v24 = vor.u32 %v2047_v20, %v1907_v19  ;;  %v2025_v19 = vld [vmem:[#allocation2 + $0x34c] sm:$0xf] }
  0xbb   : > { %v623_v42 = vpop.f32.mrf.mxu1  ;;  %1217 = vmatpush.bf16.msra.mxu3 %v1808_v23 }
  0xbc   : > { %v624_v45 = vadd.f32 %v623_v42, %v611_v36  ;;  %v1820_v36 = vor.u32 %v2026_v33, %v1819_v32  ;;  %v1912_v42 = vor.u32 %v2045_v38, %v1909_v39  ;;  %v2009_v32 = vld [vmem:[#allocation2 + $0x2cc] sm:$0xf]  ;;  %v1765_v33 = vld [vmem:[#allocation2 + $0x2d8] sm:$0xf0]  ;;  %v1844_v38 = vor.u32 %v2031_v35, %v1843_v53 }
  0xbd   : > { %v1768_v39 = vor.u32 %v2009_v32, %v1765_v33  ;;  %v1717_v32 = vld [vmem:[#allocation2 + $0x278] sm:$0xf0] }
  0xbe   : > { %v636_v54 = vpop.f32.mrf.mxu2  ;;  %v1651_v55 = vmul.f32 -1.442695, %v624_v45  ;;  %1190 = vmatpush.bf16.msra.mxu1 %v1820_v36 }
  0xbf   : > { %v637_v59 = vadd.f32 %v636_v54, %v274_v41  ;;  %v649_v60 = vpop.f32.mrf.mxu3  ;;  %v612_v5 = vpop.f32.mrf.mxu0  ;;  %1218 = vmatpush.bf16.msra.mxu3 %v1792_v37  ;;  %v2041_v54 = vld [vmem:[#allocation2 + $0x3cc] sm:$0xf]  ;;  %1251 = vmatpush.bf16.msrb.mxu2 %v1768_v39  ;;  %v1699_v39 = vld [vmem:[#allocation2 + $0x248] sm:$0xf] }
  0xc0   : > { %2070 = vpow2.f32 %v1651_v55  ;;  %v1893_v55 = vld [vmem:[#allocation2 + $0x3d8] sm:$0xf0]  ;;  %v2015_v5 = vld [vmem:[#allocation2 + $0x2f4] sm:$0xf0] }
  0xc1   : > { %v650_v4 = vadd.f32 %v649_v60, %v637_v59  ;;  %v1804_v60 = vor.u32 %v2022_v51, %v1803_v49  ;;  %v1896_v61 = vor.u32 %v2041_v54, %v1893_v55  ;;  %v2007_v51 = vld [vmem:[#allocation2 + $0x2b4] sm:$0xf0]  ;;  %v2005_v54 = vld [vmem:[#allocation2 + $0x2ac] sm:$0xf]  ;;  %v1749_v55 = vld [vmem:[#allocation2 + $0x2b8] sm:$0xf0] }
  0xc2   : > { %v1752_v58 = vor.u32 %v2005_v54, %v1749_v55  ;;  %1219 = vmatmul.bf16.vlgmr.msra.gmra.mxu3 %v2279_v63  ;;  %v1797_v54 = vld [vmem:[#allocation2 + $0x318] sm:$0xf0]  ;;  %v1683_v55 = vld [vmem:[#allocation2 + $0x228] sm:$0xf] }
  0xc3   : > { %v1652_v12 = vmul.f32 -1.442695, %v650_v4  ;;  %v625_v13 = vpop.f32.mrf.mxu1  ;;  %1263 = vmatpush.bf16.msrb.mxu3 %v1912_v42  ;;  %v1779_v4 = vld [vmem:[#allocation2 + $0x2e8] sm:$0xf]  ;;  %1191 = vmatpush.bf16.msra.mxu1 %v1804_v60 }
  0xc4   : > { %v1780_v9 = vor.u32 %v2015_v5, %v1779_v4  ;;  %v1875_v60 = vld [vmem:[#allocation2 + $0x3a8] sm:$0xf]  ;;  %v2003_v5 = vld [vmem:[#allocation2 + $0x294] sm:$0xf0]  ;;  %1252 = vmatpush.bf16.msrb.mxu2 %v1752_v58  ;;  %v1685_v58 = vld [vmem:[#allocation2 + $0x238] sm:$0xf0] }
  0xc5   : > { %2072 = vpow2.f32 %v1652_v12  ;;  %v1731_v4 = vld [vmem:[#allocation2 + $0x288] sm:$0xf] }
  0xc6   : > { %v2071_v21 = vpop.eup %2070  ;;  %v638_v22 = vpop.f32.mrf.mxu2  ;;  %1224 = vmatpush.bf16.msrb.mxu0 %v1780_v9  ;;  %v1732_v16 = vor.u32 %v2003_v5, %v1731_v4 }
  0xc7   : > { %v2225_v27 = vadd.f32 1.0, %v2071_v21  ;;  %v651_v28 = vpop.f32.mrf.mxu3  ;;  %1264 = vmatpush.bf16.msrb.mxu3 %v1896_v61  ;;  %v2037_v21 = vld [vmem:[#allocation2 + $0x3ac] sm:$0xf]  ;;  %1192 = vmatpush.bf16.msra.mxu1 %v1788_v18  ;;  %v2039_v61 = vld [vmem:[#allocation2 + $0x3b4] sm:$0xf0] }
  0xc8   : > { %v1880_v30 = vor.u32 %v2037_v21, %v1877_v25  ;;  %v1876_v0 = vor.u32 %v2039_v61, %v1875_v60  ;;  %v2035_v18 = vld [vmem:[#allocation2 + $0x394] sm:$0xf0]  ;;  %v1832_v25 = vor.u32 %v2025_v19, %v1829_v14  ;;  %1253 = vmatpush.bf16.msrb.mxu2 %v1736_v17 }
  0xc9   : > { %2074 = vrcp.f32 %v2225_v27  ;;  %v720_v46 = vand.u32 2147483648, %v2225_v27  ;;  %v718_v57 = vand.u32 2147483647, %v2225_v27  ;;  %vm714_vm0 = vweird.f32 %v2225_v27 }
  0xca   : > { %1193 = vmatmul.bf16.vlgmr.msra.gmra.mxu1 %v2279_v63 }
  0xcb   : > { %v2073_v41 = vpop.eup %2072  ;;  %v2240_v2 = vor.u32 1.1754944e-38, %v720_v46  ;;  %vm2254_vm4 = vcmp.eq.f32.partialorder %v718_v57, 8.507059e+37  ;;  %1237 = vmatpush.bf16.msrb.mxu1 %v1908_v24  ;;  %1265 = vmatpush.bf16.msrb.mxu3 %v1880_v30  ;;  %v1861_v46 = vld [vmem:[#allocation2 + $0x398] sm:$0xf0]  ;;  %v1748_v57 = vor.u32 %v2007_v51, %v1747_v47  ;;  %v2027_v47 = vld [vmem:[#allocation2 + $0x354] sm:$0xf0] }
  0xcc   : > { %v2228_v45 = vadd.f32 1.0, %v2073_v41  ;;  %v2033_v41 = vld [vmem:[#allocation2 + $0x38c] sm:$0xf] }
  0xcd   : > { %v1864_v50 = vor.u32 %v2033_v41, %v1861_v46  ;;  %v1993_v41 = vld [vmem:[#allocation2 + $0x24c] sm:$0xf]  ;;  %v1827_v46 = vld [vmem:[#allocation2 + $0x348] sm:$0xf] }
  0xce   : > { %2076 = vrcp.f32 %v2228_v45  ;;  %v737_v6 = vand.u32 2147483647, %v2228_v45  ;;  %v739_v12 = vand.u32 2147483648, %v2228_v45  ;;  %vm733_vm3 = vweird.f32 %v2228_v45  ;;  %v2017_v51 = vld [vmem:[#allocation2 + $0x30c] sm:$0xf] }
  0xcf   : > { %v2234_v59 = vpop.eup %2074  ;;  %1266 = vmatpush.bf16.msrb.mxu3 %v1864_v50  ;;  %v1828_v60 = vor.u32 %v2027_v47, %v1827_v46  ;;  %v1800_v61 = vor.u32 %v2017_v51, %v1797_v54 }
  0xd0   : > { %v710_v1 = vmul.f32 %v2234_v59, %v2225_v27  ;;  %vm715_vm1 = vweird.f32 %v2234_v59  ;;  %v2011_v27 = vld [vmem:[#allocation2 + $0x2d4] sm:$0xf0]  ;;  %v740_v36 = vor.u32 1.1754944e-38, %v739_v12  ;;  %vm2270_vm7 = vcmp.eq.f32.partialorder %v737_v6, 8.507059e+37  ;;  %v1859_v12 = vld [vmem:[#allocation2 + $0x388] sm:$0xf] }
  0xd1   : > { %vm2249_vm2 = vmor %vm714_vm0, %vm715_vm1  ;;  %v1764_v31 = vor.u32 %v2011_v27, %v1763_v26  ;;  %v1860_v24 = vor.u32 %v2035_v18, %v1859_v12  ;;  %v1715_v26 = vld [vmem:[#allocation2 + $0x268] sm:$0xf]  ;;  %v1999_v27 = vld [vmem:[#allocation2 + $0x274] sm:$0xf0] }
  0xd2   : > { %v711_v13 = vsub.f32 1.0, %v710_v1  ;;  %v1845_v1 = vld [vmem:[#allocation2 + $0x378] sm:$0xf0]  ;;  %v1795_v12 = vld [vmem:[#allocation2 + $0x308] sm:$0xf] }
  0xd3   : > { %1225 = vmatpush.bf16.msrb.mxu0 %v1764_v31  ;;  %v1848_v9 = vor.u32 %v2029_v62, %v1845_v1  ;;  %v1716_v31 = vor.u32 %v1999_v27, %v1715_v26  ;;  %v1811_v62 = vld [vmem:[#allocation2 + $0x328] sm:$0xf] }
  0xd4   : > { %v2258_v22 = vpop.eup %2076  ;;  %v712_v23 = vmul.f32 %v2234_v59, %v711_v13 }
  0xd5   : > { %v729_v28 = vmul.f32 %v2258_v22, %v2228_v45  ;;  %vm734_vm5 = vweird.f32 %v2258_v22  ;;  %v1892_v45 = vor.u32 %v2043_v40, %v1891_v34  ;;  %1267 = vmatpush.bf16.msrb.mxu3 %v1848_v9  ;;  %v1995_v40 = vld [vmem:[#allocation2 + $0x254] sm:$0xf0]  ;;  %v1985_v9 = vld [vmem:[#allocation2 + $0x20c] sm:$0xf] }
  0xd6   : > { %vm2266_vm6 = vmor %vm733_vm3, %vm734_vm5  ;;  %v713_v44 = vadd.f32 %v2234_v59, %v712_v23 }
  0xd7   : > { %v662_v29 = vpop.f32.mrf.mxu0  ;;  %v730_v42 = vsub.f32 1.0, %v729_v28  ;;  %1238 = vmatpush.bf16.msrb.mxu1 %v1892_v45  ;;  %1226 = vmatpush.bf16.msrb.mxu0 %v1748_v57  ;;  %v1997_v28 = vld [vmem:[#allocation2 + $0x26c] sm:$0xf]  ;;  %v1701_v45 = vld [vmem:[#allocation2 + $0x258] sm:$0xf0] }
  0xd8   : > { %v663_v37 = vadd.f32 %v662_v29, %v275_v56  ;;  %v717_v6 = vsel %vm2249_vm2, %v2234_v59, %v713_v44  ;;  %v1720_v34 = vor.u32 %v1997_v28, %v1717_v32  ;;  %v1704_v50 = vor.u32 %v1993_v41, %v1701_v45  ;;  %v1989_v57 = vld [vmem:[#allocation2 + $0x22c] sm:$0xf]  ;;  %v1656_v32 = vld [vmem:[%s2325_s2 + $0x4] sm:$0xf] }
  0xd9   : > { %v675_v43 = vpop.f32.mrf.mxu1  ;;  %v731_v56 = vmul.f32 %v2258_v22, %v730_v42  ;;  %1268 = vmatpush.bf16.msrb.mxu3 %v1832_v25  ;;  %v1688_v5 = vor.u32 %v1989_v57, %v1685_v58  ;;  %v846_v51 = vperm.slane %v1656_v32, 2 }
  0xda   : > { %v676_v49 = vadd.f32 %v675_v43, %v663_v37  ;;  %v1813_v37 = vld [vmem:[#allocation2 + $0x338] sm:$0xf0]  ;;  %1254 = vmatpush.bf16.msrb.mxu2 %v1720_v34 }
  0xdb   : > { %v732_v7 = vadd.f32 %v2258_v22, %v731_v56  ;;  %1239 = vmatpush.bf16.msrb.mxu1 %v1876_v0  ;;  %1227 = vmatpush.bf16.msrb.mxu0 %v1732_v16  ;;  %v1991_v56 = vld [vmem:[#allocation2 + $0x234] sm:$0xf0]  ;;  %v1672_v16 = vor.u32 %v1985_v9, %v1669_v10 }
  0xdc   : > { %2078 = vtanh.f32 %v676_v49  ;;  %v1700_v49 = vor.u32 %v1995_v40, %v1699_v39  ;;  %v2023_v0 = vld [vmem:[#allocation2 + $0x334] sm:$0xf0]  ;;  %v1684_v4 = vor.u32 %v1991_v56, %v1683_v55 }
  0xdd   : > { %v736_v59 = vsel %vm2266_vm6, %v2258_v22, %v732_v7  ;;  %v1987_v7 = vld [vmem:[#allocation2 + $0x214] sm:$0xf0]  ;;  %v1812_v11 = vor.u32 %v2023_v0, %v1811_v62 }
  0xde   : > { %v688_v8 = vpop.f32.mrf.mxu2  ;;  %v741_v21 = vsel %vm2270_vm7, %v740_v36, %v736_v59  ;;  %v2021_v36 = vld [vmem:[#allocation2 + $0x32c] sm:$0xf]  ;;  %1255 = vmatpush.bf16.msrb.mxu2 %v1704_v50 }
  0xdf   : > { %v689_v13 = vadd.f32 %v688_v8, %v276_v3  ;;  %v701_v52 = vpop.f32.mrf.mxu3  ;;  %v664_v20 = vpop.f32.mrf.mxu0  ;;  %v722_v3 = vsel %vm2254_vm4, %v2240_v2, %v717_v6  ;;  %v763_v2 = vmul.f32 %v741_v21, %v205_v15  ;;  %1240 = vmatpush.bf16.msrb.mxu1 %v1860_v24  ;;  %v1816_v44 = vor.u32 %v2021_v36, %v1813_v37  ;;  %v1667_v6 = vld [vmem:[#allocation2 + $0x208] sm:$0xf] }
  0xe0   : > { %1228 = vmatpush.bf16.msrb.mxu0 %v1716_v31  ;;  %v845_v37 = vperm.slane %v1656_v32, 1 }
  0xe1   : > { %v702_v23 = vadd.f32 %v701_v52, %v689_v13  ;;  %v677_v22 = vpop.f32.mrf.mxu1  ;;  %1269 = vmatpush.bf16.msrb.mxu3 %v1816_v44  ;;  %v2019_v13 = vld [vmem:[#allocation2 + $0x314] sm:$0xf0]  ;;  %v1668_v52 = vor.u32 %v1987_v7, %v1667_v6 }
  0xe2   : > { %v2079_v29 = vpop.eup %2078  ;;  %1256 = vmatpush.bf16.msrb.mxu2 %v1688_v5  ;;  %v1796_v17 = vor.u32 %v2019_v13, %v1795_v12 }
  0xe3   : > { %v1653_v30 = vmul.f32 -1.442695, %v702_v23  ;;  %v764_v33 = vmul.f32 %v2079_v29, %v722_v3  ;;  %1241 = vmatpush.bf16.msrb.mxu1 %v1844_v38 }
  0xe4   : > { %1229 = vmatpush.bf16.msrb.mxu0 %v1700_v49  ;;  %v847_v49 = vperm.slane %v1656_v32, 3 }
  0xe5   : > { %2080 = vpow2.f32 %v1653_v30  ;;  %v765_v42 = vadd.f32 %v764_v33, %v763_v2  ;;  %1270 = vmatpush.bf16.msrb.mxu3 %v1800_v61  ;;  %v844_v2 = vperm.slane %v1656_v32, 0 }
  0xe6   : > { %v690_v43 = vpop.f32.mrf.mxu2  ;;  %1257 = vmatpush.bf16.msrb.mxu2 %v1672_v16 }
  0xe7   : > { %v703_v48 = vpop.f32.mrf.mxu3  ;;  %769 = vst [vmem:[%s2327_s4] sm:$0xff] %v765_v42  ;;  %1242 = vmatpush.bf16.msrb.mxu1 %v1828_v60 }
  0xe8   : > { %1230 = vmatpush.bf16.msrb.mxu0 %v1684_v4  ;;  %1271 = vmatmul.bf16.vlgmr.msrb.gmra.mxu3 %v2279_v63 }
  0xeb   : > { %v2081_v1 = vpop.eup %2080  ;;  %1243 = vmatpush.bf16.msrb.mxu1 %v1812_v11 }
  0xec   : > { %v747_v8 = vadd.f32 1.0, %v2081_v1  ;;  %1231 = vmatpush.bf16.msrb.mxu0 %v1668_v52 }
  0xee   : > { %2082 = vrcp.f32 %v747_v8  ;;  %v759_v59 = vand.u32 2147483648, %v747_v8  ;;  %v757_v15 = vand.u32 2147483647, %v747_v8  ;;  %vm753_vm9 = vweird.f32 %v747_v8 }
  0xef   : > { %1244 = vmatpush.bf16.msrb.mxu1 %v1796_v17  ;;  %2084 = vtanh.f32 %v765_v42 }
  0xf0   : > { %v760_v21 = vor.u32 1.1754944e-38, %v759_v59  ;;  %vm758_vm11 = vcmp.eq.f32.partialorder %v757_v15, 8.507059e+37 }
  0xf2   : > { %1245 = vmatmul.bf16.vlgmr.msrb.gmra.mxu1 %v2279_v63 }
  0xf4   : > { %v2083_v18 = vpop.eup %2082 }
  0xf5   : > { %v749_v19 = vmul.f32 %v2083_v18, %v747_v8  ;;  %vm754_vm8 = vweird.f32 %v2083_v18  ;;  %v2085_v24 = vpop.eup %2084 }
  0xf6   : > { %vm755_vm10 = vmor %vm753_vm9, %vm754_vm8 }
  0xf7   : > { %v750_v14 = vsub.f32 1.0, %v749_v19 }
  0xf9   : > { %v751_v20 = vmul.f32 %v2083_v18, %v750_v14  ;;  %v1655_v14 = vld [vmem:[%s2327_s4 + $0x8] sm:$0xff] }
  0xfb   : > { %v752_v3 = vadd.f32 %v2083_v18, %v751_v20 }
  0xfd   : > { %v756_v23 = vsel %vm755_vm10, %v2083_v18, %v752_v3 }
  0xfe   : > { %v761_v22 = vsel %vm758_vm11, %v760_v21, %v756_v23 }
  0xff   : > { %v767_v25 = vmul.f32 %v2085_v24, %v761_v22 }
 0x101   : > { %768 = vst [vmem:[%s2326_s3] sm:$0xff] %v767_v25  ;;  %v770_v26 = vpack.c.bf16 %v767_v25, %v767_v25 }
 0x103   : > { %1180 = vmatmul.bf16.vlgmr.msra.gmra.mxu0 %v770_v26  ;;  %1206 = vmatmul.bf16.vlgmr.msra.gmra.mxu2 %v770_v26 }
 0x113   : > { %1232 = vmatmul.bf16.vlgmr.msrb.gmra.mxu0 %v770_v26  ;;  %1258 = vmatmul.bf16.vlgmr.msrb.gmra.mxu2 %v770_v26 }
 0x145   : > { %v1220_v27 = vpop.f32.mrf.mxu3 }
 0x147   : > { %v1194_v63 = vpop.f32.mrf.mxu1 }
 0x14d   : > { %v1222_v29 = vpop.f32.mrf.mxu3 }
 0x14f   : > { %v1196_v28 = vpop.f32.mrf.mxu1 }
 0x16b   : > { %v1272_v30 = vpop.f32.mrf.mxu3 }
 0x16f   : > { %v1246_v31 = vpop.f32.mrf.mxu1 }
 0x173   : > { %v1274_v53 = vpop.f32.mrf.mxu3 }
 0x177   : > { %v1248_v33 = vpop.f32.mrf.mxu1 }
 0x180   : > { %v1181_v34 = vpop.f32.mrf.mxu0 }
 0x181   : > { %v1182_v35 = vadd.f32 %v1181_v34, %v844_v2 }
 0x183   : > { %v1195_v36 = vadd.f32 %v1194_v63, %v1182_v35 }
 0x185   : > { %v1913_v38 = vmul.f32 -1.442695, %v1195_v36 }
 0x186   : > { %v1207_v39 = vpop.f32.mrf.mxu2 }
 0x187   : > { %2086 = vpow2.f32 %v1913_v38  ;;  %v1208_v40 = vadd.f32 %v1207_v39, %v845_v37 }
 0x188   : > { %v1183_v41 = vpop.f32.mrf.mxu0 }
 0x189   : > { %v1221_v42 = vadd.f32 %v1220_v27, %v1208_v40 }
 0x18b   : > { %v1914_v43 = vmul.f32 -1.442695, %v1221_v42 }
 0x18d   : > { %v2087_v44 = vpop.eup %2086  ;;  %2088 = vpow2.f32 %v1914_v43 }
 0x18e   : > { %v1279_v45 = vadd.f32 1.0, %v2087_v44  ;;  %v1209_v46 = vpop.f32.mrf.mxu2 }
 0x190   : > { %2090 = vrcp.f32 %v1279_v45  ;;  %v1233_v47 = vpop.f32.mrf.mxu0  ;;  %v1291_v8 = vand.u32 2147483648, %v1279_v45  ;;  %vm1285_vm13 = vweird.f32 %v1279_v45  ;;  %v1289_v11 = vand.u32 2147483647, %v1279_v45 }
 0x191   : > { %v1234_v58 = vadd.f32 %v1233_v47, %v846_v51 }
 0x192   : > { %v1292_v17 = vor.u32 1.1754944e-38, %v1291_v8  ;;  %vm1290_vm1 = vcmp.eq.f32.partialorder %v1289_v11, 8.507059e+37 }
 0x193   : > { %v2089_v48 = vpop.eup %2088  ;;  %v1247_v5 = vadd.f32 %v1246_v31, %v1234_v58 }
 0x194   : > { %v1298_v50 = vadd.f32 1.0, %v2089_v48 }
 0x196   : > { %v2091_v54 = vpop.eup %2090  ;;  %2092 = vrcp.f32 %v1298_v50  ;;  %v1259_v55 = vpop.f32.mrf.mxu2  ;;  %v1310_v12 = vand.u32 2147483648, %v1298_v50  ;;  %v1308_v16 = vand.u32 2147483647, %v1298_v50  ;;  %vm1304_vm0 = vweird.f32 %v1298_v50 }
 0x197   : > { %v1281_v56 = vmul.f32 %v2091_v54, %v1279_v45  ;;  %v1260_v57 = vadd.f32 %v1259_v55, %v847_v49  ;;  %vm1286_vm12 = vweird.f32 %v2091_v54 }
 0x198   : > { %v1235_v60 = vpop.f32.mrf.mxu0  ;;  %vm1287_vm14 = vmor %vm1285_vm13, %vm1286_vm12  ;;  %v1311_v20 = vor.u32 1.1754944e-38, %v1310_v12  ;;  %vm1309_vm3 = vcmp.eq.f32.partialorder %v1308_v16, 8.507059e+37 }
 0x199   : > { %v1282_v61 = vsub.f32 1.0, %v1281_v56  ;;  %v1273_v62 = vadd.f32 %v1272_v30, %v1260_v57 }
 0x19b   : > { %v1283_v0 = vmul.f32 %v2091_v54, %v1282_v61  ;;  %v1915_v1 = vmul.f32 -1.442695, %v1273_v62 }
 0x19c   : > { %v2093_v4 = vpop.eup %2092 }
 0x19d   : > { %v1300_v6 = vmul.f32 %v2093_v4, %v1298_v50  ;;  %v1284_v7 = vadd.f32 %v2091_v54, %v1283_v0  ;;  %2094 = vpow2.f32 %v1915_v1  ;;  %vm1305_vm15 = vweird.f32 %v2093_v4 }
 0x19e   : > { %v1261_v9 = vpop.f32.mrf.mxu2  ;;  %2096 = vtanh.f32 %v1247_v5  ;;  %vm1306_vm2 = vmor %vm1304_vm0, %vm1305_vm15 }
 0x19f   : > { %v1301_v10 = vsub.f32 1.0, %v1300_v6  ;;  %v1288_v52 = vsel %vm1287_vm14, %v2091_v54, %v1284_v7 }
 0x1a0   : > { %v1293_v59 = vsel %vm1290_vm1, %v1292_v17, %v1288_v52 }
 0x1a1   : > { %v1302_v13 = vmul.f32 %v2093_v4, %v1301_v10 }
 0x1a3   : > { %v2095_v18 = vpop.eup %2094  ;;  %v1303_v19 = vadd.f32 %v2093_v4, %v1302_v13 }
 0x1a4   : > { %v1318_v15 = vadd.f32 1.0, %v2095_v18  ;;  %v2097_v21 = vpop.eup %2096 }
 0x1a5   : > { %v1307_v3 = vsel %vm1306_vm2, %v2093_v4, %v1303_v19  ;;  %v1335_v22 = vmul.f32 %v2097_v21, %v1293_v59 }
 0x1a6   : > { %v1312_v23 = vsel %vm1309_vm3, %v1311_v20, %v1307_v3  ;;  %2098 = vrcp.f32 %v1318_v15  ;;  %v1330_v28 = vand.u32 2147483648, %v1318_v15  ;;  %v1328_v30 = vand.u32 2147483647, %v1318_v15 }
 0x1a7   : > { %v1334_v24 = vmul.f32 %v1655_v14, %v1312_v23  ;;  %vm1324_vm5 = vweird.f32 %v1318_v15 }
 0x1a8   : > { %v1331_v32 = vor.u32 1.1754944e-38, %v1330_v28  ;;  %vm1329_vm7 = vcmp.eq.f32.partialorder %v1328_v30, 8.507059e+37 }
 0x1a9   : > { %v1336_v25 = vadd.f32 %v1335_v22, %v1334_v24 }
 0x1ab   : > { %1917 = vst [vmem:[%s2327_s4 + $0x8] sm:$0xff] %v1336_v25  ;;  %2100 = vtanh.f32 %v1336_v25 }
 0x1ac   : > { %v2099_v26 = vpop.eup %2098 }
 0x1ad   : > { %v1320_v63 = vmul.f32 %v2099_v26, %v1318_v15  ;;  %vm1325_vm4 = vweird.f32 %v2099_v26 }
 0x1ae   : > { %vm1326_vm6 = vmor %vm1324_vm5, %vm1325_vm4 }
 0x1af   : > { %v1321_v27 = vsub.f32 1.0, %v1320_v63 }
 0x1b1   : > { %v1322_v29 = vmul.f32 %v2099_v26, %v1321_v27  ;;  %v2101_v2 = vpop.eup %2100 }
 0x1b3   : > { %v1323_v31 = vadd.f32 %v2099_v26, %v1322_v29 }
 0x1b5   : > { %v1327_v53 = vsel %vm1326_vm6, %v2099_v26, %v1323_v31 }
 0x1b6   : > { %v1332_v33 = vsel %vm1329_vm7, %v1331_v32, %v1327_v53 }
 0x1b7   : > { %v1338_v34 = vmul.f32 %v2101_v2, %v1332_v33 }
 0x1b9   : > { %1916 = vst [vmem:[%s2326_s3 + $0x8] sm:$0xff] %v1338_v34 }
 0x1ba PF: > { %s16_s15 = sadd.s32 1, %s2142_s15  }
 0x1bb   : > { %p13_p8 = scmp.ge.s32.totalorder %s16_s15, 9  }
 0x1bd   :  { %15 = sbr.rel (!%p13_p8) target bundleno = 1 (0x1), region = 79 }
 0x1c2   :  { %1358 = vsyncpa [#allocation3], 1 }
 0x1c3   :  { %1360 = vsyncpa [#allocation3 + $0x1], 1 }

// kernel: seq2seq_forward.3
= control target key start
LH: loop header
LB: loop body
LE: loop exit
PB: predicated region body
PF: predicated region fallthrough
CT: control target
= control target key end

     0   :  { %s2660_s15 = smov [#allocation6]   ;;  %s2661_s16 = smov [#allocation7]   ;;  %s2943_s0 = inlined_call_operand.vmem [shape: s32[8,8], index: 0, kind: input, shape index: {}]   ;;  %s2944_s2 = inlined_call_operand.vmem [shape: bf16[128,128], index: 2, kind: input, shape index: {}]   ;;  %s2945_s3 = inlined_call_operand.hbm [shape: bf16[2,256,512], index: 3, kind: input, shape index: {}]   ;;  %s2946_s4 = inlined_call_operand.vmem [shape: f32[2,1,512], index: 4, kind: input, shape index: {}]   ;;  %s2947_s5 = inlined_call_operand.vmem [shape: bf16[128,128], index: 5, kind: input, shape index: {}]   ;;  %s2948_s6 = inlined_call_operand.vmem [shape: f32[1,128], index: 6, kind: input, shape index: {}]   ;;  %s2949_s7 = inlined_call_operand.vmem [shape: f32[2,8,128], index: 7, kind: input, shape index: {}]   ;;  %s2950_s8 = inlined_call_operand.vmem [shape: f32[2,8,128], index: 8, kind: input, shape index: {}]   ;;  %s2951_s9 = inlined_call_operand.vmem [shape: f32[7,8,128], index: 9, kind: output, shape index: {}]   ;;  %s2952_s1 = inlined_call_operand.vmem [shape: s32[8], index: 1, kind: input, shape index: {}]  }
   0x1   :  { %s15_s11 = sshll.u32 %s2943_s0, 4  ;;  %s20_s14 = sshll.u32 %s2952_s1, 4  ;;  %s16_s11 = int_to_ptr.vmem [resolvable:$true] %s15_s11  ;;  %s21_s14 = int_to_ptr.vmem [resolvable:$true] %s20_s14 }
   0x2   :  { %18 = dma.vmem_to_smem %s16_s11, 128, %s2660_s15, [#allocation5] }
   0x3   :  { %23 = dma.vmem_to_smem %s21_s14, 16, %s2661_s16, [#allocation5] }
   0x4   :  { %2650 = dma.done.wait [#allocation5], 144 }
   0x5   :  { %2651 = vsyncadd [#allocation5], 4294967152 }
   0x6   :  { %26 = sfence }
   0x7   :  { %27 = vsyncpa [#allocation9], 0  ;;  %s2723_s17 = smov 0  }
   0x8 LB: > { %s225_s1 = sshll.u32 %s2945_s3, 4  ;;  %s2732_s19 = sadd.s32 4294967295, %s2658_s17   ;;  %s2658_s17 = sphi %s2723_s17, %s33_s17   ;;  %s226_s1 = int_to_ptr.hbm [resolvable:$true] %s225_s1 }
   0x9   : > { %p1786_p0 = scmp.ge.s32.totalorder %s2658_s17, 1  ;;  %p211_p1 = scmp.lt.s32.totalorder %s2658_s17, 8 }
   0xa   : > { %p1787_p2 = scmp.ne.s32.totalorder %s2732_s19, 0  ;;  %p2542_p3 = scmp.eq.s32.totalorder %s2732_s19, 0 }
   0xb   : > { %p212_p4 = pnand %p1786_p0, %p211_p1  ;;  %s2662_s20 = smov [#allocation8]  }
   0xc   : > { %s227_s21 = sshll.u32 %s2662_s20, 4  ;;  %s2663_s22 = smov 256   ;;  %s228_s21 = int_to_ptr.vmem [resolvable:$true] %s227_s21 }
   0xd   : > { %p2538_p5 = pneg %p212_p4  ;;  %s2664_s23 = smov 16  }
   0xe   : > { %258 = sbr.rel (%p212_p4) target bundleno = 1071 (0x42f), region = 48 }
   0xf   : > { %p2539_p6 = pnand %p2542_p3, %p2538_p5 }
  0x11   : > { %2541 = dma.hbm_to_vmem [thread:$0]  (!%p2539_p6), %s226_s1, 16384, %s228_s21, [#allocation9], %s2663_s22, %s2663_s22, %s2664_s23  }
  0x13   : > { %2653 = dma.done.wait (%p2542_p3), [#allocation9], 16384  }
  0x14   : > { %2655 = vsyncadd (%p2542_p3), [#allocation9], 4294950912  ;;  %p285_p7 = scmp.lt.s32.totalorder %s2732_s19, 6  ;;  %s289_s24 = sadd.s32 1, %s2732_s19  ;;  %v290_v0 = vlaneseq }
  0x15   : > { %297 = sbr.rel (%p1787_p2) target bundleno = 48 (0x30), region = 56  ;;  %s307_s15 = sld [smem:[#allocation6]] (!%p1787_p2) }
  0x16   : > { %s286_s25 = scalar_select %p285_p7, %s2732_s19, 6  ;;  %v2741_v1 = vshrl.u32 %v290_v0, 7  ;;  %v2743_v2 = vand.u32 127, %v290_v0 }
  0x17   : > { %s1792_s18 = sld [smem:[#allocation6 + $0x1]] (!%p1787_p2) }
  0x18   : > { %s1790_s26 = sshll.u32 %s286_s25, 3  ;;  %s1793_s1 = sld [smem:[#allocation6 + $0x2]] (!%p1787_p2) }
  0x19   : > { %s2748_s29 = scalar_lea.vmem %s2951_s9, %s1790_s26  ;;  %s1794_s20 = sld [smem:[#allocation6 + $0x3]] (!%p1787_p2) }
  0x1a   : > { %v298_v3 = vld [vmem:[%s2949_s7] sm:$0xff]  ;;  %v299_v4 = vld [vmem:[%s2949_s7 + $0x8] sm:$0xff]  ;;  %vm306_vm0 = vcmp.eq.s32.totalorder %v2741_v1, 0  ;;  %s1795_s21 = sld [smem:[#allocation6 + $0x4]]  ;;  %vm310_vm1 = vcmp.eq.s32.totalorder %v2741_v1, 1  ;;  %vm315_vm2 = vcmp.eq.s32.totalorder %v2741_v1, 2 }
  0x1b   : > { %v302_v5 = vld [vmem:[%s2950_s8] sm:$0xff]  ;;  %300 = vst [vmem:[#allocation2] sm:$0xff] %v298_v3  ;;  %v303_v6 = vld [vmem:[%s2950_s8 + $0x8] sm:$0xff]  ;;  %s1796_s22 = sld [smem:[#allocation6 + $0x5]]  ;;  %v308_v7 = vstv %s307_s15  ;;  %vm320_vm3 = vcmp.eq.s32.totalorder %v2741_v1, 3  ;;  %vm325_vm4 = vcmp.eq.s32.totalorder %v2741_v1, 4 }
  0x1c   : > { %301 = vst [vmem:[#allocation2 + $0x8] sm:$0xff] %v299_v4  ;;  %s1797_s23 = sld [smem:[#allocation6 + $0x6]]  ;;  %v309_v8 = vsel %vm306_vm0, %v308_v7, 0  ;;  %vm330_vm5 = vcmp.eq.s32.totalorder %v2741_v1, 5  ;;  %vm335_vm6 = vcmp.eq.s32.totalorder %v2741_v1, 6  ;;  %vm340_vm7 = vcmp.eq.s32.totalorder %v2741_v1, 7 }
  0x1d   : > { %304 = vst [vmem:[#allocation3 + $0x8] sm:$0xff] %v302_v5  ;;  %v312_v9 = vstv %s1792_s18  ;;  %s1798_s25 = sld [smem:[#allocation6 + $0x7]]  ;;  %v2665_v30 = vmov 0.0  }
  0x1e   : > { %305 = vst [vmem:[#allocation3] sm:$0xff] %v303_v6  ;;  %v313_v10 = vsel %vm310_vm1, %v312_v9, 0  ;;  %v317_v11 = vstv %s1793_s1 }
  0x1f   : > { %v314_v12 = vadd.s32 %v313_v10, %v309_v8  ;;  %v318_v13 = vsel %vm315_vm2, %v317_v11, 0  ;;  %v322_v14 = vstv %s1794_s20 }
  0x20   : > { %v323_v15 = vsel %vm320_vm3, %v322_v14, 0  ;;  %v327_v16 = vstv %s1795_s21 }
  0x21   : > { %v319_v17 = vadd.s32 %v318_v13, %v314_v12  ;;  %v332_v18 = vstv %s1796_s22  ;;  %v328_v19 = vsel %vm325_vm4, %v327_v16, 0 }
  0x22   : > { %v337_v21 = vstv %s1797_s23  ;;  %v333_v22 = vsel %vm330_vm5, %v332_v18, 0 }
  0x23   : > { %v324_v20 = vadd.s32 %v323_v15, %v319_v17  ;;  %v342_v24 = vstv %s1798_s25  ;;  %v338_v25 = vsel %vm335_vm6, %v337_v21, 0 }
  0x24   : > { %v343_v27 = vsel %vm340_vm7, %v342_v24, 0 }
  0x25   : > { %v329_v23 = vadd.s32 %v328_v19, %v324_v20 }
  0x27   : > { %v334_v26 = vadd.s32 %v333_v22, %v329_v23 }
  0x29   : > { %v339_v28 = vadd.s32 %v338_v25, %v334_v26 }
  0x2b   : > { %v344_v29 = vadd.s32 %v343_v27, %v339_v28 }
  0x2d   : > { %vm345_vm8 = vcmp.eq.s32.totalorder %v2743_v2, %v344_v29 }
  0x2e   : > { %v1799_v31 = vsel %vm345_vm8, 1.0, %v2665_v30 }
  0x2f   : > { %348 = vst [vmem:[#allocation4] sm:$0xff] %v1799_v31 }
  0x30 PF: > { %v2395_v32 = vld [vmem:[%s2944_s2 + $0x38] sm:$0xff]  ;;  %v2394_v33 = vld [vmem:[%s2944_s2 + $0x30] sm:$0xff]  ;;  %v2074_v34 = vld [vmem:[#allocation8 + $0x1e0] sm:$0xf]  ;;  %s2532_s26 = sshll.u32 %s2732_s19, 7  ;;  %s1670_s21 = sld [smem:[#allocation7 + %s289_s24]] }
  0x31   : > { %415 = vmatpush.bf16.msra.mxu0 %v2395_v32  ;;  %v2458_v35 = vld [vmem:[#allocation8 + $0x1ec] sm:$0xf0]  ;;  %v1946_v36 = vld [vmem:[#allocation8 + $0xe0] sm:$0xf]  ;;  %v2424_v42 = vld [vmem:[#allocation8 + $0xe4] sm:$0xf] }
  0x32   : > { %v2075_v37 = vor.u32 %v2458_v35, %v2074_v34  ;;  %v2426_v38 = vld [vmem:[#allocation8 + $0xec] sm:$0xf0]  ;;  %v2058_v39 = vld [vmem:[#allocation8 + $0x1c0] sm:$0xf]  ;;  %v1948_v43 = vld [vmem:[#allocation8 + $0xf0] sm:$0xf0] }
  0x33   : > { %v2454_v40 = vld [vmem:[#allocation8 + $0x1cc] sm:$0xf0]  ;;  %v1947_v41 = vor.u32 %v2426_v38, %v1946_v36  ;;  %v2393_v44 = vld [vmem:[%s2944_s2 + $0x28] sm:$0xff]  ;;  %v1951_v46 = vor.u32 %v2424_v42, %v1948_v43  ;;  %v1932_v53 = vld [vmem:[#allocation8 + $0xd0] sm:$0xf0]  ;;  %s2918_s27 = sadd.s32 128, %s2532_s26 }
  0x34   : > { %839 = vmatpush.bf16.msra.mxu2 %v2075_v37  ;;  %v2059_v45 = vor.u32 %v2454_v40, %v2058_v39  ;;  %v1930_v47 = vld [vmem:[#allocation8 + $0xc0] sm:$0xf]  ;;  %v2422_v48 = vld [vmem:[#allocation8 + $0xcc] sm:$0xf0]  ;;  %v2420_v52 = vld [vmem:[#allocation8 + $0xc4] sm:$0xf] }
  0x35   : > { %416 = vmatpush.bf16.msra.mxu0 %v2394_v33  ;;  %826 = vmatpush.bf16.msra.mxu1 %v1947_v41  ;;  %v1931_v49 = vor.u32 %v2422_v48, %v1930_v47  ;;  %v2042_v50 = vld [vmem:[#allocation8 + $0x1a0] sm:$0xf]  ;;  %v2450_v51 = vld [vmem:[#allocation8 + $0x1ac] sm:$0xf0]  ;;  %v1935_v54 = vor.u32 %v2420_v52, %v1932_v53  ;;  %v2392_v57 = vld [vmem:[%s2944_s2 + $0x20] sm:$0xff]  ;;  %s1676_s28 = sld [smem:[#allocation6 + %s2918_s27]] }
  0x36   : > { %852 = vmatpush.bf16.msra.mxu3 %v1951_v46  ;;  %v1914_v55 = vld [vmem:[#allocation8 + $0xa0] sm:$0xf]  ;;  %v2418_v56 = vld [vmem:[#allocation8 + $0xac] sm:$0xf0]  ;;  %v2043_v58 = vor.u32 %v2450_v51, %v2042_v50  ;;  %v2416_v59 = vld [vmem:[#allocation8 + $0xa4] sm:$0xf] }
  0x37   : > { %v1916_v60 = vld [vmem:[#allocation8 + $0xb0] sm:$0xf0]  ;;  %v1915_v61 = vor.u32 %v2418_v56, %v1914_v55  ;;  %v2026_v62 = vld [vmem:[#allocation8 + $0x180] sm:$0xf]  ;;  %v2446_v63 = vld [vmem:[#allocation8 + $0x18c] sm:$0xf0] }
  0x38   : > { %840 = vmatpush.bf16.msra.mxu2 %v2059_v45  ;;  %v1919_v0 = vor.u32 %v2416_v59, %v1916_v60  ;;  %v1898_v3 = vld [vmem:[#allocation8 + $0x80] sm:$0xf]  ;;  %v2414_v4 = vld [vmem:[#allocation8 + $0x8c] sm:$0xf0]  ;;  %v2412_v5 = vld [vmem:[#allocation8 + $0x84] sm:$0xf]  ;;  %v2027_v8 = vor.u32 %v2446_v63, %v2026_v62 }
  0x39   : > { %417 = vmatpush.bf16.msra.mxu0 %v2393_v44  ;;  %827 = vmatpush.bf16.msra.mxu1 %v1931_v49  ;;  %v1900_v6 = vld [vmem:[#allocation8 + $0x90] sm:$0xf0]  ;;  %v1899_v9 = vor.u32 %v2414_v4, %v1898_v3  ;;  %v2010_v10 = vld [vmem:[#allocation8 + $0x160] sm:$0xf]  ;;  %v2442_v11 = vld [vmem:[#allocation8 + $0x16c] sm:$0xf0] }
  0x3a   : > { %853 = vmatpush.bf16.msra.mxu3 %v1935_v54  ;;  %v2391_v7 = vld [vmem:[%s2944_s2 + $0x18] sm:$0xff]  ;;  %v1903_v12 = vor.u32 %v2412_v5, %v1900_v6  ;;  %v1882_v13 = vld [vmem:[#allocation8 + $0x60] sm:$0xf]  ;;  %v2408_v15 = vld [vmem:[#allocation8 + $0x64] sm:$0xf]  ;;  %v2011_v18 = vor.u32 %v2442_v11, %v2010_v10  ;;  %s1686_s10 = sadd.s32 2, %s2918_s27 }
  0x3b   : > { %v2410_v14 = vld [vmem:[#allocation8 + $0x6c] sm:$0xf0]  ;;  %v1884_v16 = vld [vmem:[#allocation8 + $0x70] sm:$0xf0]  ;;  %v2390_v17 = vld [vmem:[%s2944_s2 + $0x10] sm:$0xff]  ;;  %s1687_s11 = sld [smem:[#allocation6 + %s1686_s10]] }
  0x3c   : > { %841 = vmatpush.bf16.msra.mxu2 %v2043_v58  ;;  %v1883_v19 = vor.u32 %v2410_v14, %v1882_v13  ;;  %v1994_v20 = vld [vmem:[#allocation8 + $0x140] sm:$0xf]  ;;  %v2438_v21 = vld [vmem:[#allocation8 + $0x14c] sm:$0xf0]  ;;  %v1887_v22 = vor.u32 %v2408_v15, %v1884_v16  ;;  %v2404_v25 = vld [vmem:[#allocation8 + $0x44] sm:$0xf] }
  0x3d   : > { %418 = vmatpush.bf16.msra.mxu0 %v2392_v57  ;;  %828 = vmatpush.bf16.msra.mxu1 %v1915_v61  ;;  %v1866_v23 = vld [vmem:[#allocation8 + $0x40] sm:$0xf]  ;;  %v2406_v24 = vld [vmem:[#allocation8 + $0x4c] sm:$0xf0]  ;;  %v1868_v26 = vld [vmem:[#allocation8 + $0x50] sm:$0xf0]  ;;  %v1995_v28 = vor.u32 %v2438_v21, %v1994_v20 }
  0x3e   : > { %854 = vmatpush.bf16.msra.mxu3 %v1919_v0  ;;  %v2389_v27 = vld [vmem:[%s2944_s2 + $0x8] sm:$0xff]  ;;  %v1867_v30 = vor.u32 %v2406_v24, %v1866_v23  ;;  %v2434_v32 = vld [vmem:[#allocation8 + $0x12c] sm:$0xf0]  ;;  %v2076_v33 = vld [vmem:[#allocation8 + $0x1f0] sm:$0xf0]  ;;  %v1871_v34 = vor.u32 %v2404_v25, %v1868_v26  ;;  %s1692_s12 = sadd.s32 3, %s2918_s27 }
  0x3f   : > { %v2456_v29 = vld [vmem:[#allocation8 + $0x1e4] sm:$0xf]  ;;  %v1978_v31 = vld [vmem:[#allocation8 + $0x120] sm:$0xf]  ;;  %v2402_v36 = vld [vmem:[#allocation8 + $0x2c] sm:$0xf0] }
  0x40   : > { %842 = vmatpush.bf16.msra.mxu2 %v2027_v8  ;;  %v1850_v35 = vld [vmem:[#allocation8 + $0x20] sm:$0xf]  ;;  %v2388_v37 = vld [vmem:[%s2944_s2] sm:$0xff]  ;;  %v2400_v38 = vld [vmem:[#allocation8 + $0x24] sm:$0xf]  ;;  %v1979_v43 = vor.u32 %v2434_v32, %v1978_v31  ;;  %v2079_v44 = vor.u32 %v2456_v29, %v2076_v33  ;;  %s1693_s13 = sld [smem:[#allocation6 + %s1692_s12]] }
  0x41   : > { %419 = vmatpush.bf16.msra.mxu0 %v2391_v7  ;;  %829 = vmatpush.bf16.msra.mxu1 %v1899_v9  ;;  %v1852_v39 = vld [vmem:[#allocation8 + $0x30] sm:$0xf0]  ;;  %v349_v40 = vld [vmem:[#allocation4] sm:$0xff]  ;;  %v2452_v41 = vld [vmem:[#allocation8 + $0x1c4] sm:$0xf]  ;;  %v1851_v45 = vor.u32 %v2402_v36, %v1850_v35  ;;  %s1698_s14 = sadd.s32 4, %s2918_s27 }
  0x42   : > { %855 = vmatpush.bf16.msra.mxu3 %v1903_v12  ;;  %v2060_v42 = vld [vmem:[#allocation8 + $0x1d0] sm:$0xf0]  ;;  %v1962_v46 = vld [vmem:[#allocation8 + $0x100] sm:$0xf]  ;;  %v2430_v47 = vld [vmem:[#allocation8 + $0x10c] sm:$0xf0]  ;;  %v1855_v49 = vor.u32 %v2400_v38, %v1852_v39  ;;  %v350_v53 = vpack.c.bf16 %v349_v40, %v349_v40 }
  0x43   : > { %v2082_v48 = vld [vmem:[#allocation8 + $0x1e8] sm:$0xf]  ;;  %v2459_v50 = vld [vmem:[#allocation8 + $0x1f4] sm:$0xf0]  ;;  %v1834_v51 = vld [vmem:[#allocation8] sm:$0xf]  ;;  %v1963_v57 = vor.u32 %v2430_v47, %v1962_v46  ;;  %v2063_v61 = vor.u32 %v2452_v41, %v2060_v42 }
  0x44   : > { %843 = vmatpush.bf16.msra.mxu2 %v2011_v18  ;;  %v2398_v52 = vld [vmem:[#allocation8 + $0xc] sm:$0xf0]  ;;  %v2396_v54 = vld [vmem:[#allocation8 + $0x4] sm:$0xf]  ;;  %v1836_v55 = vld [vmem:[#allocation8 + $0x10] sm:$0xf0]  ;;  %v2083_v63 = vor.u32 %v2459_v50, %v2082_v48 }
  0x45   : > { %420 = vmatpush.bf16.msra.mxu0 %v2390_v17  ;;  %830 = vmatpush.bf16.msra.mxu1 %v1883_v19  ;;  %v1954_v56 = vld [vmem:[#allocation8 + $0xe8] sm:$0xf]  ;;  %v2427_v58 = vld [vmem:[#allocation8 + $0xf4] sm:$0xf0]  ;;  %v2425_v59 = vld [vmem:[#allocation8 + $0xec] sm:$0xf]  ;;  %v1835_v3 = vor.u32 %v2398_v52, %v1834_v51  ;;  %v1839_v4 = vor.u32 %v2396_v54, %v1836_v55 }
  0x46   : > { %856 = vmatpush.bf16.msra.mxu3 %v1887_v22  ;;  %v1956_v60 = vld [vmem:[#allocation8 + $0xf8] sm:$0xf0]  ;;  %v2448_v62 = vld [vmem:[#allocation8 + $0x1a4] sm:$0xf]  ;;  %v2044_v0 = vld [vmem:[#allocation8 + $0x1b0] sm:$0xf0]  ;;  %v1955_v7 = vor.u32 %v2427_v58, %v1954_v56 }
  0x47   : > { %v2066_v5 = vld [vmem:[#allocation8 + $0x1c8] sm:$0xf]  ;;  %v2455_v6 = vld [vmem:[#allocation8 + $0x1d4] sm:$0xf0]  ;;  %v1959_v8 = vor.u32 %v2425_v59, %v1956_v60  ;;  %v2421_v11 = vld [vmem:[#allocation8 + $0xcc] sm:$0xf]  ;;  %v2047_v13 = vor.u32 %v2448_v62, %v2044_v0 }
  0x48   : > { %844 = vmatpush.bf16.msra.mxu2 %v1995_v28  ;;  %v1938_v9 = vld [vmem:[#allocation8 + $0xc8] sm:$0xf]  ;;  %v2423_v10 = vld [vmem:[#allocation8 + $0xd4] sm:$0xf0]  ;;  %v1940_v12 = vld [vmem:[#allocation8 + $0xd8] sm:$0xf0]  ;;  %v2067_v16 = vor.u32 %v2455_v6, %v2066_v5 }
  0x49   : > { %421 = vmatpush.bf16.msra.mxu0 %v2389_v27  ;;  %831 = vmatpush.bf16.msra.mxu1 %v1867_v30  ;;  %v2444_v14 = vld [vmem:[#allocation8 + $0x184] sm:$0xf]  ;;  %v2028_v15 = vld [vmem:[#allocation8 + $0x190] sm:$0xf0]  ;;  %v2050_v17 = vld [vmem:[#allocation8 + $0x1a8] sm:$0xf]  ;;  %v1939_v20 = vor.u32 %v2423_v10, %v1938_v9  ;;  %v1943_v21 = vor.u32 %v2421_v11, %v1940_v12 }
  0x4a   : > { %857 = vmatpush.bf16.msra.mxu3 %v1871_v34  ;;  %v2451_v18 = vld [vmem:[#allocation8 + $0x1b4] sm:$0xf0]  ;;  %v1922_v22 = vld [vmem:[#allocation8 + $0xa8] sm:$0xf]  ;;  %v2417_v25 = vld [vmem:[#allocation8 + $0xac] sm:$0xf]  ;;  %v2031_v27 = vor.u32 %v2444_v14, %v2028_v15 }
  0x4b   : > { %v429_v19 = vld [vmem:[#allocation2] sm:$0xff]  ;;  %v2440_v28 = vld [vmem:[#allocation8 + $0x164] sm:$0xf]  ;;  %v2051_v29 = vor.u32 %v2451_v18, %v2050_v17  ;;  %v2012_v30 = vld [vmem:[#allocation8 + $0x170] sm:$0xf0]  ;;  %s1699_s15 = sld [smem:[#allocation6 + %s1698_s14]] }
  0x4c   : > { %845 = vmatpush.bf16.msra.mxu2 %v1979_v43  ;;  %v2797_v23 = vpack.c.bf16 %v429_v19, %v429_v19  ;;  %v2419_v24 = vld [vmem:[#allocation8 + $0xb4] sm:$0xf0]  ;;  %v1924_v26 = vld [vmem:[#allocation8 + $0xb8] sm:$0xf0]  ;;  %v2034_v31 = vld [vmem:[#allocation8 + $0x188] sm:$0xf]  ;;  %v2015_v35 = vor.u32 %v2440_v28, %v2012_v30 }
  0x4d   : > { %422 = vmatpush.bf16.msra.mxu0 %v2388_v37  ;;  %832 = vmatpush.bf16.msra.mxu1 %v1851_v45  ;;  %v2447_v32 = vld [vmem:[#allocation8 + $0x194] sm:$0xf0]  ;;  %v1923_v33 = vor.u32 %v2419_v24, %v1922_v22  ;;  %v1927_v34 = vor.u32 %v2417_v25, %v1924_v26  ;;  %v2436_v37 = vld [vmem:[#allocation8 + $0x144] sm:$0xf]  ;;  %v1996_v38 = vld [vmem:[#allocation8 + $0x150] sm:$0xf0] }
  0x4e   : > { %858 = vmatpush.bf16.msra.mxu3 %v1855_v49  ;;  %v2035_v36 = vor.u32 %v2447_v32, %v2034_v31  ;;  %v1999_v39 = vor.u32 %v2436_v37, %v1996_v38  ;;  %v2432_v40 = vld [vmem:[#allocation8 + $0x124] sm:$0xf]  ;;  %v1980_v41 = vld [vmem:[#allocation8 + $0x130] sm:$0xf0]  ;;  %v2457_v45 = vld [vmem:[#allocation8 + $0x1ec] sm:$0xf] }
  0x4f   : > { %v1983_v42 = vor.u32 %v2432_v40, %v1980_v41  ;;  %v2428_v43 = vld [vmem:[#allocation8 + $0x104] sm:$0xf]  ;;  %v2084_v46 = vld [vmem:[#allocation8 + $0x1f8] sm:$0xf0]  ;;  %v2453_v49 = vld [vmem:[#allocation8 + $0x1cc] sm:$0xf] }
  0x50   : > { %423 = vmatmul.bf16.vlgmr.msra.gmra.mxu0 %v350_v53  ;;  %846 = vmatpush.bf16.msra.mxu2 %v1963_v57  ;;  %v2087_v48 = vor.u32 %v2457_v45, %v2084_v46  ;;  %v2068_v50 = vld [vmem:[#allocation8 + $0x1d8] sm:$0xf0]  ;;  %v2449_v52 = vld [vmem:[#allocation8 + $0x1ac] sm:$0xf]  ;;  %v1906_v55 = vld [vmem:[#allocation8 + $0x88] sm:$0xf] }
  0x51   : > { %865 = vmatpush.bf16.msrb.mxu0 %v2079_v44  ;;  %833 = vmatpush.bf16.msra.mxu1 %v1835_v3  ;;  %v1964_v44 = vld [vmem:[#allocation8 + $0x110] sm:$0xf0]  ;;  %v2071_v51 = vor.u32 %v2453_v49, %v2068_v50  ;;  %v2052_v53 = vld [vmem:[#allocation8 + $0x1b8] sm:$0xf0]  ;;  %v2415_v56 = vld [vmem:[#allocation8 + $0x94] sm:$0xf0] }
  0x52   : > { %859 = vmatpush.bf16.msra.mxu3 %v1839_v4  ;;  %v1967_v47 = vor.u32 %v2428_v43, %v1964_v44  ;;  %v2055_v54 = vor.u32 %v2449_v52, %v2052_v53  ;;  %v2018_v57 = vld [vmem:[#allocation8 + $0x168] sm:$0xf]  ;;  %v1907_v58 = vor.u32 %v2415_v56, %v1906_v55  ;;  %v2443_v59 = vld [vmem:[#allocation8 + $0x174] sm:$0xf0]  ;;  %v2413_v60 = vld [vmem:[#allocation8 + $0x8c] sm:$0xf] }
  0x53   : > { %847 = vmatmul.bf16.vlgmr.msra.gmra.mxu2 %v2797_v23  ;;  %v2019_v62 = vor.u32 %v2443_v59, %v2018_v57  ;;  %v2445_v0 = vld [vmem:[#allocation8 + $0x18c] sm:$0xf]  ;;  %v2036_v3 = vld [vmem:[#allocation8 + $0x198] sm:$0xf0]  ;;  %v1890_v5 = vld [vmem:[#allocation8 + $0x68] sm:$0xf] }
  0x54   : > { %891 = vmatpush.bf16.msrb.mxu2 %v2083_v63  ;;  %v2039_v4 = vor.u32 %v2445_v0, %v2036_v3  ;;  %v2411_v6 = vld [vmem:[#allocation8 + $0x74] sm:$0xf0]  ;;  %v2409_v10 = vld [vmem:[#allocation8 + $0x6c] sm:$0xf]  ;;  %v1892_v11 = vld [vmem:[#allocation8 + $0x78] sm:$0xf0] }
  0x55   : > { %866 = vmatpush.bf16.msrb.mxu0 %v2063_v61  ;;  %878 = vmatpush.bf16.msrb.mxu1 %v1955_v7  ;;  %v1908_v61 = vld [vmem:[#allocation8 + $0x98] sm:$0xf0]  ;;  %v2002_v7 = vld [vmem:[#allocation8 + $0x148] sm:$0xf]  ;;  %v2439_v9 = vld [vmem:[#allocation8 + $0x154] sm:$0xf0] }
  0x56   : > { %904 = vmatpush.bf16.msrb.mxu3 %v1959_v8  ;;  %v1911_v63 = vor.u32 %v2413_v60, %v1908_v61  ;;  %v1891_v8 = vor.u32 %v2411_v6, %v1890_v5  ;;  %v2003_v12 = vor.u32 %v2439_v9, %v2002_v7  ;;  %v2441_v14 = vld [vmem:[#allocation8 + $0x16c] sm:$0xf]  ;;  %v2020_v15 = vld [vmem:[#allocation8 + $0x178] sm:$0xf0]  ;;  %v1874_v17 = vld [vmem:[#allocation8 + $0x48] sm:$0xf] }
  0x57   : > { %v2407_v18 = vld [vmem:[#allocation8 + $0x54] sm:$0xf0]  ;;  %v1986_v19 = vld [vmem:[#allocation8 + $0x128] sm:$0xf]  ;;  %v2405_v22 = vld [vmem:[#allocation8 + $0x4c] sm:$0xf] }
  0x58   : > { %892 = vmatpush.bf16.msrb.mxu2 %v2067_v16  ;;  %v2023_v16 = vor.u32 %v2441_v14, %v2020_v15  ;;  %v1876_v24 = vld [vmem:[#allocation8 + $0x58] sm:$0xf0]  ;;  %v1858_v30 = vld [vmem:[#allocation8 + $0x28] sm:$0xf]  ;;  %v2403_v31 = vld [vmem:[#allocation8 + $0x34] sm:$0xf0] }
  0x59   : > { %867 = vmatpush.bf16.msrb.mxu0 %v2047_v13  ;;  %879 = vmatpush.bf16.msrb.mxu1 %v1939_v20  ;;  %v1895_v13 = vor.u32 %v2409_v10, %v1892_v11  ;;  %v1875_v20 = vor.u32 %v2407_v18, %v1874_v17  ;;  %v1879_v26 = vor.u32 %v2405_v22, %v1876_v24  ;;  %v2004_v28 = vld [vmem:[#allocation8 + $0x158] sm:$0xf0]  ;;  %v1970_v32 = vld [vmem:[#allocation8 + $0x108] sm:$0xf]  ;;  %v2399_v43 = vld [vmem:[#allocation8 + $0x14] sm:$0xf0] }
  0x5a   : > { %905 = vmatpush.bf16.msrb.mxu3 %v1943_v21  ;;  %v2435_v21 = vld [vmem:[#allocation8 + $0x134] sm:$0xf0]  ;;  %v1988_v40 = vld [vmem:[#allocation8 + $0x138] sm:$0xf0]  ;;  %v1842_v41 = vld [vmem:[#allocation8 + $0x8] sm:$0xf] }
  0x5b   : > { %v1987_v25 = vor.u32 %v2435_v21, %v1986_v19  ;;  %v2397_v44 = vld [vmem:[#allocation8 + $0xc] sm:$0xf]  ;;  %v1844_v45 = vld [vmem:[#allocation8 + $0x18] sm:$0xf0]  ;;  %v1843_v46 = vor.u32 %v2399_v43, %v1842_v41  ;;  %v2334_v57 = vld [vmem:[#allocation8 + $0x3e0] sm:$0xf] }
  0x5c   : > { %893 = vmatpush.bf16.msrb.mxu2 %v2051_v29  ;;  %v1847_v49 = vor.u32 %v2397_v44, %v1844_v45  ;;  %v2206_v61 = vld [vmem:[#allocation8 + $0x2e0] sm:$0xf]  ;;  %v2518_v0 = vld [vmem:[#allocation8 + $0x3cc] sm:$0xf0]  ;;  %v2488_v3 = vld [vmem:[#allocation8 + $0x2e4] sm:$0xf] }
  0x5d   : > { %868 = vmatpush.bf16.msrb.mxu0 %v2031_v27  ;;  %880 = vmatpush.bf16.msrb.mxu1 %v1923_v33  ;;  %v2437_v27 = vld [vmem:[#allocation8 + $0x14c] sm:$0xf]  ;;  %v1859_v33 = vor.u32 %v2403_v31, %v1858_v30  ;;  %v2520_v7 = vld [vmem:[#allocation8 + $0x3e4] sm:$0xf]  ;;  %v2190_v10 = vld [vmem:[#allocation8 + $0x2c0] sm:$0xf] }
  0x5e   : > { %906 = vmatpush.bf16.msrb.mxu3 %v1927_v34  ;;  %v2007_v29 = vor.u32 %v2437_v27, %v2004_v28  ;;  %v2431_v34 = vld [vmem:[#allocation8 + $0x114] sm:$0xf0]  ;;  %v2486_v11 = vld [vmem:[#allocation8 + $0x2cc] sm:$0xf0]  ;;  %v2484_v15 = vld [vmem:[#allocation8 + $0x2c4] sm:$0xf] }
  0x5f   : > { %v1971_v37 = vor.u32 %v2431_v34, %v1970_v32  ;;  %v2514_v14 = vld [vmem:[#allocation8 + $0x3ac] sm:$0xf0]  ;;  %v2320_v21 = vld [vmem:[#allocation8 + $0x3d0] sm:$0xf0]  ;;  %v2286_v27 = vld [vmem:[#allocation8 + $0x380] sm:$0xf] }
  0x60   : > { %894 = vmatpush.bf16.msrb.mxu2 %v2035_v36  ;;  %v1860_v36 = vld [vmem:[#allocation8 + $0x38] sm:$0xf0]  ;;  %v2480_v30 = vld [vmem:[#allocation8 + $0x2a4] sm:$0xf]  ;;  %v2176_v32 = vld [vmem:[#allocation8 + $0x2b0] sm:$0xf0] }
  0x61   : > { %869 = vmatpush.bf16.msrb.mxu0 %v2015_v35  ;;  %881 = vmatpush.bf16.msrb.mxu1 %v1907_v58  ;;  %v2401_v35 = vld [vmem:[#allocation8 + $0x2c] sm:$0xf]  ;;  %v2522_v58 = vld [vmem:[#allocation8 + $0x3ec] sm:$0xf0]  ;;  %v2304_v34 = vld [vmem:[#allocation8 + $0x3b0] sm:$0xf0] }
  0x62   : > { %907 = vmatpush.bf16.msrb.mxu3 %v1911_v63  ;;  %v1863_v38 = vor.u32 %v2401_v35, %v1860_v36  ;;  %v2335_v60 = vor.u32 %v2522_v58, %v2334_v57  ;;  %v2814_v35 = vld [vmem:[%s2946_s4] sm:$0xf]  ;;  %v2179_v36 = vor.u32 %v2480_v30, %v2176_v32  ;;  %v2476_v43 = vld [vmem:[#allocation8 + $0x284] sm:$0xf]  ;;  %v2160_v44 = vld [vmem:[#allocation8 + $0x290] sm:$0xf0] }
  0x63   : > { %v2254_v57 = vld [vmem:[#allocation8 + $0x340] sm:$0xf]  ;;  %v2112_v32 = vld [vmem:[#allocation8 + $0x230] sm:$0xf0]  ;;  %s1704_s16 = sadd.s32 5, %s2918_s27  ;;  %s1710_s18 = sadd.s32 6, %s2918_s27 }
  0x64   : > { %895 = vmatpush.bf16.msrb.mxu2 %v2019_v62  ;;  %v2490_v62 = vld [vmem:[#allocation8 + $0x2ec] sm:$0xf0]  ;;  %s1705_s0 = sld [smem:[#allocation6 + %s1704_s16]]  ;;  %s1716_s20 = sadd.s32 7, %s2918_s27 }
  0x65   : > { %870 = vmatpush.bf16.msrb.mxu0 %v1999_v39  ;;  %882 = vmatpush.bf16.msrb.mxu1 %v1891_v8  ;;  %v2433_v39 = vld [vmem:[#allocation8 + $0x12c] sm:$0xf]  ;;  %v2207_v63 = vor.u32 %v2490_v62, %v2206_v61  ;;  %v2336_v8 = vld [vmem:[#allocation8 + $0x3f0] sm:$0xf0]  ;;  %s1711_s1 = sld [smem:[#allocation6 + %s1710_s18]]  ;;  %p1671_p8 = scmp.ne.s32.totalorder %s1670_s21, 0 }
  0x66   : > { %908 = vmatpush.bf16.msrb.mxu3 %v1895_v13  ;;  %v2339_v9 = vor.u32 %v2520_v7, %v2336_v8  ;;  %v2191_v13 = vor.u32 %v2486_v11, %v2190_v10  ;;  %v2144_v61 = vld [vmem:[#allocation8 + $0x270] sm:$0xf0]  ;;  %v2238_v7 = vld [vmem:[#allocation8 + $0x320] sm:$0xf]  ;;  %v2498_v10 = vld [vmem:[#allocation8 + $0x32c] sm:$0xf0] }
  0x67   : > { %v2468_v11 = vld [vmem:[#allocation8 + $0x244] sm:$0xf]  ;;  %s1717_s22 = sld [smem:[#allocation6 + %s1716_s20]] }
  0x68   : > { %896 = vmatpush.bf16.msrb.mxu2 %v2003_v12  ;;  %v2302_v12 = vld [vmem:[#allocation8 + $0x3a0] sm:$0xf]  ;;  %s1672_s23 = scalar_select %p1671_p8, 1, 0 }
  0x69   : > { %871 = vmatpush.bf16.msrb.mxu0 %v1983_v42  ;;  %883 = vmatpush.bf16.msrb.mxu1 %v1875_v20  ;;  %v1991_v42 = vor.u32 %v2433_v39, %v1988_v40  ;;  %v2303_v18 = vor.u32 %v2514_v14, %v2302_v12  ;;  %v2516_v20 = vld [vmem:[#allocation8 + $0x3c4] sm:$0xf]  ;;  %v2478_v39 = vld [vmem:[#allocation8 + $0x28c] sm:$0xf0]  ;;  %v2270_v40 = vld [vmem:[#allocation8 + $0x360] sm:$0xf]  ;;  %v2239_v12 = vor.u32 %v2498_v10, %v2238_v7 }
  0x6a   : > { %909 = vmatpush.bf16.msrb.mxu3 %v1879_v26  ;;  %v2323_v24 = vor.u32 %v2516_v20, %v2320_v21  ;;  %v2482_v26 = vld [vmem:[#allocation8 + $0x2ac] sm:$0xf0]  ;;  %v2500_v14 = vld [vmem:[#allocation8 + $0x344] sm:$0xf]  ;;  %v2110_v21 = vld [vmem:[#allocation8 + $0x220] sm:$0xf]  ;;  %s1673_s19 = scvt.s32.f32 %s1672_s23 }
  0x6b   : > { %v2515_v10 = vld [vmem:[#allocation8 + $0x3b4] sm:$0xf0] }
  0x6c   : > { %897 = vmatpush.bf16.msrb.mxu2 %v1987_v25  ;;  %v2174_v25 = vld [vmem:[#allocation8 + $0x2a0] sm:$0xf]  ;;  %s1726_s24 = ssub.f32 1.0, %s1673_s19 }
  0x6d   : > { %872 = vmatpush.bf16.msrb.mxu0 %v1967_v47  ;;  %884 = vmatpush.bf16.msrb.mxu1 %v1859_v33  ;;  %v2429_v47 = vld [vmem:[#allocation8 + $0x10c] sm:$0xf]  ;;  %v2175_v28 = vor.u32 %v2482_v26, %v2174_v25  ;;  %v2512_v33 = vld [vmem:[#allocation8 + $0x3a4] sm:$0xf]  ;;  %v2222_v25 = vld [vmem:[#allocation8 + $0x300] sm:$0xf] }
  0x6e   : > { %910 = vmatpush.bf16.msrb.mxu3 %v1863_v38  ;;  %v2158_v38 = vld [vmem:[#allocation8 + $0x280] sm:$0xf] }
  0x6f   : > { %v2159_v41 = vor.u32 %v2478_v39, %v2158_v38  ;;  %v2342_v38 = vld [vmem:[#allocation8 + $0x3e8] sm:$0xf]  ;;  %v2523_v39 = vld [vmem:[#allocation8 + $0x3f4] sm:$0xf0] }
  0x70   : > { %873 = vmatmul.bf16.vlgmr.msrb.gmra.mxu0 %v2797_v23  ;;  %898 = vmatpush.bf16.msrb.mxu2 %v1971_v37  ;;  %v2307_v37 = vor.u32 %v2512_v33, %v2304_v34  ;;  %v2496_v33 = vld [vmem:[#allocation8 + $0x324] sm:$0xf] }
  0x71   : > { %917 = vmatpush.bf16.msra.mxu0 %v2087_v48  ;;  %v1972_v48 = vld [vmem:[#allocation8 + $0x118] sm:$0xf0]  ;;  %885 = vmatpush.bf16.msrb.mxu1 %v1843_v46 }
  0x72   : > { %v1975_v50 = vor.u32 %v2429_v47, %v1972_v48  ;;  %911 = vmatpush.bf16.msrb.mxu3 %v1847_v49  ;;  %v2163_v47 = vor.u32 %v2476_v43, %v2160_v44  ;;  %v2508_v48 = vld [vmem:[#allocation8 + $0x384] sm:$0xf]  ;;  %v2288_v49 = vld [vmem:[#allocation8 + $0x390] sm:$0xf0]  ;;  %v2462_v43 = vld [vmem:[#allocation8 + $0x20c] sm:$0xf0] }
  0x73   : > { %899 = vmatmul.bf16.vlgmr.msrb.gmra.mxu2 %v2797_v23  ;;  %v2460_v44 = vld [vmem:[#allocation8 + $0x204] sm:$0xf] }
  0x74   : > { %1410 = vmatpush.bf16.msra.mxu2 %v2335_v60  ;;  %v2472_v60 = vld [vmem:[#allocation8 + $0x264] sm:$0xf] }
  0x75   : > { %918 = vmatpush.bf16.msra.mxu0 %v2071_v51 }
  0x79   : > { %919 = vmatpush.bf16.msra.mxu0 %v2055_v54 }
  0x7d   : > { %920 = vmatpush.bf16.msra.mxu0 %v2039_v4  ;;  %v2208_v4 = vld [vmem:[#allocation8 + $0x2f0] sm:$0xf0] }
  0x7e   : > { %v2211_v6 = vor.u32 %v2488_v3, %v2208_v4 }
  0x81   : > { %921 = vmatpush.bf16.msra.mxu0 %v2023_v16  ;;  %v2192_v16 = vld [vmem:[#allocation8 + $0x2d0] sm:$0xf0] }
  0x82   : > { %v2195_v19 = vor.u32 %v2484_v15, %v2192_v16  ;;  %v2256_v15 = vld [vmem:[#allocation8 + $0x350] sm:$0xf0] }
  0x83   : > { %v2259_v20 = vor.u32 %v2500_v14, %v2256_v15  ;;  %v2517_v14 = vld [vmem:[#allocation8 + $0x3cc] sm:$0xf]  ;;  %v2328_v15 = vld [vmem:[#allocation8 + $0x3d8] sm:$0xf0] }
  0x85   : > { %922 = vmatpush.bf16.msra.mxu0 %v2007_v29  ;;  %v2510_v29 = vld [vmem:[#allocation8 + $0x38c] sm:$0xf0] }
  0x86   : > { %v2287_v31 = vor.u32 %v2510_v29, %v2286_v27  ;;  %v2464_v29 = vld [vmem:[#allocation8 + $0x224] sm:$0xf] }
  0x89   : > { %923 = vmatpush.bf16.msra.mxu0 %v1991_v42  ;;  %v2506_v42 = vld [vmem:[#allocation8 + $0x36c] sm:$0xf0] }
  0x8a   : > { %v2271_v46 = vor.u32 %v2506_v42, %v2270_v40  ;;  %v2094_v42 = vld [vmem:[#allocation8 + $0x200] sm:$0xf] }
  0x8d   : > { %924 = vmatpush.bf16.msra.mxu0 %v1975_v50  ;;  %v498_v50 = vperm.slane %v2814_v35, 0 }
  0x90   : > { %925 = vmatmul.bf16.vlgmr.msra.gmra.mxu0 %v2797_v23  ;;  %v2318_v23 = vld [vmem:[#allocation8 + $0x3c0] sm:$0xf] }
  0x91   : > { %v2319_v5 = vor.u32 %v2518_v0, %v2318_v23  ;;  %1436 = vmatpush.bf16.msrb.mxu0 %v2339_v9  ;;  %v2147_v23 = vor.u32 %v2472_v60, %v2144_v61  ;;  %v2272_v0 = vld [vmem:[#allocation8 + $0x370] sm:$0xf0]  ;;  %v2489_v60 = vld [vmem:[#allocation8 + $0x2ec] sm:$0xf] }
  0x93   : > { %1411 = vmatpush.bf16.msra.mxu2 %v2319_v5  ;;  %v2126_v5 = vld [vmem:[#allocation8 + $0x240] sm:$0xf] }
  0x95   : > { %1437 = vmatpush.bf16.msrb.mxu0 %v2323_v24  ;;  %v2466_v24 = vld [vmem:[#allocation8 + $0x22c] sm:$0xf0] }
  0x96   : > { %v2111_v27 = vor.u32 %v2466_v24, %v2110_v21  ;;  %v2331_v21 = vor.u32 %v2517_v14, %v2328_v15  ;;  %v2483_v24 = vld [vmem:[#allocation8 + $0x2b4] sm:$0xf0]  ;;  %v2280_v14 = vld [vmem:[#allocation8 + $0x378] sm:$0xf0] }
  0x97   : > { %1412 = vmatpush.bf16.msra.mxu2 %v2303_v18  ;;  %v499_v18 = vperm.slane %v2814_v35, 1 }
  0x99   : > { %1438 = vmatpush.bf16.msrb.mxu0 %v2307_v37 }
  0x9b   : > { %1413 = vmatpush.bf16.msra.mxu2 %v2287_v31 }
  0x9f   : > { %1414 = vmatpush.bf16.msra.mxu2 %v2271_v46  ;;  %v2095_v46 = vor.u32 %v2462_v43, %v2094_v42  ;;  %v2278_v42 = vld [vmem:[#allocation8 + $0x368] sm:$0xf]  ;;  %v2507_v43 = vld [vmem:[#allocation8 + $0x374] sm:$0xf0] }
  0xcd   : > { %v424_v51 = vpop.f32.mrf.mxu0 }
  0xce   : > { %v428_v52 = vpack.c.bf16 %v424_v51, %v424_v51  ;;  %v2291_v51 = vor.u32 %v2508_v48, %v2288_v49  ;;  %v2492_v48 = vld [vmem:[#allocation8 + $0x304] sm:$0xf]  ;;  %v2224_v49 = vld [vmem:[#allocation8 + $0x310] sm:$0xf0] }
  0xd0   : > { %834 = vmatmul.bf16.vlgmr.msra.gmra.mxu1 %v428_v52  ;;  %860 = vmatmul.bf16.vlgmr.msra.gmra.mxu3 %v428_v52 }
  0xd1   : > { %1397 = vmatpush.bf16.msra.mxu1 %v2207_v63  ;;  %1423 = vmatpush.bf16.msra.mxu3 %v2211_v6  ;;  %v2504_v63 = vld [vmem:[#allocation8 + $0x364] sm:$0xf]  ;;  %v2470_v6 = vld [vmem:[#allocation8 + $0x24c] sm:$0xf0] }
  0xd2   : > { %1439 = vmatpush.bf16.msrb.mxu0 %v2291_v51  ;;  %v2275_v3 = vor.u32 %v2504_v63, %v2272_v0  ;;  %v2127_v9 = vor.u32 %v2470_v6, %v2126_v5  ;;  %v2227_v51 = vor.u32 %v2492_v48, %v2224_v49  ;;  %v2487_v5 = vld [vmem:[#allocation8 + $0x2d4] sm:$0xf0]  ;;  %v2310_v6 = vld [vmem:[#allocation8 + $0x3a8] sm:$0xf]  ;;  %v2509_v49 = vld [vmem:[#allocation8 + $0x38c] sm:$0xf] }
  0xd5   : > { %v426_v53 = vpop.f32.mrf.mxu0  ;;  %1398 = vmatpush.bf16.msra.mxu1 %v2191_v13  ;;  %1424 = vmatpush.bf16.msra.mxu3 %v2195_v19  ;;  %v2128_v13 = vld [vmem:[#allocation8 + $0x250] sm:$0xf0] }
  0xd6   : > { %v2805_v55 = vpop.f32.mrf.mxu2  ;;  %v2142_v53 = vld [vmem:[#allocation8 + $0x260] sm:$0xf]  ;;  %1440 = vmatpush.bf16.msrb.mxu0 %v2275_v3  ;;  %v2131_v19 = vor.u32 %v2468_v11, %v2128_v13  ;;  %v2485_v11 = vld [vmem:[#allocation8 + $0x2cc] sm:$0xf]  ;;  %v2200_v13 = vld [vmem:[#allocation8 + $0x2d8] sm:$0xf0] }
  0xd9   : > { %1399 = vmatpush.bf16.msra.mxu1 %v2175_v28  ;;  %1425 = vmatpush.bf16.msra.mxu3 %v2179_v36  ;;  %v2494_v28 = vld [vmem:[#allocation8 + $0x30c] sm:$0xf0]  ;;  %v2115_v36 = vor.u32 %v2464_v29, %v2112_v32  ;;  %v501_v29 = vperm.slane %v2814_v35, 3  ;;  %v2481_v32 = vld [vmem:[#allocation8 + $0x2ac] sm:$0xf] }
  0xda   : > { %1441 = vmatpush.bf16.msrb.mxu0 %v2259_v20  ;;  %v2223_v31 = vor.u32 %v2494_v28, %v2222_v25  ;;  %v2203_v20 = vor.u32 %v2485_v11, %v2200_v13  ;;  %v2294_v25 = vld [vmem:[#allocation8 + $0x388] sm:$0xf]  ;;  %v500_v28 = vperm.slane %v2814_v35, 2  ;;  %v2479_v35 = vld [vmem:[#allocation8 + $0x294] sm:$0xf0] }
  0xdb   : > { %v2505_v13 = vld [vmem:[#allocation8 + $0x36c] sm:$0xf] }
  0xdd   : > { %1400 = vmatpush.bf16.msra.mxu1 %v2159_v41  ;;  %1426 = vmatpush.bf16.msra.mxu3 %v2163_v47  ;;  %v2343_v41 = vor.u32 %v2523_v39, %v2342_v38  ;;  %v2096_v47 = vld [vmem:[#allocation8 + $0x210] sm:$0xf0]  ;;  %v2166_v38 = vld [vmem:[#allocation8 + $0x288] sm:$0xf] }
  0xde   : > { %v850_v59 = vpop.f32.mrf.mxu2  ;;  %v2167_v48 = vor.u32 %v2479_v35, %v2166_v38  ;;  %v2118_v38 = vld [vmem:[#allocation8 + $0x228] sm:$0xf] }
  0xdf   : > { %v2502_v59 = vld [vmem:[#allocation8 + $0x34c] sm:$0xf0] }
  0xe0   : > { %886 = vmatmul.bf16.vlgmr.msrb.gmra.mxu1 %v428_v52  ;;  %912 = vmatmul.bf16.vlgmr.msrb.gmra.mxu3 %v428_v52  ;;  %v2255_v62 = vor.u32 %v2502_v59, %v2254_v57  ;;  %v2519_v59 = vld [vmem:[#allocation8 + $0x3d4] sm:$0xf0] }
  0xe1   : > { %1427 = vmatpush.bf16.msra.mxu3 %v2147_v23  ;;  %v2344_v23 = vld [vmem:[#allocation8 + $0x3f8] sm:$0xf0] }
  0xe2   : > { %1415 = vmatpush.bf16.msra.mxu2 %v2255_v62  ;;  %v2216_v62 = vld [vmem:[#allocation8 + $0x2f8] sm:$0xf0] }
  0xe3   : > { %v2219_v0 = vor.u32 %v2489_v60, %v2216_v62 }
  0xe5   : > { %1428 = vmatpush.bf16.msra.mxu3 %v2131_v19  ;;  %v997_v19 = vld [vmem:[#allocation2 + $0x8] sm:$0xff] }
  0xe6   : > { %1416 = vmatpush.bf16.msra.mxu2 %v2239_v12  ;;  %v2311_v12 = vor.u32 %v2515_v10, %v2310_v6 }
  0xe9   : > { %1429 = vmatpush.bf16.msra.mxu3 %v2115_v36  ;;  %v2513_v36 = vld [vmem:[#allocation8 + $0x3ac] sm:$0xf] }
  0xea   : > { %1417 = vmatpush.bf16.msra.mxu2 %v2223_v31 }
  0xed   : > { %v2803_v54 = vpop.f32.mrf.mxu0 }
  0xee   : > { %1462 = vmatpush.bf16.msrb.mxu2 %v2343_v41 }
  0xf5   : > { %v876_v56 = vpop.f32.mrf.mxu0 }
  0xf6   : > { %v2809_v22 = vpop.f32.mrf.mxu2  ;;  %v2474_v56 = vld [vmem:[#allocation8 + $0x26c] sm:$0xf0] }
  0xf7   : > { %v2143_v58 = vor.u32 %v2474_v56, %v2142_v53  ;;  %v2491_v53 = vld [vmem:[#allocation8 + $0x2f4] sm:$0xf0]  ;;  %v2326_v56 = vld [vmem:[#allocation8 + $0x3c8] sm:$0xf] }
  0xf8   : > { %v2327_v61 = vor.u32 %v2519_v59, %v2326_v56  ;;  %v2296_v56 = vld [vmem:[#allocation8 + $0x398] sm:$0xf0] }
  0xf9   : > { %1401 = vmatpush.bf16.msra.mxu1 %v2143_v58  ;;  %v2299_v60 = vor.u32 %v2509_v49, %v2296_v56  ;;  %v2497_v49 = vld [vmem:[#allocation8 + $0x32c] sm:$0xf]  ;;  %v2102_v56 = vld [vmem:[#allocation8 + $0x208] sm:$0xf] }
  0xfa   : > { %1463 = vmatpush.bf16.msrb.mxu2 %v2327_v61 }
  0xfd   : > { %1402 = vmatpush.bf16.msra.mxu1 %v2127_v9 }
  0xfe   : > { %v902_v52 = vpop.f32.mrf.mxu2  ;;  %1464 = vmatpush.bf16.msrb.mxu2 %v2311_v12  ;;  %v2152_v12 = vld [vmem:[#allocation8 + $0x278] sm:$0xf0] }
  0xff   : > { %v2214_v52 = vld [vmem:[#allocation8 + $0x2e8] sm:$0xf] }
 0x100   : > { %v2215_v58 = vor.u32 %v2491_v53, %v2214_v52  ;;  %v2279_v53 = vor.u32 %v2507_v43, %v2278_v42  ;;  %v2230_v42 = vld [vmem:[#allocation8 + $0x308] sm:$0xf]  ;;  %v2495_v43 = vld [vmem:[#allocation8 + $0x314] sm:$0xf0] }
 0x101   : > { %1403 = vmatpush.bf16.msra.mxu1 %v2111_v27  ;;  %v2823_v27 = vpack.c.bf16 %v997_v19, %v997_v19  ;;  %v2471_v19 = vld [vmem:[#allocation8 + $0x254] sm:$0xf0] }
 0x103   : > { %1418 = vmatmul.bf16.vlgmr.msra.gmra.mxu2 %v2823_v27 }
 0x105   : > { %1404 = vmatpush.bf16.msra.mxu1 %v2095_v46 }
 0x109   : > { %1449 = vmatpush.bf16.msrb.mxu1 %v2215_v58 }
 0x10d   : > { %v2807_v17 = vpop.f32.mrf.mxu0 }
 0x115   : > { %v928_v45 = vpop.f32.mrf.mxu0 }
 0x14d   : > { %v835_v4 = vpop.f32.mrf.mxu1 }
 0x14e   : > { %v836_v8 = vadd.f32 %v835_v4, %v498_v50  ;;  %v2099_v50 = vor.u32 %v2460_v44, %v2096_v47  ;;  %v2198_v4 = vld [vmem:[#allocation8 + $0x2c8] sm:$0xf]  ;;  %v2477_v44 = vld [vmem:[#allocation8 + $0x28c] sm:$0xf] }
 0x14f   : > { %v2199_v9 = vor.u32 %v2487_v5, %v2198_v4 }
 0x150   : > { %v849_v16 = vadd.f32 %v2805_v55, %v836_v8  ;;  %v2240_v55 = vld [vmem:[#allocation8 + $0x330] sm:$0xf0]  ;;  %1430 = vmatpush.bf16.msra.mxu3 %v2099_v50 }
 0x151   : > { %v2243_v37 = vor.u32 %v2496_v33, %v2240_v55  ;;  %1450 = vmatpush.bf16.msrb.mxu1 %v2199_v9  ;;  %v2184_v33 = vld [vmem:[#allocation8 + $0x2b8] sm:$0xf0]  ;;  %v2473_v9 = vld [vmem:[#allocation8 + $0x26c] sm:$0xf] }
 0x152   : > { %v2088_v26 = vmul.f32 -1.442695, %v849_v16 }
 0x153   : > { %v861_v30 = vpop.f32.mrf.mxu3  ;;  %1442 = vmatpush.bf16.msrb.mxu0 %v2243_v37  ;;  %v2312_v37 = vld [vmem:[#allocation8 + $0x3b8] sm:$0xf0] }
 0x154   : > { %2560 = vpow2.f32 %v2088_v26  ;;  %v862_v34 = vadd.f32 %v861_v30, %v499_v18  ;;  %1475 = vmatpush.bf16.msrb.mxu3 %v2219_v0  ;;  %v2182_v18 = vld [vmem:[#allocation8 + $0x2a8] sm:$0xf]  ;;  %v2511_v26 = vld [vmem:[#allocation8 + $0x394] sm:$0xf0]  ;;  %v2315_v41 = vor.u32 %v2513_v36, %v2312_v37  ;;  %v2264_v37 = vld [vmem:[#allocation8 + $0x358] sm:$0xf0] }
 0x155   : > { %v837_v40 = vpop.f32.mrf.mxu1  ;;  %v2183_v30 = vor.u32 %v2483_v24, %v2182_v18  ;;  %v2295_v31 = vor.u32 %v2511_v26, %v2294_v25  ;;  %v2262_v0 = vld [vmem:[#allocation8 + $0x348] sm:$0xf]  ;;  %v2155_v24 = vor.u32 %v2473_v9, %v2152_v12  ;;  %v2283_v25 = vor.u32 %v2505_v13, %v2280_v14 }
 0x156   : > { %v875_v45 = vadd.f32 %v2803_v54, %v862_v34  ;;  %v2521_v54 = vld [vmem:[#allocation8 + $0x3ec] sm:$0xf]  ;;  %v2187_v34 = vor.u32 %v2481_v32, %v2184_v33  ;;  %v2134_v18 = vld [vmem:[#allocation8 + $0x248] sm:$0xf]  ;;  %v2091_v32 = vld [vmem:[%s2946_s4 + $0x4] sm:$0xf] }
 0x157   : > { %1443 = vmatpush.bf16.msrb.mxu0 %v2227_v51  ;;  %v2347_v3 = vor.u32 %v2521_v54, %v2344_v23  ;;  %1451 = vmatpush.bf16.msrb.mxu1 %v2183_v30  ;;  %v2150_v23 = vld [vmem:[#allocation8 + $0x268] sm:$0xf]  ;;  %v2135_v26 = vor.u32 %v2471_v19, %v2134_v18 }
 0x158   : > { %v2089_v57 = vmul.f32 -1.442695, %v875_v45  ;;  %1476 = vmatpush.bf16.msrb.mxu3 %v2203_v20  ;;  %v2168_v45 = vld [vmem:[#allocation8 + $0x298] sm:$0xf0]  ;;  %1465 = vmatpush.bf16.msrb.mxu2 %v2295_v31  ;;  %v2246_v20 = vld [vmem:[#allocation8 + $0x328] sm:$0xf] }
 0x159   : > { %v2171_v59 = vor.u32 %v2477_v44, %v2168_v45  ;;  %v2465_v44 = vld [vmem:[#allocation8 + $0x22c] sm:$0xf] }
 0x15a   : > { %v2561_v63 = vpop.eup %2560  ;;  %2562 = vpow2.f32 %v2089_v57  ;;  %1444 = vmatmul.bf16.vlgmr.msrb.gmra.mxu0 %v2823_v27 }
 0x15b   : > { %v2820_v7 = vadd.f32 1.0, %v2561_v63  ;;  %v863_v8 = vpop.f32.mrf.mxu3  ;;  %1488 = vmatpush.bf16.msra.mxu0 %v2347_v3  ;;  %1452 = vmatpush.bf16.msrb.mxu1 %v2167_v48  ;;  %v2475_v63 = vld [vmem:[#allocation8 + $0x274] sm:$0xf0]  ;;  %v2120_v48 = vld [vmem:[#allocation8 + $0x238] sm:$0xf0] }
 0x15c   : > { %1477 = vmatpush.bf16.msrb.mxu3 %v2187_v34  ;;  %1466 = vmatpush.bf16.msrb.mxu2 %v2279_v53  ;;  %v2151_v6 = vor.u32 %v2475_v63, %v2150_v23  ;;  %v2503_v8 = vld [vmem:[#allocation8 + $0x354] sm:$0xf0]  ;;  %v2501_v34 = vld [vmem:[#allocation8 + $0x34c] sm:$0xf]  ;;  %v2104_v63 = vld [vmem:[#allocation8 + $0x218] sm:$0xf0] }
 0x15d   : > { %2564 = vrcp.f32 %v2820_v7  ;;  %v887_v16 = vpop.f32.mrf.mxu1  ;;  %v945_v40 = vand.u32 2147483648, %v2820_v7  ;;  %v943_v51 = vand.u32 2147483647, %v2820_v7  ;;  %v2263_v11 = vor.u32 %v2503_v8, %v2262_v0  ;;  %v2493_v0 = vld [vmem:[#allocation8 + $0x30c] sm:$0xf] }
 0x15e   : > { %v888_v57 = vadd.f32 %v887_v16, %v500_v28  ;;  %vm939_vm11 = vweird.f32 %v2820_v7  ;;  %v2499_v28 = vld [vmem:[#allocation8 + $0x334] sm:$0xf0]  ;;  %v2267_v35 = vor.u32 %v2501_v34, %v2264_v37  ;;  %v2530_v37 = vld [vmem:[%s2947_s5 + $0x30] sm:$0xff] }
 0x15f   : > { %1489 = vmatpush.bf16.msra.mxu0 %v2331_v21  ;;  %v2838_v62 = vor.u32 1.1754944e-38, %v945_v40  ;;  %vm2842_vm9 = vcmp.eq.f32.partialorder %v943_v51, 8.507059e+37  ;;  %1453 = vmatpush.bf16.msrb.mxu1 %v2151_v6  ;;  %v2247_v33 = vor.u32 %v2499_v28, %v2246_v20  ;;  %v2467_v40 = vld [vmem:[#allocation8 + $0x234] sm:$0xf0] }
 0x160   : > { %v2563_v55 = vpop.eup %2562  ;;  %1478 = vmatpush.bf16.msrb.mxu3 %v2171_v59  ;;  %1467 = vmatpush.bf16.msrb.mxu2 %v2263_v11  ;;  %v2119_v45 = vor.u32 %v2467_v40, %v2118_v38 }
 0x161   : > { %v2827_v39 = vadd.f32 1.0, %v2563_v55  ;;  %v2136_v55 = vld [vmem:[#allocation8 + $0x258] sm:$0xf0] }
 0x163   : > { %v2832_v46 = vpop.eup %2564  ;;  %2566 = vrcp.f32 %v2827_v39  ;;  %v913_v47 = vpop.f32.mrf.mxu3  ;;  %1490 = vmatpush.bf16.msra.mxu0 %v2315_v41  ;;  %v962_v21 = vand.u32 2147483647, %v2827_v39  ;;  %v964_v31 = vand.u32 2147483648, %v2827_v39  ;;  %1454 = vmatpush.bf16.msrb.mxu1 %v2135_v26  ;;  %vm958_vm14 = vweird.f32 %v2827_v39 }
 0x164   : > { %v935_v50 = vmul.f32 %v2832_v46, %v2820_v7  ;;  %v914_v52 = vadd.f32 %v913_v47, %v501_v29  ;;  %vm940_vm10 = vweird.f32 %v2832_v46  ;;  %v2469_v29 = vld [vmem:[#allocation8 + $0x24c] sm:$0xf]  ;;  %1479 = vmatpush.bf16.msrb.mxu3 %v2155_v24  ;;  %1468 = vmatpush.bf16.msrb.mxu2 %v2247_v33  ;;  %v2231_v47 = vor.u32 %v2495_v43, %v2230_v42  ;;  %v2531_v33 = vld [vmem:[%s2947_s5 + $0x38] sm:$0xff] }
 0x165   : > { %v889_v58 = vpop.f32.mrf.mxu1  ;;  %vm2860_vm12 = vmor %vm939_vm11, %vm940_vm10  ;;  %v2139_v36 = vor.u32 %v2469_v29, %v2136_v55  ;;  %vm2871_vm15 = vcmp.eq.f32.partialorder %v962_v21, 8.507059e+37  ;;  %v965_v53 = vor.u32 1.1754944e-38, %v964_v31 }
 0x166   : > { %v936_v61 = vsub.f32 1.0, %v935_v50  ;;  %v927_v54 = vadd.f32 %v2807_v17, %v914_v52  ;;  %v901_v17 = vadd.f32 %v2809_v22, %v888_v57  ;;  %v2248_v50 = vld [vmem:[#allocation8 + $0x338] sm:$0xf0]  ;;  %v2463_v57 = vld [vmem:[#allocation8 + $0x214] sm:$0xf0]  ;;  %v430_v58 = vld [vmem:[#allocation3 + $0x8] sm:$0xff] }
 0x167   : > { %1491 = vmatpush.bf16.msra.mxu0 %v2299_v60  ;;  %1455 = vmatpush.bf16.msrb.mxu1 %v2119_v45  ;;  %v2528_v45 = vld [vmem:[%s2947_s5 + $0x20] sm:$0xff] }
 0x168   : > { %v937_v3 = vmul.f32 %v2832_v46, %v936_v61  ;;  %v2090_v5 = vmul.f32 -1.442695, %v927_v54  ;;  %1480 = vmatpush.bf16.msrb.mxu3 %v2139_v36  ;;  %v2251_v61 = vor.u32 %v2497_v49, %v2248_v50  ;;  %v2461_v54 = vld [vmem:[#allocation8 + $0x20c] sm:$0xf]  ;;  %1469 = vmatpush.bf16.msrb.mxu2 %v2231_v47  ;;  %v1069_v36 = vperm.slane %v2091_v32, 0  ;;  %v2527_v50 = vld [vmem:[%s2947_s5 + $0x18] sm:$0xff] }
 0x169   : > { %v2846_v10 = vpop.eup %2566  ;;  %v2107_v9 = vor.u32 %v2461_v54, %v2104_v63 }
 0x16a   : > { %v954_v15 = vmul.f32 %v2846_v10, %v2827_v39  ;;  %v938_v16 = vadd.f32 %v2832_v46, %v937_v3  ;;  %2568 = vpow2.f32 %v2090_v5  ;;  %vm959_vm13 = vweird.f32 %v2846_v10  ;;  %v2232_v3 = vld [vmem:[#allocation8 + $0x318] sm:$0xf0] }
 0x16b   : > { %v915_v22 = vpop.f32.mrf.mxu3  ;;  %2570 = vtanh.f32 %v901_v17  ;;  %1492 = vmatpush.bf16.msra.mxu0 %v2283_v25  ;;  %vm960_vm0 = vmor %vm958_vm14, %vm959_vm13  ;;  %v2123_v39 = vor.u32 %v2465_v44, %v2120_v48  ;;  %v2235_v17 = vor.u32 %v2493_v0, %v2232_v3  ;;  %1470 = vmatmul.bf16.vlgmr.msrb.gmra.mxu2 %v2823_v27 }
 0x16c   : > { %v955_v30 = vsub.f32 1.0, %v954_v15  ;;  %v942_v7 = vsel %vm2860_vm12, %v2832_v46, %v938_v16 }
 0x16d   : > { %v947_v59 = vsel %vm2842_vm9, %v2838_v62, %v942_v7  ;;  %v2103_v62 = vor.u32 %v2463_v57, %v2102_v56  ;;  %1481 = vmatpush.bf16.msrb.mxu3 %v2123_v39  ;;  %v1070_v7 = vperm.slane %v2091_v32, 1  ;;  %v2525_v57 = vld [vmem:[%s2947_s5 + $0x8] sm:$0xff]  ;;  %v1071_v39 = vperm.slane %v2091_v32, 2 }
 0x16e   : > { %v956_v41 = vmul.f32 %v2846_v10, %v955_v30 }
 0x16f   : > { %1493 = vmatpush.bf16.msra.mxu0 %v2267_v35  ;;  %1456 = vmatpush.bf16.msrb.mxu1 %v2103_v62  ;;  %v2529_v35 = vld [vmem:[%s2947_s5 + $0x28] sm:$0xff] }
 0x170   : > { %v2569_v51 = vpop.eup %2568  ;;  %v957_v52 = vadd.f32 %v2846_v10, %v956_v41 }
 0x171   : > { %v972_v60 = vadd.f32 1.0, %v2569_v51  ;;  %v2571_v5 = vpop.eup %2570  ;;  %1482 = vmatpush.bf16.msrb.mxu3 %v2107_v9 }
 0x172   : > { %v961_v23 = vsel %vm960_vm0, %v2846_v10, %v957_v52  ;;  %v989_v8 = vmul.f32 %v2571_v5, %v947_v59  ;;  %v1072_v59 = vperm.slane %v2091_v32, 3 }
 0x173   : > { %v966_v6 = vsel %vm2871_vm15, %v965_v53, %v961_v23  ;;  %2572 = vrcp.f32 %v972_v60  ;;  %1494 = vmatpush.bf16.msra.mxu0 %v2251_v61  ;;  %v984_v14 = vand.u32 2147483648, %v972_v60  ;;  %v982_v16 = vand.u32 2147483647, %v972_v60  ;;  %v2526_v53 = vld [vmem:[%s2947_s5 + $0x10] sm:$0xff]  ;;  %v2524_v61 = vld [vmem:[%s2947_s5] sm:$0xff] }
 0x174   : > { %v988_v4 = vmul.f32 %v966_v6, %v430_v58  ;;  %vm978_vm2 = vweird.f32 %v972_v60 }
 0x175   : > { %v985_v19 = vor.u32 1.1754944e-38, %v984_v14  ;;  %vm983_vm4 = vcmp.eq.f32.partialorder %v982_v16, 8.507059e+37 }
 0x176   : > { %v990_v11 = vadd.f32 %v989_v8, %v988_v4 }
 0x177   : > { %1495 = vmatpush.bf16.msra.mxu0 %v2235_v17 }
 0x178   : > { %994 = vst [vmem:[#allocation3 + $0x8] sm:$0xff] %v990_v11  ;;  %2574 = vtanh.f32 %v990_v11 }
 0x179   : > { %v2573_v10 = vpop.eup %2572 }
 0x17a   : > { %v974_v12 = vmul.f32 %v2573_v10, %v972_v60  ;;  %1496 = vmatmul.bf16.vlgmr.msra.gmra.mxu0 %v2823_v27  ;;  %vm979_vm1 = vweird.f32 %v2573_v10 }
 0x17b   : > { %vm980_vm3 = vmor %vm978_vm2, %vm979_vm1 }
 0x17c   : > { %v975_v13 = vsub.f32 1.0, %v974_v12 }
 0x17e   : > { %v976_v15 = vmul.f32 %v2573_v10, %v975_v13  ;;  %v2575_v21 = vpop.eup %2574 }
 0x180   : > { %v977_v18 = vadd.f32 %v2573_v10, %v976_v15 }
 0x182   : > { %v981_v20 = vsel %vm980_vm3, %v2573_v10, %v977_v18  ;;  %vm1674_vm3 = vcmp.eq.s32.totalorder %v2741_v1, 0 }
 0x183   : > { %v986_v22 = vsel %vm983_vm4, %v985_v19, %v981_v20  ;;  %vm1679_vm4 = vcmp.eq.s32.totalorder %v2741_v1, 1 }
 0x184   : > { %v992_v24 = vmul.f32 %v2575_v21, %v986_v22 }
 0x186   : > { %993 = vst [vmem:[#allocation2] sm:$0xff] %v992_v24  ;;  %v995_v25 = vpack.c.bf16 %v992_v24, %v992_v24  ;;  %v1419_v26 = vpop.f32.mrf.mxu2 }
 0x188   : > { %1405 = vmatmul.bf16.vlgmr.msra.gmra.mxu1 %v995_v25  ;;  %1431 = vmatmul.bf16.vlgmr.msra.gmra.mxu3 %v995_v25 }
 0x189   : > { %1635 = vmatpush.bf16.msra.mxu1 %v2531_v33 }
 0x18d   : > { %1636 = vmatpush.bf16.msra.mxu1 %v2530_v37 }
 0x18e   : > { %v1421_v29 = vpop.f32.mrf.mxu2 }
 0x191   : > { %1637 = vmatpush.bf16.msra.mxu1 %v2529_v35 }
 0x195   : > { %1638 = vmatpush.bf16.msra.mxu1 %v2528_v45 }
 0x198   : > { %1457 = vmatmul.bf16.vlgmr.msrb.gmra.mxu1 %v995_v25  ;;  %1483 = vmatmul.bf16.vlgmr.msrb.gmra.mxu3 %v995_v25  ;;  %v999_v25 = vld [vmem:[#allocation3] sm:$0xff] }
 0x199   : > { %1639 = vmatpush.bf16.msra.mxu1 %v2527_v50 }
 0x19d   : > { %1640 = vmatpush.bf16.msra.mxu1 %v2526_v53 }
 0x1a1   : > { %1641 = vmatpush.bf16.msra.mxu1 %v2525_v57 }
 0x1a5   : > { %1642 = vmatpush.bf16.msra.mxu1 %v2524_v61 }
 0x1d7   : > { %v1445_v27 = vpop.f32.mrf.mxu0 }
 0x1df   : > { %v1447_v28 = vpop.f32.mrf.mxu0 }
 0x1ee   : > { %v1471_v31 = vpop.f32.mrf.mxu2 }
 0x1f6   : > { %v1473_v34 = vpop.f32.mrf.mxu2 }
 0x1f7   : > { %v1497_v30 = vpop.f32.mrf.mxu0 }
 0x1ff   : > { %v1499_v55 = vpop.f32.mrf.mxu0 }
 0x205   : > { %v1406_v38 = vpop.f32.mrf.mxu1 }
 0x206   : > { %v1407_v40 = vadd.f32 %v1406_v38, %v1069_v36 }
 0x208   : > { %v1420_v41 = vadd.f32 %v1419_v26, %v1407_v40 }
 0x20a   : > { %v2348_v42 = vmul.f32 -1.442695, %v1420_v41 }
 0x20b   : > { %v1432_v43 = vpop.f32.mrf.mxu3 }
 0x20c   : > { %2576 = vpow2.f32 %v2348_v42  ;;  %v1433_v44 = vadd.f32 %v1432_v43, %v1070_v7 }
 0x20d   : > { %v1408_v47 = vpop.f32.mrf.mxu1 }
 0x20e   : > { %v1446_v48 = vadd.f32 %v1445_v27, %v1433_v44 }
 0x210   : > { %v2349_v49 = vmul.f32 -1.442695, %v1446_v48  ;;  %v2559_v48 = vld [vmem:[%s2948_s6] ss:$0 sm:$0xff] }
 0x212   : > { %v2577_v51 = vpop.eup %2576  ;;  %2578 = vpow2.f32 %v2349_v49 }
 0x213   : > { %v1504_v52 = vadd.f32 1.0, %v2577_v51  ;;  %v1434_v46 = vpop.f32.mrf.mxu3 }
 0x215   : > { %2580 = vrcp.f32 %v1504_v52  ;;  %v1458_v56 = vpop.f32.mrf.mxu1  ;;  %v1516_v12 = vand.u32 2147483648, %v1504_v52  ;;  %vm1510_vm6 = vweird.f32 %v1504_v52  ;;  %v1514_v15 = vand.u32 2147483647, %v1504_v52 }
 0x216   : > { %v1459_v3 = vadd.f32 %v1458_v56, %v1071_v39  ;;  %v1677_v39 = vstv %s1676_s28 }
 0x217   : > { %v1517_v21 = vor.u32 1.1754944e-38, %v1516_v12  ;;  %vm1515_vm10 = vcmp.eq.f32.partialorder %v1514_v15, 8.507059e+37  ;;  %v1712_v12 = vstv %s1711_s1  ;;  %v1718_v15 = vstv %s1717_s22 }
 0x218   : > { %v2579_v58 = vpop.eup %2578  ;;  %v1472_v17 = vadd.f32 %v1471_v31, %v1459_v3 }
 0x219   : > { %v1523_v60 = vadd.f32 1.0, %v2579_v58 }
 0x21b   : > { %v2581_v54 = vpop.eup %2580  ;;  %2582 = vrcp.f32 %v1523_v60  ;;  %v1484_v23 = vpop.f32.mrf.mxu3  ;;  %v1535_v16 = vand.u32 2147483648, %v1523_v60  ;;  %v1533_v20 = vand.u32 2147483647, %v1523_v60  ;;  %vm1529_vm9 = vweird.f32 %v1523_v60 }
 0x21c   : > { %v1506_v63 = vmul.f32 %v2581_v54, %v1504_v52  ;;  %v1485_v0 = vadd.f32 %v1484_v23, %v1072_v59  ;;  %vm1511_vm5 = vweird.f32 %v2581_v54 }
 0x21d   : > { %v1460_v5 = vpop.f32.mrf.mxu1  ;;  %vm1512_vm7 = vmor %vm1510_vm6, %vm1511_vm5  ;;  %v1536_v26 = vor.u32 1.1754944e-38, %v1535_v16  ;;  %vm1534_vm12 = vcmp.eq.f32.partialorder %v1533_v20, 8.507059e+37  ;;  %vm1685_vm5 = vcmp.eq.s32.totalorder %v2741_v1, 2  ;;  %vm1691_vm6 = vcmp.eq.s32.totalorder %v2741_v1, 3 }
 0x21e   : > { %v1507_v6 = vsub.f32 1.0, %v1506_v63  ;;  %v1498_v62 = vadd.f32 %v1497_v30, %v1485_v0  ;;  %v1688_v63 = vstv %s1687_s11  ;;  %v1694_v5 = vstv %s1693_s13 }
 0x21f   : > { %v1689_v3 = vsel %vm1685_vm5, %v1688_v63, 0 }
 0x220   : > { %v1508_v4 = vmul.f32 %v2581_v54, %v1507_v6  ;;  %v2350_v8 = vmul.f32 -1.442695, %v1498_v62  ;;  %v1695_v62 = vsel %vm1691_vm6, %v1694_v5, 0 }
 0x221   : > { %v2583_v9 = vpop.eup %2582 }
 0x222   : > { %v1525_v11 = vmul.f32 %v2583_v9, %v1523_v60  ;;  %v1509_v10 = vadd.f32 %v2581_v54, %v1508_v4  ;;  %2584 = vpow2.f32 %v2350_v8  ;;  %vm1530_vm8 = vweird.f32 %v2583_v9 }
 0x223   : > { %v1486_v13 = vpop.f32.mrf.mxu3  ;;  %2586 = vtanh.f32 %v1472_v17  ;;  %vm1531_vm11 = vmor %vm1529_vm9, %vm1530_vm8  ;;  %v1700_v4 = vstv %s1699_s15  ;;  %vm1703_vm8 = vcmp.eq.s32.totalorder %v2741_v1, 5  ;;  %v1706_v17 = vstv %s1705_s0 }
 0x224   : > { %v1526_v14 = vsub.f32 1.0, %v1525_v11  ;;  %v1513_v19 = vsel %vm1512_vm7, %v2581_v54, %v1509_v10  ;;  %v1678_v54 = vsel %vm1674_vm3, %v1677_v39, 0  ;;  %vm1697_vm7 = vcmp.eq.s32.totalorder %v2741_v1, 4 }
 0x225   : > { %v1518_v27 = vsel %vm1515_vm10, %v1517_v21, %v1513_v19  ;;  %v1707_v10 = vsel %vm1703_vm8, %v1706_v17, 0  ;;  %vm1709_vm9 = vcmp.eq.s32.totalorder %v2741_v1, 6  ;;  %vm1715_vm10 = vcmp.eq.s32.totalorder %v2741_v1, 7 }
 0x226   : > { %v1527_v18 = vmul.f32 %v2583_v9, %v1526_v14  ;;  %v1713_v14 = vsel %vm1709_vm9, %v1712_v12, 0 }
 0x228   : > { %v2585_v22 = vpop.eup %2584  ;;  %v1528_v24 = vadd.f32 %v2583_v9, %v1527_v18  ;;  %v1719_v18 = vsel %vm1715_vm10, %v1718_v15, 0 }
 0x229   : > { %v1543_v28 = vadd.f32 1.0, %v2585_v22  ;;  %v2587_v30 = vpop.eup %2586 }
 0x22a   : > { %v1532_v29 = vsel %vm1531_vm11, %v2583_v9, %v1528_v24  ;;  %v1560_v33 = vmul.f32 %v2587_v30, %v1518_v27  ;;  %v1701_v9 = vsel %vm1697_vm7, %v1700_v4, 0 }
 0x22b   : > { %v1537_v31 = vsel %vm1534_vm12, %v1536_v26, %v1532_v29  ;;  %2588 = vrcp.f32 %v1543_v28  ;;  %v1555_v38 = vand.u32 2147483648, %v1543_v28  ;;  %v1553_v41 = vand.u32 2147483647, %v1543_v28 }
 0x22c   : > { %v1559_v32 = vmul.f32 %v1537_v31, %v999_v25  ;;  %vm1549_vm14 = vweird.f32 %v1543_v28  ;;  %v2666_v25 = vmov 0.0   ;;  %v1724_v26 = vstv %s1673_s19 }
 0x22d   : > { %v1556_v35 = vor.u32 1.1754944e-38, %v1555_v38  ;;  %vm1554_vm0 = vcmp.eq.f32.partialorder %v1553_v41, 8.507059e+37  ;;  %v1727_v29 = vstv %s1726_s24 }
 0x22e   : > { %v1561_v55 = vadd.f32 %v1560_v33, %v1559_v32 }
 0x230   : > { %1565 = vst [vmem:[#allocation3] sm:$0xff] %v1561_v55  ;;  %2590 = vtanh.f32 %v1561_v55 }
 0x231   : > { %v2589_v34 = vpop.eup %2588 }
 0x232   : > { %v1545_v36 = vmul.f32 %v2589_v34, %v1543_v28  ;;  %vm1550_vm13 = vweird.f32 %v2589_v34 }
 0x233   : > { %vm1551_vm15 = vmor %vm1549_vm14, %vm1550_vm13 }
 0x234   : > { %v1546_v37 = vsub.f32 1.0, %v1545_v36 }
 0x236   : > { %v1547_v40 = vmul.f32 %v2589_v34, %v1546_v37  ;;  %v2591_v43 = vpop.eup %2590 }
 0x238   : > { %v1548_v7 = vadd.f32 %v2589_v34, %v1547_v40 }
 0x23a   : > { %v1552_v42 = vsel %vm1551_vm15, %v2589_v34, %v1548_v7 }
 0x23b   : > { %v1557_v44 = vsel %vm1554_vm0, %v1556_v35, %v1552_v42 }
 0x23c   : > { %v1563_v45 = vmul.f32 %v2591_v43, %v1557_v44 }
 0x23e   : > { %1564 = vst [vmem:[#allocation2 + $0x8] sm:$0xff] %v1563_v45  ;;  %v1566_v47 = vpack.c.bf16 %v1563_v45, %v1563_v45 }
 0x240   : > { %1643 = vmatmul.bf16.vlgmr.msra.gmra.mxu1 %v1566_v47 }
 0x2bd   : > { %v1644_v49 = vpop.f32.mrf.mxu1 }
 0x2be   : > { %v1645_v50 = vadd.f32 %v2559_v48, %v1644_v49 }
 0x2c0   : > { %1648 = vst [vmem:[%s2748_s29] sm:$0xff] %v1645_v50  ;;  %1649 = vmax.xlane.f32.xlu0 %v1645_v50  ;;  %s1680_s29 = sadd.s32 1, %s2918_s27 }
 0x2c1   : > { %s1681_s30 = sld [smem:[#allocation6 + %s1680_s29]] }
 0x2c5   : > { %v1646_v51 = vpop.f32.mrf.mxu1 }
 0x2c7   : > { %v1682_v61 = vstv %s1681_s30 }
 0x2c8   : > { %v1683_v23 = vsel %vm1679_vm4, %v1682_v61, 0 }
 0x2c9   : > { %v1684_v0 = vadd.s32 %v1683_v23, %v1678_v54 }
 0x2cb   : > { %v1690_v6 = vadd.s32 %v1689_v3, %v1684_v0 }
 0x2cd   : > { %v1696_v8 = vadd.s32 %v1695_v62, %v1690_v6 }
 0x2cf   : > { %v1702_v11 = vadd.s32 %v1701_v9, %v1696_v8 }
 0x2d1   : > { %v1708_v13 = vadd.s32 %v1707_v10, %v1702_v11 }
 0x2d3   : > { %v1714_v16 = vadd.s32 %v1713_v14, %v1708_v13 }
 0x2d5   : > { %v1720_v19 = vadd.s32 %v1719_v18, %v1714_v16 }
 0x2d7   : > { %vm1721_vm11 = vcmp.eq.s32.totalorder %v2743_v2, %v1720_v19 }
 0x2d8   : > { %v2385_v27 = vsel %vm1721_vm11, 1.0, %v2666_v25 }
 0x2d9   : > { %v1725_v30 = vmul.f32 %v2385_v27, %v1724_v26 }
 0x333   : > { %v1650_v52 = vpop.xlane.xlu0 %1649 }
 0x334   : > { %vm1651_vm1 = vcmp.ge.f32.partialorder %v1645_v50, %v1650_v52 }
 0x335   : > { %v1652_v46 = vsel %vm1651_vm1, %v2743_v2, 128 }
 0x336   : > { %v1654_v53 = vshra.s32 %v1652_v46, 16  ;;  %v1653_v57 = vand.u32 65535, %v1652_v46 }
 0x338   : > { %v1656_v56 = vcvt.s32.f32 %v1654_v53  ;;  %v1655_v59 = vcvt.s32.f32 %v1653_v57 }
 0x33a   : > { %1657 = vmin.xlane.f32.xlu0 %v1656_v56 }
 0x3ad   : > { %v1658_v58 = vpop.xlane.xlu0 %1657 }
 0x3ae   : > { %vm1659_vm2 = vcmp.eq.f32.partialorder %v1656_v56, %v1658_v58  ;;  %v1664_v20 = vcvt.f32.s32 %v1658_v58 }
 0x3af   : > { %v1660_v60 = vsel %vm1659_vm2, %v1655_v59, inf }
 0x3b0   : > { %1661 = vmin.xlane.f32.xlu1 %v1660_v60  ;;  %v1665_v22 = vshll.u32 %v1664_v20, 16 }
 0x423   : > { %v1662_v21 = vpop.xlane.xlu1 %1661 }
 0x424   : > { %v1663_v24 = vcvt.f32.s32 %v1662_v21 }
 0x426   : > { %v1666_v28 = vadd.s32 %v1665_v22, %v1663_v24 }
 0x428   : > { %vm1667_vm12 = vcmp.eq.s32.totalorder %v2743_v2, %v1666_v28 }
 0x429   : > { %v2383_v1 = vsel %vm1667_vm12, 1.0, %v2666_v25 }
 0x42a   : > { %v1728_v31 = vmul.f32 %v2383_v1, %v1727_v29 }
 0x42c   : > { %v1729_v32 = vadd.f32 %v1728_v31, %v1725_v30 }
 0x42e   : > { %1730 = vst [vmem:[#allocation4] sm:$0xff] %v1729_v32 }
 0x42f PF: > { %s33_s17 = sadd.s32 1, %s2658_s17  }
 0x430   : > { %p30_p9 = scmp.ge.s32.totalorder %s33_s17, 9  }
 0x432   :  { %32 = sbr.rel (!%p30_p9) target bundleno = 8 (0x8), region = 88 }
 0x437   :  { %1750 = vsyncpa [#allocation9], 1 }
 0x438   :  { %1752 = vsyncpa [#allocation9 + $0x1], 1 }

</bundles_post_ra>
